<compile_context>
chip_gen: v7x
topology: tpu7x:2x2x1
jax: 0.10.0
libtpu: 0.0.40
codegen_flags: <defaults>
</compile_context>

<pallas_src>
import functools
import math

import jax
import jax.numpy as jnp
from jax.experimental import pallas as pl
from jax.experimental.pallas import tpu as pltpu


# ----------------------------------------------------------------------------
# Fused Pallas kernel: one grid step == one image's full (truncated) forward
# ----------------------------------------------------------------------------

def _eva_fused_kernel(p_ref, pw_ref, aux_ref,
                      ln1g_ref, ln1b_ref, qkvw_ref, qkvb_ref,
                      projw_ref, projb_ref,
                      ln2g_ref, ln2b_ref,
                      w1_ref, b1_ref, w2_ref, b2_ref,
                      ln3g_ref, ln3b_ref,
                      w3_ref, b3_ref,
                      o_ref, *, num_heads, num_blocks, eps, out_start):
    f32 = jnp.float32
    bf16 = jnp.bfloat16

    def layer_norm(x, g, b):
        mu = jnp.mean(x, axis=-1, keepdims=True)
        xc = x - mu
        var = jnp.mean(xc * xc, axis=-1, keepdims=True)
        return xc * jax.lax.rsqrt(var + eps) * g + b

    def silu(x):
        # exp + approximate reciprocal -> EUP slot, no VPU divide chain.
        return x * pl.reciprocal(1.0 + jnp.exp(-x), approx=True)

    # ---- patch embedding ----
    # p_ref[0] is [T, 128] (im2col lanes zero-padded, zero CLS row prepended);
    # `aux` already carries (cls_token | conv_bias) + pos_embed, so one
    # lane-dense [T, D] f32 slab comes out of the bf16 matmul + add.
    x = jnp.dot(p_ref[0].astype(bf16), pw_ref[...],
                preferred_element_type=f32) + aux_ref[...]
    tokens, dim = x.shape
    dh = dim // num_heads

    def split_heads(mat):
        # [T, D] -> [H, T, dh] via static lane slices stacked along a new
        # leading (batch) axis -- no lane-splitting 3-D reshape/relayout.
        return jnp.stack(
            [mat[:, h * dh:(h + 1) * dh] for h in range(num_heads)], axis=0)

    # ---- transformer blocks (only the ones feeding select_layer) ----
    for i in range(num_blocks):
        # -- attention branch (head-batched) --
        h = layer_norm(x, ln1g_ref[i], ln1b_ref[i])
        qkv = (jnp.dot(h.astype(bf16), qkvw_ref[i],
                       preferred_element_type=f32)
               + qkvb_ref[i]).astype(bf16)           # [T, 3D], scale pre-folded
        qh = split_heads(qkv[:, 0:dim])              # [H, T, dh] bf16
        kh = split_heads(qkv[:, dim:2 * dim])
        vh = split_heads(qkv[:, 2 * dim:3 * dim])

        # one batched score matmul + ONE softmax pass over all heads
        s = jnp.einsum('htd,hsd->hts', qh, kh,
                       preferred_element_type=f32)   # [H, T, T] f32
        s = s - jnp.max(s, axis=-1, keepdims=True)
        p = jnp.exp(s)
        p = p * pl.reciprocal(jnp.sum(p, axis=-1, keepdims=True), approx=True)

        o = jnp.einsum('hts,hsd->htd', p.astype(bf16), vh,
                       preferred_element_type=f32)   # [H, T, dh] f32
        # Head merge folded into the output projection: batched matmul with
        # per-head projection slabs, then a cheap sum over the leading axis.
        contrib = jnp.einsum('htd,hdk->htk', o.astype(bf16), projw_ref[i],
                             preferred_element_type=f32)   # [H, T, D]
        x = x + jnp.sum(contrib, axis=0) + projb_ref[i]

        # -- SwiGLU MLP branch (with EVA02 sub-LayerNorm before w3) --
        h = layer_norm(x, ln2g_ref[i], ln2b_ref[i])
        h_bf = h.astype(bf16)
        h1 = jnp.dot(h_bf, w1_ref[i], preferred_element_type=f32) + b1_ref[i]
        h2 = jnp.dot(h_bf, w2_ref[i], preferred_element_type=f32) + b2_ref[i]
        g = layer_norm(silu(h1) * h2, ln3g_ref[i], ln3b_ref[i])
        x = x + jnp.dot(g.astype(bf16), w3_ref[i],
                        preferred_element_type=f32) + b3_ref[i]

    # Emit only the tokens the tower actually returns (patch-only when
    # select_feature == "patch"): 16 rows -> sublane-aligned, unmasked stores.
    o_ref[0] = x[out_start:, :].astype(o_ref.dtype)


# ----------------------------------------------------------------------------
# Model definition (synthetic EVA02-style ViT) + wrapper
# ----------------------------------------------------------------------------

class Config:
    image_size = 16
    patch_size = 4
    in_chans = 3
    embed_dim = 128            # lane-dense (one full 128-lane vreg row)
    num_heads = 4
    mlp_hidden = 256
    depth = 3
    select_layer = -2          # penultimate block's hidden states
    select_feature = "patch"   # drop CLS token


def build_params(key, cfg):
    D = cfg.embed_dim
    P = cfg.patch_size
    C = cfg.in_chans
    Hd = cfg.mlp_hidden
    n = cfg.depth
    T = (cfg.image_size // P) ** 2 + 1

    def nrm(k, shape, scale=0.02):
        return (scale * jax.random.normal(k, shape)).astype(jnp.float32)

    keys = jax.random.split(key, 8)
    return {
        "patch_w": nrm(keys[0], (C * P * P, D)),   # conv weight, (c,ph,pw)-major
        "patch_b": jnp.zeros((1, D), jnp.float32),
        "cls_token": nrm(keys[1], (1, D)),
        "pos_embed": nrm(keys[2], (T, D)),
        # per-block params stacked along a leading "block" axis
        "ln1_g": jnp.ones((n, 1, D), jnp.float32),
        "ln1_b": jnp.zeros((n, 1, D), jnp.float32),
        "qkv_w": nrm(keys[3], (n, D, 3 * D)),
        "qkv_b": jnp.zeros((n, 1, 3 * D), jnp.float32),
        "proj_w": nrm(keys[4], (n, D, D)),
        "proj_b": jnp.zeros((n, 1, D), jnp.float32),
        "ln2_g": jnp.ones((n, 1, D), jnp.float32),
        "ln2_b": jnp.zeros((n, 1, D), jnp.float32),
        "w1": nrm(keys[5], (n, D, Hd)),
        "b1": jnp.zeros((n, 1, Hd), jnp.float32),
        "w2": nrm(keys[6], (n, D, Hd)),
        "b2": jnp.zeros((n, 1, Hd), jnp.float32),
        "ln3_g": jnp.ones((n, 1, Hd), jnp.float32),   # SwiGLU sub-LN
        "ln3_b": jnp.zeros((n, 1, Hd), jnp.float32),
        "w3": nrm(keys[7], (n, Hd, D)),
        "b3": jnp.zeros((n, 1, D), jnp.float32),
    }


def num_blocks_to_run(cfg):
    # select_layer = -2  ==>  the last block's output is never used; skip it.
    n_run = (cfg.depth + cfg.select_layer + 1 if cfg.select_layer < 0
             else cfg.select_layer + 1)
    assert 1 <= n_run <= cfg.depth
    return n_run


def prepare_kernel_params(params, cfg):
    """One-time host-side weight transforms:
       * truncate per-block stacks to the blocks feeding select_layer,
       * fold the 1/sqrt(dh) attention scale into the Q columns of qkv_w/b,
       * reshape proj_w to per-head [n, H, dh, D] for the batched head merge,
       * pad the patch-embed weight rows to a 128-lane boundary,
       * precompute aux = (cls | conv_bias) + pos_embed,
       * cast all matmul weights to bf16 (biases / LN params stay f32)."""
    D, nH = cfg.embed_dim, cfg.num_heads
    dh = D // nH
    scale = 1.0 / math.sqrt(dh)
    n_run = num_blocks_to_run(cfg)
    bf16 = jnp.bfloat16

    def sl(a):
        return a[:n_run]

    qkv_w = sl(params["qkv_w"])
    qkv_b = sl(params["qkv_b"])
    qkv_w = jnp.concatenate([qkv_w[..., :D] * scale, qkv_w[..., D:]], axis=-1)
    qkv_b = jnp.concatenate([qkv_b[..., :D] * scale, qkv_b[..., D:]], axis=-1)
    proj_w = sl(params["proj_w"]).reshape(n_run, nH, dh, D)

    CPP = params["patch_w"].shape[0]
    cpp_pad = (-CPP) % 128
    patch_w = jnp.pad(params["patch_w"], ((0, cpp_pad), (0, 0)))

    T = params["pos_embed"].shape[0]
    aux = params["pos_embed"] + jnp.concatenate(
        [params["cls_token"],
         jnp.broadcast_to(params["patch_b"], (T - 1, D))], axis=0)

    return {
        "patch_w": patch_w.astype(bf16),
        "aux": aux,
        "ln1_g": sl(params["ln1_g"]), "ln1_b": sl(params["ln1_b"]),
        "qkv_w": qkv_w.astype(bf16), "qkv_b": qkv_b,
        "proj_w": proj_w.astype(bf16), "proj_b": sl(params["proj_b"]),
        "ln2_g": sl(params["ln2_g"]), "ln2_b": sl(params["ln2_b"]),
        "w1": sl(params["w1"]).astype(bf16), "b1": sl(params["b1"]),
        "w2": sl(params["w2"]).astype(bf16), "b2": sl(params["b2"]),
        "ln3_g": sl(params["ln3_g"]), "ln3_b": sl(params["ln3_b"]),
        "w3": sl(params["w3"]).astype(bf16), "b3": sl(params["b3"]),
    }


def _extract_patches(images, patch):
    # images: [B, C, H, W] (NCHW, like PyTorch) -> [B, N, C*P*P]
    B, C, H, W = images.shape
    Hp, Wp = H // patch, W // patch
    x = images.reshape(B, C, Hp, patch, Wp, patch)
    x = jnp.transpose(x, (0, 2, 4, 1, 3, 5))          # [B, Hp, Wp, C, P, P]
    return x.reshape(B, Hp * Wp, C * patch * patch)


def eva02_forward(prepped, images, cfg):
    D = cfg.embed_dim
    nH = cfg.num_heads
    Hd = cfg.mlp_hidden
    P = cfg.patch_size
    dh = D // nH
    n_run = prepped["qkv_w"].shape[0]
    cpp_total = prepped["patch_w"].shape[0]            # 128-lane padded

    # ---- host-side glue: im2col + zero CLS row + zero lane padding ----
    patches = _extract_patches(images.astype(jnp.float32), P)   # [B, Np, CPP]
    B, Np, CPP = patches.shape
    T = Np + 1
    patches = jnp.pad(patches, ((0, 0), (1, 0), (0, cpp_total - CPP)))

    out_start = 1 if cfg.select_feature == "patch" else 0   # drop CLS in-kernel
    T_out = T - out_start

    def const_spec(shape):           # full-array block, same for every image
        return pl.BlockSpec(shape, lambda b: (0,) * len(shape))

    kernel = functools.partial(
        _eva_fused_kernel, num_heads=nH, num_blocks=n_run, eps=1e-6,
        out_start=out_start)

    return pl.pallas_call(
        kernel,
        out_shape=jax.ShapeDtypeStruct((B, T_out, D), jnp.float32),
        grid=(B,),
        in_specs=[
            pl.BlockSpec((1, T, cpp_total), lambda b: (b, 0, 0)),   # patches
            const_spec((cpp_total, D)),                             # patch_w
            const_spec((T, D)),                                     # aux
            const_spec((n_run, 1, D)), const_spec((n_run, 1, D)),          # ln1
            const_spec((n_run, D, 3 * D)), const_spec((n_run, 1, 3 * D)),  # qkv
            const_spec((n_run, nH, dh, D)), const_spec((n_run, 1, D)),     # proj
            const_spec((n_run, 1, D)), const_spec((n_run, 1, D)),          # ln2
            const_spec((n_run, D, Hd)), const_spec((n_run, 1, Hd)),        # w1/b1
            const_spec((n_run, D, Hd)), const_spec((n_run, 1, Hd)),        # w2/b2
            const_spec((n_run, 1, Hd)), const_spec((n_run, 1, Hd)),        # ln3
            const_spec((n_run, Hd, D)), const_spec((n_run, 1, D)),         # w3/b3
        ],
        out_specs=pl.BlockSpec((1, T_out, D), lambda b: (b, 0, 0)),
        compiler_params=pltpu.CompilerParams(
            dimension_semantics=("parallel",)),
    )(patches, prepped["patch_w"], prepped["aux"],
      prepped["ln1_g"], prepped["ln1_b"],
      prepped["qkv_w"], prepped["qkv_b"],
      prepped["proj_w"], prepped["proj_b"],
      prepped["ln2_g"], prepped["ln2_b"],
      prepped["w1"], prepped["b1"],
      prepped["w2"], prepped["b2"],
      prepped["ln3_g"], prepped["ln3_b"],
      prepped["w3"], prepped["b3"])


# ----------------------------------------------------------------------------
# Driver
# ----------------------------------------------------------------------------

if __name__ == "__main__":
    cfg = Config()
    key = jax.random.PRNGKey(0)
    pkey, xkey = jax.random.split(key)

    params = build_params(pkey, cfg)
    prepped = prepare_kernel_params(params, cfg)     # one-time weight transforms
    images = jax.random.normal(
        xkey, (2, cfg.in_chans, cfg.image_size, cfg.image_size),
        dtype=jnp.float32)

    fwd = jax.jit(functools.partial(eva02_forward, cfg=cfg))
    out = fwd(prepped, images)
    jax.block_until_ready(out)

    expected_tokens = (cfg.image_size // cfg.patch_size) ** 2
    assert out.shape == (2, expected_tokens, cfg.embed_dim), out.shape
    assert bool(jnp.all(jnp.isfinite(out)))
    print("KERNEL_OK")
</pallas_src>

<mosaic_0001>
module attributes {stable_mosaic.version = 11 : i64} {
  func.func @_eva_fused_kernel(%arg0: i32, %arg1: memref<1x17x128xf32, #tpu.memory_space<vmem>>, %arg2: memref<128x128xbf16, #tpu.memory_space<vmem>>, %arg3: memref<17x128xf32, #tpu.memory_space<vmem>>, %arg4: memref<2x1x128xf32, #tpu.memory_space<vmem>>, %arg5: memref<2x1x128xf32, #tpu.memory_space<vmem>>, %arg6: memref<2x128x384xbf16, #tpu.memory_space<vmem>>, %arg7: memref<2x1x384xf32, #tpu.memory_space<vmem>>, %arg8: memref<2x4x32x128xbf16, #tpu.memory_space<vmem>>, %arg9: memref<2x1x128xf32, #tpu.memory_space<vmem>>, %arg10: memref<2x1x128xf32, #tpu.memory_space<vmem>>, %arg11: memref<2x1x128xf32, #tpu.memory_space<vmem>>, %arg12: memref<2x128x256xbf16, #tpu.memory_space<vmem>>, %arg13: memref<2x1x256xf32, #tpu.memory_space<vmem>>, %arg14: memref<2x128x256xbf16, #tpu.memory_space<vmem>>, %arg15: memref<2x1x256xf32, #tpu.memory_space<vmem>>, %arg16: memref<2x1x256xf32, #tpu.memory_space<vmem>>, %arg17: memref<2x1x256xf32, #tpu.memory_space<vmem>>, %arg18: memref<2x256x128xbf16, #tpu.memory_space<vmem>>, %arg19: memref<2x1x128xf32, #tpu.memory_space<vmem>>, %arg20: memref<1x16x128xf32, #tpu.memory_space<vmem>>) attributes {dimension_semantics = [#tpu.dimension_semantics<parallel>], iteration_bounds = array<i64: 2>, scalar_prefetch = 0 : i64, scratch_operands = 0 : i64, tpu.core_type = #tpu.core_type<tc>, window_params = [{transform_indices = @transform_0, window_bounds = array<i64: 1, 17, 128>}, {pipeline_mode = #tpu.pipeline_mode<synchronous>, transform_indices = @transform_1, window_bounds = array<i64: 128, 128>}, {pipeline_mode = #tpu.pipeline_mode<synchronous>, transform_indices = @transform_2, window_bounds = array<i64: 17, 128>}, {pipeline_mode = #tpu.pipeline_mode<synchronous>, transform_indices = @transform_3, window_bounds = array<i64: 2, 1, 128>}, {pipeline_mode = #tpu.pipeline_mode<synchronous>, transform_indices = @transform_4, window_bounds = array<i64: 2, 1, 128>}, {pipeline_mode = #tpu.pipeline_mode<synchronous>, transform_indices = @transform_5, window_bounds = array<i64: 2, 128, 384>}, {pipeline_mode = #tpu.pipeline_mode<synchronous>, transform_indices = @transform_6, window_bounds = array<i64: 2, 1, 384>}, {pipeline_mode = #tpu.pipeline_mode<synchronous>, transform_indices = @transform_7, window_bounds = array<i64: 2, 4, 32, 128>}, {pipeline_mode = #tpu.pipeline_mode<synchronous>, transform_indices = @transform_8, window_bounds = array<i64: 2, 1, 128>}, {pipeline_mode = #tpu.pipeline_mode<synchronous>, transform_indices = @transform_9, window_bounds = array<i64: 2, 1, 128>}, {pipeline_mode = #tpu.pipeline_mode<synchronous>, transform_indices = @transform_10, window_bounds = array<i64: 2, 1, 128>}, {pipeline_mode = #tpu.pipeline_mode<synchronous>, transform_indices = @transform_11, window_bounds = array<i64: 2, 128, 256>}, {pipeline_mode = #tpu.pipeline_mode<synchronous>, transform_indices = @transform_12, window_bounds = array<i64: 2, 1, 256>}, {pipeline_mode = #tpu.pipeline_mode<synchronous>, transform_indices = @transform_13, window_bounds = array<i64: 2, 128, 256>}, {pipeline_mode = #tpu.pipeline_mode<synchronous>, transform_indices = @transform_14, window_bounds = array<i64: 2, 1, 256>}, {pipeline_mode = #tpu.pipeline_mode<synchronous>, transform_indices = @transform_15, window_bounds = array<i64: 2, 1, 256>}, {pipeline_mode = #tpu.pipeline_mode<synchronous>, transform_indices = @transform_16, window_bounds = array<i64: 2, 1, 256>}, {pipeline_mode = #tpu.pipeline_mode<synchronous>, transform_indices = @transform_17, window_bounds = array<i64: 2, 256, 128>}, {pipeline_mode = #tpu.pipeline_mode<synchronous>, transform_indices = @transform_18, window_bounds = array<i64: 2, 1, 128>}, {transform_indices = @transform_19, window_bounds = array<i64: 1, 16, 128>}]} {
    %c0 = arith.constant 0 : index
    %c0_0 = arith.constant 0 : index
    %c0_1 = arith.constant 0 : index
    %0 = vector.load %arg1[%c0, %c0_0, %c0_1] : memref<1x17x128xf32, #tpu.memory_space<vmem>>, vector<1x17x128xf32>
    %1 = vector.shape_cast %0 : vector<1x17x128xf32> to vector<17x128xf32>
    %2 = arith.truncf %1 : vector<17x128xf32> to vector<17x128xbf16>
    %c0_2 = arith.constant 0 : index
    %c0_3 = arith.constant 0 : index
    %3 = vector.load %arg2[%c0_2, %c0_3] : memref<128x128xbf16, #tpu.memory_space<vmem>>, vector<128x128xbf16>
    %cst = arith.constant dense<0.000000e+00> : vector<17x128xf32>
    %4 = tpu.matmul %2, %3, %cst {dimension_numbers = #tpu.dot_dimension_numbers<[1], [0], [0], [1], [0, 0, 1, 1], [], []>} : vector<17x128xbf16>, vector<128x128xbf16>, vector<17x128xf32> -> vector<17x128xf32>
    %c0_4 = arith.constant 0 : index
    %c0_5 = arith.constant 0 : index
    %5 = vector.load %arg3[%c0_4, %c0_5] : memref<17x128xf32, #tpu.memory_space<vmem>>, vector<17x128xf32>
    %6 = arith.addf %4, %5 : vector<17x128xf32>
    %c0_6 = arith.constant 0 : index
    %c0_7 = arith.constant 0 : index
    %c0_8 = arith.constant 0 : index
    %7 = vector.load %arg4[%c0_6, %c0_7, %c0_8] : memref<2x1x128xf32, #tpu.memory_space<vmem>>, vector<1x1x128xf32>
    %8 = vector.shape_cast %7 : vector<1x1x128xf32> to vector<1x128xf32>
    %c0_9 = arith.constant 0 : index
    %c0_10 = arith.constant 0 : index
    %c0_11 = arith.constant 0 : index
    %9 = vector.load %arg5[%c0_9, %c0_10, %c0_11] : memref<2x1x128xf32, #tpu.memory_space<vmem>>, vector<1x1x128xf32>
    %10 = vector.shape_cast %9 : vector<1x1x128xf32> to vector<1x128xf32>
    %cst_12 = arith.constant dense<0.000000e+00> : vector<17xf32>
    %11 = vector.multi_reduction <add>, %6, %cst_12 [1] : vector<17x128xf32> to vector<17xf32>
    %12 = vector.shape_cast %11 : vector<17xf32> to vector<17x1xf32>
    %cst_13 = arith.constant 1.280000e+02 : f32
    %13 = vector.broadcast %cst_13 : f32 to vector<17x1xf32>
    %14 = arith.divf %12, %13 : vector<17x1xf32>
    %15 = vector.broadcast %14 : vector<17x1xf32> to vector<17x128xf32>
    %16 = arith.subf %6, %15 : vector<17x128xf32>
    %17 = arith.mulf %16, %16 : vector<17x128xf32>
    %cst_14 = arith.constant dense<0.000000e+00> : vector<17xf32>
    %18 = vector.multi_reduction <add>, %17, %cst_14 [1] : vector<17x128xf32> to vector<17xf32>
    %19 = vector.shape_cast %18 : vector<17xf32> to vector<17x1xf32>
    %cst_15 = arith.constant 1.280000e+02 : f32
    %20 = vector.broadcast %cst_15 : f32 to vector<17x1xf32>
    %21 = arith.divf %19, %20 : vector<17x1xf32>
    %cst_16 = arith.constant 9.99999997E-7 : f32
    %22 = vector.broadcast %cst_16 : f32 to vector<17x1xf32>
    %23 = arith.addf %21, %22 : vector<17x1xf32>
    %24 = math.rsqrt %23 : vector<17x1xf32>
    %25 = vector.broadcast %24 : vector<17x1xf32> to vector<17x128xf32>
    %26 = arith.mulf %16, %25 : vector<17x128xf32>
    %27 = vector.broadcast %8 : vector<1x128xf32> to vector<17x128xf32>
    %28 = arith.mulf %26, %27 : vector<17x128xf32>
    %29 = vector.broadcast %10 : vector<1x128xf32> to vector<17x128xf32>
    %30 = arith.addf %28, %29 : vector<17x128xf32>
    %31 = arith.truncf %30 : vector<17x128xf32> to vector<17x128xbf16>
    %c0_17 = arith.constant 0 : index
    %c0_18 = arith.constant 0 : index
    %c0_19 = arith.constant 0 : index
    %32 = vector.load %arg6[%c0_17, %c0_18, %c0_19] : memref<2x128x384xbf16, #tpu.memory_space<vmem>>, vector<1x128x384xbf16>
    %33 = vector.shape_cast %32 : vector<1x128x384xbf16> to vector<128x384xbf16>
    %cst_20 = arith.constant dense<0.000000e+00> : vector<17x384xf32>
    %34 = tpu.matmul %31, %33, %cst_20 {dimension_numbers = #tpu.dot_dimension_numbers<[1], [0], [0], [1], [0, 0, 1, 1], [], []>} : vector<17x128xbf16>, vector<128x384xbf16>, vector<17x384xf32> -> vector<17x384xf32>
    %c0_21 = arith.constant 0 : index
    %c0_22 = arith.constant 0 : index
    %c0_23 = arith.constant 0 : index
    %35 = vector.load %arg7[%c0_21, %c0_22, %c0_23] : memref<2x1x384xf32, #tpu.memory_space<vmem>>, vector<1x1x384xf32>
    %36 = vector.shape_cast %35 : vector<1x1x384xf32> to vector<1x384xf32>
    %37 = vector.broadcast %36 : vector<1x384xf32> to vector<17x384xf32>
    %38 = arith.addf %34, %37 : vector<17x384xf32>
    %39 = arith.truncf %38 : vector<17x384xf32> to vector<17x384xbf16>
    %40 = vector.extract_strided_slice %39 {offsets = [0, 0], sizes = [17, 128], strides = [1, 1]} : vector<17x384xbf16> to vector<17x128xbf16>
    %41 = vector.extract_strided_slice %40 {offsets = [0, 0], sizes = [17, 32], strides = [1, 1]} : vector<17x128xbf16> to vector<17x32xbf16>
    %42 = vector.extract_strided_slice %40 {offsets = [0, 32], sizes = [17, 32], strides = [1, 1]} : vector<17x128xbf16> to vector<17x32xbf16>
    %43 = vector.extract_strided_slice %40 {offsets = [0, 64], sizes = [17, 32], strides = [1, 1]} : vector<17x128xbf16> to vector<17x32xbf16>
    %44 = vector.extract_strided_slice %40 {offsets = [0, 96], sizes = [17, 32], strides = [1, 1]} : vector<17x128xbf16> to vector<17x32xbf16>
    %45 = vector.shape_cast %41 : vector<17x32xbf16> to vector<1x17x32xbf16>
    %46 = vector.shape_cast %42 : vector<17x32xbf16> to vector<1x17x32xbf16>
    %47 = vector.shape_cast %43 : vector<17x32xbf16> to vector<1x17x32xbf16>
    %48 = vector.shape_cast %44 : vector<17x32xbf16> to vector<1x17x32xbf16>
    %49 = tpu.concatenate %45, %46, %47, %48 in 0 : vector<1x17x32xbf16>, vector<1x17x32xbf16>, vector<1x17x32xbf16>, vector<1x17x32xbf16> -> vector<4x17x32xbf16>
    %50 = vector.extract_strided_slice %39 {offsets = [0, 128], sizes = [17, 128], strides = [1, 1]} : vector<17x384xbf16> to vector<17x128xbf16>
    %51 = vector.extract_strided_slice %50 {offsets = [0, 0], sizes = [17, 32], strides = [1, 1]} : vector<17x128xbf16> to vector<17x32xbf16>
    %52 = vector.extract_strided_slice %50 {offsets = [0, 32], sizes = [17, 32], strides = [1, 1]} : vector<17x128xbf16> to vector<17x32xbf16>
    %53 = vector.extract_strided_slice %50 {offsets = [0, 64], sizes = [17, 32], strides = [1, 1]} : vector<17x128xbf16> to vector<17x32xbf16>
    %54 = vector.extract_strided_slice %50 {offsets = [0, 96], sizes = [17, 32], strides = [1, 1]} : vector<17x128xbf16> to vector<17x32xbf16>
    %55 = vector.shape_cast %51 : vector<17x32xbf16> to vector<1x17x32xbf16>
    %56 = vector.shape_cast %52 : vector<17x32xbf16> to vector<1x17x32xbf16>
    %57 = vector.shape_cast %53 : vector<17x32xbf16> to vector<1x17x32xbf16>
    %58 = vector.shape_cast %54 : vector<17x32xbf16> to vector<1x17x32xbf16>
    %59 = tpu.concatenate %55, %56, %57, %58 in 0 : vector<1x17x32xbf16>, vector<1x17x32xbf16>, vector<1x17x32xbf16>, vector<1x17x32xbf16> -> vector<4x17x32xbf16>
    %60 = vector.extract_strided_slice %39 {offsets = [0, 256], sizes = [17, 128], strides = [1, 1]} : vector<17x384xbf16> to vector<17x128xbf16>
    %61 = vector.extract_strided_slice %60 {offsets = [0, 0], sizes = [17, 32], strides = [1, 1]} : vector<17x128xbf16> to vector<17x32xbf16>
    %62 = vector.extract_strided_slice %60 {offsets = [0, 32], sizes = [17, 32], strides = [1, 1]} : vector<17x128xbf16> to vector<17x32xbf16>
    %63 = vector.extract_strided_slice %60 {offsets = [0, 64], sizes = [17, 32], strides = [1, 1]} : vector<17x128xbf16> to vector<17x32xbf16>
    %64 = vector.extract_strided_slice %60 {offsets = [0, 96], sizes = [17, 32], strides = [1, 1]} : vector<17x128xbf16> to vector<17x32xbf16>
    %65 = vector.shape_cast %61 : vector<17x32xbf16> to vector<1x17x32xbf16>
    %66 = vector.shape_cast %62 : vector<17x32xbf16> to vector<1x17x32xbf16>
    %67 = vector.shape_cast %63 : vector<17x32xbf16> to vector<1x17x32xbf16>
    %68 = vector.shape_cast %64 : vector<17x32xbf16> to vector<1x17x32xbf16>
    %69 = tpu.concatenate %65, %66, %67, %68 in 0 : vector<1x17x32xbf16>, vector<1x17x32xbf16>, vector<1x17x32xbf16>, vector<1x17x32xbf16> -> vector<4x17x32xbf16>
    "tpu.trace_start"() <{level = 10 : i32, message = "htd,hsd->hts"}> : () -> ()
    %cst_24 = arith.constant dense<0.000000e+00> : vector<4x17x17xf32>
    %70 = tpu.matmul %49, %59, %cst_24 {dimension_numbers = #tpu.dot_dimension_numbers<[2], [2], [1], [1], [0, 0, 0, 1, 1, 1], [0], [0]>} : vector<4x17x32xbf16>, vector<4x17x32xbf16>, vector<4x17x17xf32> -> vector<4x17x17xf32>
    "tpu.trace_stop"() : () -> ()
    %cst_25 = arith.constant dense<0xFF800000> : vector<4x17xf32>
    %71 = vector.multi_reduction <maximumf>, %70, %cst_25 [2] : vector<4x17x17xf32> to vector<4x17xf32>
    %72 = vector.shape_cast %71 : vector<4x17xf32> to vector<4x17x1xf32>
    %73 = vector.broadcast %72 : vector<4x17x1xf32> to vector<4x17x17xf32>
    %74 = arith.subf %70, %73 : vector<4x17x17xf32>
    %75 = math.exp %74 : vector<4x17x17xf32>
    %cst_26 = arith.constant dense<0.000000e+00> : vector<4x17xf32>
    %76 = vector.multi_reduction <add>, %75, %cst_26 [2] : vector<4x17x17xf32> to vector<4x17xf32>
    %77 = vector.shape_cast %76 : vector<4x17xf32> to vector<4x17x1xf32>
    %78 = tpu.reciprocal %77 {approx = true} : vector<4x17x1xf32> -> vector<4x17x1xf32>
    %79 = vector.broadcast %78 : vector<4x17x1xf32> to vector<4x17x17xf32>
    %80 = arith.mulf %75, %79 : vector<4x17x17xf32>
    %81 = arith.truncf %80 : vector<4x17x17xf32> to vector<4x17x17xbf16>
    "tpu.trace_start"() <{level = 10 : i32, message = "hts,hsd->htd"}> : () -> ()
    %cst_27 = arith.constant dense<0.000000e+00> : vector<4x17x32xf32>
    %82 = tpu.matmul %81, %69, %cst_27 {dimension_numbers = #tpu.dot_dimension_numbers<[2], [1], [1], [2], [0, 0, 0, 1, 1, 2], [0], [0]>} : vector<4x17x17xbf16>, vector<4x17x32xbf16>, vector<4x17x32xf32> -> vector<4x17x32xf32>
    "tpu.trace_stop"() : () -> ()
    %83 = arith.truncf %82 : vector<4x17x32xf32> to vector<4x17x32xbf16>
    %c0_28 = arith.constant 0 : index
    %c0_29 = arith.constant 0 : index
    %c0_30 = arith.constant 0 : index
    %c0_31 = arith.constant 0 : index
    %84 = vector.load %arg8[%c0_28, %c0_29, %c0_30, %c0_31] : memref<2x4x32x128xbf16, #tpu.memory_space<vmem>>, vector<1x4x32x128xbf16>
    %85 = vector.shape_cast %84 : vector<1x4x32x128xbf16> to vector<4x32x128xbf16>
    "tpu.trace_start"() <{level = 10 : i32, message = "htd,hdk->htk"}> : () -> ()
    %cst_32 = arith.constant dense<0.000000e+00> : vector<4x17x128xf32>
    %86 = tpu.matmul %83, %85, %cst_32 {dimension_numbers = #tpu.dot_dimension_numbers<[2], [1], [1], [2], [0, 0, 0, 1, 1, 2], [0], [0]>} : vector<4x17x32xbf16>, vector<4x32x128xbf16>, vector<4x17x128xf32> -> vector<4x17x128xf32>
    "tpu.trace_stop"() : () -> ()
    %cst_33 = arith.constant dense<0.000000e+00> : vector<17x128xf32>
    %87 = vector.multi_reduction <add>, %86, %cst_33 [0] : vector<4x17x128xf32> to vector<17x128xf32>
    %88 = arith.addf %6, %87 : vector<17x128xf32>
    %c0_34 = arith.constant 0 : index
    %c0_35 = arith.constant 0 : index
    %c0_36 = arith.constant 0 : index
    %89 = vector.load %arg9[%c0_34, %c0_35, %c0_36] : memref<2x1x128xf32, #tpu.memory_space<vmem>>, vector<1x1x128xf32>
    %90 = vector.shape_cast %89 : vector<1x1x128xf32> to vector<1x128xf32>
    %91 = vector.broadcast %90 : vector<1x128xf32> to vector<17x128xf32>
    %92 = arith.addf %88, %91 : vector<17x128xf32>
    %c0_37 = arith.constant 0 : index
    %c0_38 = arith.constant 0 : index
    %c0_39 = arith.constant 0 : index
    %93 = vector.load %arg10[%c0_37, %c0_38, %c0_39] : memref<2x1x128xf32, #tpu.memory_space<vmem>>, vector<1x1x128xf32>
    %94 = vector.shape_cast %93 : vector<1x1x128xf32> to vector<1x128xf32>
    %c0_40 = arith.constant 0 : index
    %c0_41 = arith.constant 0 : index
    %c0_42 = arith.constant 0 : index
    %95 = vector.load %arg11[%c0_40, %c0_41, %c0_42] : memref<2x1x128xf32, #tpu.memory_space<vmem>>, vector<1x1x128xf32>
    %96 = vector.shape_cast %95 : vector<1x1x128xf32> to vector<1x128xf32>
    %cst_43 = arith.constant dense<0.000000e+00> : vector<17xf32>
    %97 = vector.multi_reduction <add>, %92, %cst_43 [1] : vector<17x128xf32> to vector<17xf32>
    %98 = vector.shape_cast %97 : vector<17xf32> to vector<17x1xf32>
    %cst_44 = arith.constant 1.280000e+02 : f32
    %99 = vector.broadcast %cst_44 : f32 to vector<17x1xf32>
    %100 = arith.divf %98, %99 : vector<17x1xf32>
    %101 = vector.broadcast %100 : vector<17x1xf32> to vector<17x128xf32>
    %102 = arith.subf %92, %101 : vector<17x128xf32>
    %103 = arith.mulf %102, %102 : vector<17x128xf32>
    %cst_45 = arith.constant dense<0.000000e+00> : vector<17xf32>
    %104 = vector.multi_reduction <add>, %103, %cst_45 [1] : vector<17x128xf32> to vector<17xf32>
    %105 = vector.shape_cast %104 : vector<17xf32> to vector<17x1xf32>
    %cst_46 = arith.constant 1.280000e+02 : f32
    %106 = vector.broadcast %cst_46 : f32 to vector<17x1xf32>
    %107 = arith.divf %105, %106 : vector<17x1xf32>
    %cst_47 = arith.constant 9.99999997E-7 : f32
    %108 = vector.broadcast %cst_47 : f32 to vector<17x1xf32>
    %109 = arith.addf %107, %108 : vector<17x1xf32>
    %110 = math.rsqrt %109 : vector<17x1xf32>
    %111 = vector.broadcast %110 : vector<17x1xf32> to vector<17x128xf32>
    %112 = arith.mulf %102, %111 : vector<17x128xf32>
    %113 = vector.broadcast %94 : vector<1x128xf32> to vector<17x128xf32>
    %114 = arith.mulf %112, %113 : vector<17x128xf32>
    %115 = vector.broadcast %96 : vector<1x128xf32> to vector<17x128xf32>
    %116 = arith.addf %114, %115 : vector<17x128xf32>
    %117 = arith.truncf %116 : vector<17x128xf32> to vector<17x128xbf16>
    %c0_48 = arith.constant 0 : index
    %c0_49 = arith.constant 0 : index
    %c0_50 = arith.constant 0 : index
    %118 = vector.load %arg12[%c0_48, %c0_49, %c0_50] : memref<2x128x256xbf16, #tpu.memory_space<vmem>>, vector<1x128x256xbf16>
    %119 = vector.shape_cast %118 : vector<1x128x256xbf16> to vector<128x256xbf16>
    %cst_51 = arith.constant dense<0.000000e+00> : vector<17x256xf32>
    %120 = tpu.matmul %117, %119, %cst_51 {dimension_numbers = #tpu.dot_dimension_numbers<[1], [0], [0], [1], [0, 0, 1, 1], [], []>} : vector<17x128xbf16>, vector<128x256xbf16>, vector<17x256xf32> -> vector<17x256xf32>
    %c0_52 = arith.constant 0 : index
    %c0_53 = arith.constant 0 : index
    %c0_54 = arith.constant 0 : index
    %121 = vector.load %arg13[%c0_52, %c0_53, %c0_54] : memref<2x1x256xf32, #tpu.memory_space<vmem>>, vector<1x1x256xf32>
    %122 = vector.shape_cast %121 : vector<1x1x256xf32> to vector<1x256xf32>
    %123 = vector.broadcast %122 : vector<1x256xf32> to vector<17x256xf32>
    %124 = arith.addf %120, %123 : vector<17x256xf32>
    %c0_55 = arith.constant 0 : index
    %c0_56 = arith.constant 0 : index
    %c0_57 = arith.constant 0 : index
    %125 = vector.load %arg14[%c0_55, %c0_56, %c0_57] : memref<2x128x256xbf16, #tpu.memory_space<vmem>>, vector<1x128x256xbf16>
    %126 = vector.shape_cast %125 : vector<1x128x256xbf16> to vector<128x256xbf16>
    %cst_58 = arith.constant dense<0.000000e+00> : vector<17x256xf32>
    %127 = tpu.matmul %117, %126, %cst_58 {dimension_numbers = #tpu.dot_dimension_numbers<[1], [0], [0], [1], [0, 0, 1, 1], [], []>} : vector<17x128xbf16>, vector<128x256xbf16>, vector<17x256xf32> -> vector<17x256xf32>
    %c0_59 = arith.constant 0 : index
    %c0_60 = arith.constant 0 : index
    %c0_61 = arith.constant 0 : index
    %128 = vector.load %arg15[%c0_59, %c0_60, %c0_61] : memref<2x1x256xf32, #tpu.memory_space<vmem>>, vector<1x1x256xf32>
    %129 = vector.shape_cast %128 : vector<1x1x256xf32> to vector<1x256xf32>
    %130 = vector.broadcast %129 : vector<1x256xf32> to vector<17x256xf32>
    %131 = arith.addf %127, %130 : vector<17x256xf32>
    %cst_62 = arith.constant 0.000000e+00 : f32
    %132 = vector.broadcast %cst_62 : f32 to vector<17x256xf32>
    %133 = arith.subf %132, %124 : vector<17x256xf32>
    %134 = math.exp %133 : vector<17x256xf32>
    %cst_63 = arith.constant 1.000000e+00 : f32
    %135 = vector.broadcast %cst_63 : f32 to vector<17x256xf32>
    %136 = arith.addf %135, %134 : vector<17x256xf32>
    %137 = tpu.reciprocal %136 {approx = true} : vector<17x256xf32> -> vector<17x256xf32>
    %138 = arith.mulf %124, %137 : vector<17x256xf32>
    %139 = arith.mulf %138, %131 : vector<17x256xf32>
    %c0_64 = arith.constant 0 : index
    %c0_65 = arith.constant 0 : index
    %c0_66 = arith.constant 0 : index
    %140 = vector.load %arg16[%c0_64, %c0_65, %c0_66] : memref<2x1x256xf32, #tpu.memory_space<vmem>>, vector<1x1x256xf32>
    %141 = vector.shape_cast %140 : vector<1x1x256xf32> to vector<1x256xf32>
    %c0_67 = arith.constant 0 : index
    %c0_68 = arith.constant 0 : index
    %c0_69 = arith.constant 0 : index
    %142 = vector.load %arg17[%c0_67, %c0_68, %c0_69] : memref<2x1x256xf32, #tpu.memory_space<vmem>>, vector<1x1x256xf32>
    %143 = vector.shape_cast %142 : vector<1x1x256xf32> to vector<1x256xf32>
    %cst_70 = arith.constant dense<0.000000e+00> : vector<17xf32>
    %144 = vector.multi_reduction <add>, %139, %cst_70 [1] : vector<17x256xf32> to vector<17xf32>
    %145 = vector.shape_cast %144 : vector<17xf32> to vector<17x1xf32>
    %cst_71 = arith.constant 2.560000e+02 : f32
    %146 = vector.broadcast %cst_71 : f32 to vector<17x1xf32>
    %147 = arith.divf %145, %146 : vector<17x1xf32>
    %148 = vector.broadcast %147 : vector<17x1xf32> to vector<17x256xf32>
    %149 = arith.subf %139, %148 : vector<17x256xf32>
    %150 = arith.mulf %149, %149 : vector<17x256xf32>
    %cst_72 = arith.constant dense<0.000000e+00> : vector<17xf32>
    %151 = vector.multi_reduction <add>, %150, %cst_72 [1] : vector<17x256xf32> to vector<17xf32>
    %152 = vector.shape_cast %151 : vector<17xf32> to vector<17x1xf32>
    %cst_73 = arith.constant 2.560000e+02 : f32
    %153 = vector.broadcast %cst_73 : f32 to vector<17x1xf32>
    %154 = arith.divf %152, %153 : vector<17x1xf32>
    %cst_74 = arith.constant 9.99999997E-7 : f32
    %155 = vector.broadcast %cst_74 : f32 to vector<17x1xf32>
    %156 = arith.addf %154, %155 : vector<17x1xf32>
    %157 = math.rsqrt %156 : vector<17x1xf32>
    %158 = vector.broadcast %157 : vector<17x1xf32> to vector<17x256xf32>
    %159 = arith.mulf %149, %158 : vector<17x256xf32>
    %160 = vector.broadcast %141 : vector<1x256xf32> to vector<17x256xf32>
    %161 = arith.mulf %159, %160 : vector<17x256xf32>
    %162 = vector.broadcast %143 : vector<1x256xf32> to vector<17x256xf32>
    %163 = arith.addf %161, %162 : vector<17x256xf32>
    %164 = arith.truncf %163 : vector<17x256xf32> to vector<17x256xbf16>
    %c0_75 = arith.constant 0 : index
    %c0_76 = arith.constant 0 : index
    %c0_77 = arith.constant 0 : index
    %165 = vector.load %arg18[%c0_75, %c0_76, %c0_77] : memref<2x256x128xbf16, #tpu.memory_space<vmem>>, vector<1x256x128xbf16>
    %166 = vector.shape_cast %165 : vector<1x256x128xbf16> to vector<256x128xbf16>
    %cst_78 = arith.constant dense<0.000000e+00> : vector<17x128xf32>
    %167 = tpu.matmul %164, %166, %cst_78 {dimension_numbers = #tpu.dot_dimension_numbers<[1], [0], [0], [1], [0, 0, 1, 1], [], []>} : vector<17x256xbf16>, vector<256x128xbf16>, vector<17x128xf32> -> vector<17x128xf32>
    %168 = arith.addf %92, %167 : vector<17x128xf32>
    %c0_79 = arith.constant 0 : index
    %c0_80 = arith.constant 0 : index
    %c0_81 = arith.constant 0 : index
    %169 = vector.load %arg19[%c0_79, %c0_80, %c0_81] : memref<2x1x128xf32, #tpu.memory_space<vmem>>, vector<1x1x128xf32>
    %170 = vector.shape_cast %169 : vector<1x1x128xf32> to vector<1x128xf32>
    %171 = vector.broadcast %170 : vector<1x128xf32> to vector<17x128xf32>
    %172 = arith.addf %168, %171 : vector<17x128xf32>
    %c1 = arith.constant 1 : index
    %c0_82 = arith.constant 0 : index
    %c0_83 = arith.constant 0 : index
    %173 = vector.load %arg4[%c1, %c0_82, %c0_83] : memref<2x1x128xf32, #tpu.memory_space<vmem>>, vector<1x1x128xf32>
    %174 = vector.shape_cast %173 : vector<1x1x128xf32> to vector<1x128xf32>
    %c1_84 = arith.constant 1 : index
    %c0_85 = arith.constant 0 : index
    %c0_86 = arith.constant 0 : index
    %175 = vector.load %arg5[%c1_84, %c0_85, %c0_86] : memref<2x1x128xf32, #tpu.memory_space<vmem>>, vector<1x1x128xf32>
    %176 = vector.shape_cast %175 : vector<1x1x128xf32> to vector<1x128xf32>
    %cst_87 = arith.constant dense<0.000000e+00> : vector<17xf32>
    %177 = vector.multi_reduction <add>, %172, %cst_87 [1] : vector<17x128xf32> to vector<17xf32>
    %178 = vector.shape_cast %177 : vector<17xf32> to vector<17x1xf32>
    %cst_88 = arith.constant 1.280000e+02 : f32
    %179 = vector.broadcast %cst_88 : f32 to vector<17x1xf32>
    %180 = arith.divf %178, %179 : vector<17x1xf32>
    %181 = vector.broadcast %180 : vector<17x1xf32> to vector<17x128xf32>
    %182 = arith.subf %172, %181 : vector<17x128xf32>
    %183 = arith.mulf %182, %182 : vector<17x128xf32>
    %cst_89 = arith.constant dense<0.000000e+00> : vector<17xf32>
    %184 = vector.multi_reduction <add>, %183, %cst_89 [1] : vector<17x128xf32> to vector<17xf32>
    %185 = vector.shape_cast %184 : vector<17xf32> to vector<17x1xf32>
    %cst_90 = arith.constant 1.280000e+02 : f32
    %186 = vector.broadcast %cst_90 : f32 to vector<17x1xf32>
    %187 = arith.divf %185, %186 : vector<17x1xf32>
    %cst_91 = arith.constant 9.99999997E-7 : f32
    %188 = vector.broadcast %cst_91 : f32 to vector<17x1xf32>
    %189 = arith.addf %187, %188 : vector<17x1xf32>
    %190 = math.rsqrt %189 : vector<17x1xf32>
    %191 = vector.broadcast %190 : vector<17x1xf32> to vector<17x128xf32>
    %192 = arith.mulf %182, %191 : vector<17x128xf32>
    %193 = vector.broadcast %174 : vector<1x128xf32> to vector<17x128xf32>
    %194 = arith.mulf %192, %193 : vector<17x128xf32>
    %195 = vector.broadcast %176 : vector<1x128xf32> to vector<17x128xf32>
    %196 = arith.addf %194, %195 : vector<17x128xf32>
    %197 = arith.truncf %196 : vector<17x128xf32> to vector<17x128xbf16>
    %c1_92 = arith.constant 1 : index
    %c0_93 = arith.constant 0 : index
    %c0_94 = arith.constant 0 : index
    %198 = vector.load %arg6[%c1_92, %c0_93, %c0_94] : memref<2x128x384xbf16, #tpu.memory_space<vmem>>, vector<1x128x384xbf16>
    %199 = vector.shape_cast %198 : vector<1x128x384xbf16> to vector<128x384xbf16>
    %cst_95 = arith.constant dense<0.000000e+00> : vector<17x384xf32>
    %200 = tpu.matmul %197, %199, %cst_95 {dimension_numbers = #tpu.dot_dimension_numbers<[1], [0], [0], [1], [0, 0, 1, 1], [], []>} : vector<17x128xbf16>, vector<128x384xbf16>, vector<17x384xf32> -> vector<17x384xf32>
    %c1_96 = arith.constant 1 : index
    %c0_97 = arith.constant 0 : index
    %c0_98 = arith.constant 0 : index
    %201 = vector.load %arg7[%c1_96, %c0_97, %c0_98] : memref<2x1x384xf32, #tpu.memory_space<vmem>>, vector<1x1x384xf32>
    %202 = vector.shape_cast %201 : vector<1x1x384xf32> to vector<1x384xf32>
    %203 = vector.broadcast %202 : vector<1x384xf32> to vector<17x384xf32>
    %204 = arith.addf %200, %203 : vector<17x384xf32>
    %205 = arith.truncf %204 : vector<17x384xf32> to vector<17x384xbf16>
    %206 = vector.extract_strided_slice %205 {offsets = [0, 0], sizes = [17, 128], strides = [1, 1]} : vector<17x384xbf16> to vector<17x128xbf16>
    %207 = vector.extract_strided_slice %206 {offsets = [0, 0], sizes = [17, 32], strides = [1, 1]} : vector<17x128xbf16> to vector<17x32xbf16>
    %208 = vector.extract_strided_slice %206 {offsets = [0, 32], sizes = [17, 32], strides = [1, 1]} : vector<17x128xbf16> to vector<17x32xbf16>
    %209 = vector.extract_strided_slice %206 {offsets = [0, 64], sizes = [17, 32], strides = [1, 1]} : vector<17x128xbf16> to vector<17x32xbf16>
    %210 = vector.extract_strided_slice %206 {offsets = [0, 96], sizes = [17, 32], strides = [1, 1]} : vector<17x128xbf16> to vector<17x32xbf16>
    %211 = vector.shape_cast %207 : vector<17x32xbf16> to vector<1x17x32xbf16>
    %212 = vector.shape_cast %208 : vector<17x32xbf16> to vector<1x17x32xbf16>
    %213 = vector.shape_cast %209 : vector<17x32xbf16> to vector<1x17x32xbf16>
    %214 = vector.shape_cast %210 : vector<17x32xbf16> to vector<1x17x32xbf16>
    %215 = tpu.concatenate %211, %212, %213, %214 in 0 : vector<1x17x32xbf16>, vector<1x17x32xbf16>, vector<1x17x32xbf16>, vector<1x17x32xbf16> -> vector<4x17x32xbf16>
    %216 = vector.extract_strided_slice %205 {offsets = [0, 128], sizes = [17, 128], strides = [1, 1]} : vector<17x384xbf16> to vector<17x128xbf16>
    %217 = vector.extract_strided_slice %216 {offsets = [0, 0], sizes = [17, 32], strides = [1, 1]} : vector<17x128xbf16> to vector<17x32xbf16>
    %218 = vector.extract_strided_slice %216 {offsets = [0, 32], sizes = [17, 32], strides = [1, 1]} : vector<17x128xbf16> to vector<17x32xbf16>
    %219 = vector.extract_strided_slice %216 {offsets = [0, 64], sizes = [17, 32], strides = [1, 1]} : vector<17x128xbf16> to vector<17x32xbf16>
    %220 = vector.extract_strided_slice %216 {offsets = [0, 96], sizes = [17, 32], strides = [1, 1]} : vector<17x128xbf16> to vector<17x32xbf16>
    %221 = vector.shape_cast %217 : vector<17x32xbf16> to vector<1x17x32xbf16>
    %222 = vector.shape_cast %218 : vector<17x32xbf16> to vector<1x17x32xbf16>
    %223 = vector.shape_cast %219 : vector<17x32xbf16> to vector<1x17x32xbf16>
    %224 = vector.shape_cast %220 : vector<17x32xbf16> to vector<1x17x32xbf16>
    %225 = tpu.concatenate %221, %222, %223, %224 in 0 : vector<1x17x32xbf16>, vector<1x17x32xbf16>, vector<1x17x32xbf16>, vector<1x17x32xbf16> -> vector<4x17x32xbf16>
    %226 = vector.extract_strided_slice %205 {offsets = [0, 256], sizes = [17, 128], strides = [1, 1]} : vector<17x384xbf16> to vector<17x128xbf16>
    %227 = vector.extract_strided_slice %226 {offsets = [0, 0], sizes = [17, 32], strides = [1, 1]} : vector<17x128xbf16> to vector<17x32xbf16>
    %228 = vector.extract_strided_slice %226 {offsets = [0, 32], sizes = [17, 32], strides = [1, 1]} : vector<17x128xbf16> to vector<17x32xbf16>
    %229 = vector.extract_strided_slice %226 {offsets = [0, 64], sizes = [17, 32], strides = [1, 1]} : vector<17x128xbf16> to vector<17x32xbf16>
    %230 = vector.extract_strided_slice %226 {offsets = [0, 96], sizes = [17, 32], strides = [1, 1]} : vector<17x128xbf16> to vector<17x32xbf16>
    %231 = vector.shape_cast %227 : vector<17x32xbf16> to vector<1x17x32xbf16>
    %232 = vector.shape_cast %228 : vector<17x32xbf16> to vector<1x17x32xbf16>
    %233 = vector.shape_cast %229 : vector<17x32xbf16> to vector<1x17x32xbf16>
    %234 = vector.shape_cast %230 : vector<17x32xbf16> to vector<1x17x32xbf16>
    %235 = tpu.concatenate %231, %232, %233, %234 in 0 : vector<1x17x32xbf16>, vector<1x17x32xbf16>, vector<1x17x32xbf16>, vector<1x17x32xbf16> -> vector<4x17x32xbf16>
    "tpu.trace_start"() <{level = 10 : i32, message = "htd,hsd->hts"}> : () -> ()
    %cst_99 = arith.constant dense<0.000000e+00> : vector<4x17x17xf32>
    %236 = tpu.matmul %215, %225, %cst_99 {dimension_numbers = #tpu.dot_dimension_numbers<[2], [2], [1], [1], [0, 0, 0, 1, 1, 1], [0], [0]>} : vector<4x17x32xbf16>, vector<4x17x32xbf16>, vector<4x17x17xf32> -> vector<4x17x17xf32>
    "tpu.trace_stop"() : () -> ()
    %cst_100 = arith.constant dense<0xFF800000> : vector<4x17xf32>
    %237 = vector.multi_reduction <maximumf>, %236, %cst_100 [2] : vector<4x17x17xf32> to vector<4x17xf32>
    %238 = vector.shape_cast %237 : vector<4x17xf32> to vector<4x17x1xf32>
    %239 = vector.broadcast %238 : vector<4x17x1xf32> to vector<4x17x17xf32>
    %240 = arith.subf %236, %239 : vector<4x17x17xf32>
    %241 = math.exp %240 : vector<4x17x17xf32>
    %cst_101 = arith.constant dense<0.000000e+00> : vector<4x17xf32>
    %242 = vector.multi_reduction <add>, %241, %cst_101 [2] : vector<4x17x17xf32> to vector<4x17xf32>
    %243 = vector.shape_cast %242 : vector<4x17xf32> to vector<4x17x1xf32>
    %244 = tpu.reciprocal %243 {approx = true} : vector<4x17x1xf32> -> vector<4x17x1xf32>
    %245 = vector.broadcast %244 : vector<4x17x1xf32> to vector<4x17x17xf32>
    %246 = arith.mulf %241, %245 : vector<4x17x17xf32>
    %247 = arith.truncf %246 : vector<4x17x17xf32> to vector<4x17x17xbf16>
    "tpu.trace_start"() <{level = 10 : i32, message = "hts,hsd->htd"}> : () -> ()
    %cst_102 = arith.constant dense<0.000000e+00> : vector<4x17x32xf32>
    %248 = tpu.matmul %247, %235, %cst_102 {dimension_numbers = #tpu.dot_dimension_numbers<[2], [1], [1], [2], [0, 0, 0, 1, 1, 2], [0], [0]>} : vector<4x17x17xbf16>, vector<4x17x32xbf16>, vector<4x17x32xf32> -> vector<4x17x32xf32>
    "tpu.trace_stop"() : () -> ()
    %249 = arith.truncf %248 : vector<4x17x32xf32> to vector<4x17x32xbf16>
    %c1_103 = arith.constant 1 : index
    %c0_104 = arith.constant 0 : index
    %c0_105 = arith.constant 0 : index
    %c0_106 = arith.constant 0 : index
    %250 = vector.load %arg8[%c1_103, %c0_104, %c0_105, %c0_106] : memref<2x4x32x128xbf16, #tpu.memory_space<vmem>>, vector<1x4x32x128xbf16>
    %251 = vector.shape_cast %250 : vector<1x4x32x128xbf16> to vector<4x32x128xbf16>
    "tpu.trace_start"() <{level = 10 : i32, message = "htd,hdk->htk"}> : () -> ()
    %cst_107 = arith.constant dense<0.000000e+00> : vector<4x17x128xf32>
    %252 = tpu.matmul %249, %251, %cst_107 {dimension_numbers = #tpu.dot_dimension_numbers<[2], [1], [1], [2], [0, 0, 0, 1, 1, 2], [0], [0]>} : vector<4x17x32xbf16>, vector<4x32x128xbf16>, vector<4x17x128xf32> -> vector<4x17x128xf32>
    "tpu.trace_stop"() : () -> ()
    %cst_108 = arith.constant dense<0.000000e+00> : vector<17x128xf32>
    %253 = vector.multi_reduction <add>, %252, %cst_108 [0] : vector<4x17x128xf32> to vector<17x128xf32>
    %254 = arith.addf %172, %253 : vector<17x128xf32>
    %c1_109 = arith.constant 1 : index
    %c0_110 = arith.constant 0 : index
    %c0_111 = arith.constant 0 : index
    %255 = vector.load %arg9[%c1_109, %c0_110, %c0_111] : memref<2x1x128xf32, #tpu.memory_space<vmem>>, vector<1x1x128xf32>
    %256 = vector.shape_cast %255 : vector<1x1x128xf32> to vector<1x128xf32>
    %257 = vector.broadcast %256 : vector<1x128xf32> to vector<17x128xf32>
    %258 = arith.addf %254, %257 : vector<17x128xf32>
    %c1_112 = arith.constant 1 : index
    %c0_113 = arith.constant 0 : index
    %c0_114 = arith.constant 0 : index
    %259 = vector.load %arg10[%c1_112, %c0_113, %c0_114] : memref<2x1x128xf32, #tpu.memory_space<vmem>>, vector<1x1x128xf32>
    %260 = vector.shape_cast %259 : vector<1x1x128xf32> to vector<1x128xf32>
    %c1_115 = arith.constant 1 : index
    %c0_116 = arith.constant 0 : index
    %c0_117 = arith.constant 0 : index
    %261 = vector.load %arg11[%c1_115, %c0_116, %c0_117] : memref<2x1x128xf32, #tpu.memory_space<vmem>>, vector<1x1x128xf32>
    %262 = vector.shape_cast %261 : vector<1x1x128xf32> to vector<1x128xf32>
    %cst_118 = arith.constant dense<0.000000e+00> : vector<17xf32>
    %263 = vector.multi_reduction <add>, %258, %cst_118 [1] : vector<17x128xf32> to vector<17xf32>
    %264 = vector.shape_cast %263 : vector<17xf32> to vector<17x1xf32>
    %cst_119 = arith.constant 1.280000e+02 : f32
    %265 = vector.broadcast %cst_119 : f32 to vector<17x1xf32>
    %266 = arith.divf %264, %265 : vector<17x1xf32>
    %267 = vector.broadcast %266 : vector<17x1xf32> to vector<17x128xf32>
    %268 = arith.subf %258, %267 : vector<17x128xf32>
    %269 = arith.mulf %268, %268 : vector<17x128xf32>
    %cst_120 = arith.constant dense<0.000000e+00> : vector<17xf32>
    %270 = vector.multi_reduction <add>, %269, %cst_120 [1] : vector<17x128xf32> to vector<17xf32>
    %271 = vector.shape_cast %270 : vector<17xf32> to vector<17x1xf32>
    %cst_121 = arith.constant 1.280000e+02 : f32
    %272 = vector.broadcast %cst_121 : f32 to vector<17x1xf32>
    %273 = arith.divf %271, %272 : vector<17x1xf32>
    %cst_122 = arith.constant 9.99999997E-7 : f32
    %274 = vector.broadcast %cst_122 : f32 to vector<17x1xf32>
    %275 = arith.addf %273, %274 : vector<17x1xf32>
    %276 = math.rsqrt %275 : vector<17x1xf32>
    %277 = vector.broadcast %276 : vector<17x1xf32> to vector<17x128xf32>
    %278 = arith.mulf %268, %277 : vector<17x128xf32>
    %279 = vector.broadcast %260 : vector<1x128xf32> to vector<17x128xf32>
    %280 = arith.mulf %278, %279 : vector<17x128xf32>
    %281 = vector.broadcast %262 : vector<1x128xf32> to vector<17x128xf32>
    %282 = arith.addf %280, %281 : vector<17x128xf32>
    %283 = arith.truncf %282 : vector<17x128xf32> to vector<17x128xbf16>
    %c1_123 = arith.constant 1 : index
    %c0_124 = arith.constant 0 : index
    %c0_125 = arith.constant 0 : index
    %284 = vector.load %arg12[%c1_123, %c0_124, %c0_125] : memref<2x128x256xbf16, #tpu.memory_space<vmem>>, vector<1x128x256xbf16>
    %285 = vector.shape_cast %284 : vector<1x128x256xbf16> to vector<128x256xbf16>
    %cst_126 = arith.constant dense<0.000000e+00> : vector<17x256xf32>
    %286 = tpu.matmul %283, %285, %cst_126 {dimension_numbers = #tpu.dot_dimension_numbers<[1], [0], [0], [1], [0, 0, 1, 1], [], []>} : vector<17x128xbf16>, vector<128x256xbf16>, vector<17x256xf32> -> vector<17x256xf32>
    %c1_127 = arith.constant 1 : index
    %c0_128 = arith.constant 0 : index
    %c0_129 = arith.constant 0 : index
    %287 = vector.load %arg13[%c1_127, %c0_128, %c0_129] : memref<2x1x256xf32, #tpu.memory_space<vmem>>, vector<1x1x256xf32>
    %288 = vector.shape_cast %287 : vector<1x1x256xf32> to vector<1x256xf32>
    %289 = vector.broadcast %288 : vector<1x256xf32> to vector<17x256xf32>
    %290 = arith.addf %286, %289 : vector<17x256xf32>
    %c1_130 = arith.constant 1 : index
    %c0_131 = arith.constant 0 : index
    %c0_132 = arith.constant 0 : index
    %291 = vector.load %arg14[%c1_130, %c0_131, %c0_132] : memref<2x128x256xbf16, #tpu.memory_space<vmem>>, vector<1x128x256xbf16>
    %292 = vector.shape_cast %291 : vector<1x128x256xbf16> to vector<128x256xbf16>
    %cst_133 = arith.constant dense<0.000000e+00> : vector<17x256xf32>
    %293 = tpu.matmul %283, %292, %cst_133 {dimension_numbers = #tpu.dot_dimension_numbers<[1], [0], [0], [1], [0, 0, 1, 1], [], []>} : vector<17x128xbf16>, vector<128x256xbf16>, vector<17x256xf32> -> vector<17x256xf32>
    %c1_134 = arith.constant 1 : index
    %c0_135 = arith.constant 0 : index
    %c0_136 = arith.constant 0 : index
    %294 = vector.load %arg15[%c1_134, %c0_135, %c0_136] : memref<2x1x256xf32, #tpu.memory_space<vmem>>, vector<1x1x256xf32>
    %295 = vector.shape_cast %294 : vector<1x1x256xf32> to vector<1x256xf32>
    %296 = vector.broadcast %295 : vector<1x256xf32> to vector<17x256xf32>
    %297 = arith.addf %293, %296 : vector<17x256xf32>
    %cst_137 = arith.constant 0.000000e+00 : f32
    %298 = vector.broadcast %cst_137 : f32 to vector<17x256xf32>
    %299 = arith.subf %298, %290 : vector<17x256xf32>
    %300 = math.exp %299 : vector<17x256xf32>
    %cst_138 = arith.constant 1.000000e+00 : f32
    %301 = vector.broadcast %cst_138 : f32 to vector<17x256xf32>
    %302 = arith.addf %301, %300 : vector<17x256xf32>
    %303 = tpu.reciprocal %302 {approx = true} : vector<17x256xf32> -> vector<17x256xf32>
    %304 = arith.mulf %290, %303 : vector<17x256xf32>
    %305 = arith.mulf %304, %297 : vector<17x256xf32>
    %c1_139 = arith.constant 1 : index
    %c0_140 = arith.constant 0 : index
    %c0_141 = arith.constant 0 : index
    %306 = vector.load %arg16[%c1_139, %c0_140, %c0_141] : memref<2x1x256xf32, #tpu.memory_space<vmem>>, vector<1x1x256xf32>
    %307 = vector.shape_cast %306 : vector<1x1x256xf32> to vector<1x256xf32>
    %c1_142 = arith.constant 1 : index
    %c0_143 = arith.constant 0 : index
    %c0_144 = arith.constant 0 : index
    %308 = vector.load %arg17[%c1_142, %c0_143, %c0_144] : memref<2x1x256xf32, #tpu.memory_space<vmem>>, vector<1x1x256xf32>
    %309 = vector.shape_cast %308 : vector<1x1x256xf32> to vector<1x256xf32>
    %cst_145 = arith.constant dense<0.000000e+00> : vector<17xf32>
    %310 = vector.multi_reduction <add>, %305, %cst_145 [1] : vector<17x256xf32> to vector<17xf32>
    %311 = vector.shape_cast %310 : vector<17xf32> to vector<17x1xf32>
    %cst_146 = arith.constant 2.560000e+02 : f32
    %312 = vector.broadcast %cst_146 : f32 to vector<17x1xf32>
    %313 = arith.divf %311, %312 : vector<17x1xf32>
    %314 = vector.broadcast %313 : vector<17x1xf32> to vector<17x256xf32>
    %315 = arith.subf %305, %314 : vector<17x256xf32>
    %316 = arith.mulf %315, %315 : vector<17x256xf32>
    %cst_147 = arith.constant dense<0.000000e+00> : vector<17xf32>
    %317 = vector.multi_reduction <add>, %316, %cst_147 [1] : vector<17x256xf32> to vector<17xf32>
    %318 = vector.shape_cast %317 : vector<17xf32> to vector<17x1xf32>
    %cst_148 = arith.constant 2.560000e+02 : f32
    %319 = vector.broadcast %cst_148 : f32 to vector<17x1xf32>
    %320 = arith.divf %318, %319 : vector<17x1xf32>
    %cst_149 = arith.constant 9.99999997E-7 : f32
    %321 = vector.broadcast %cst_149 : f32 to vector<17x1xf32>
    %322 = arith.addf %320, %321 : vector<17x1xf32>
    %323 = math.rsqrt %322 : vector<17x1xf32>
    %324 = vector.broadcast %323 : vector<17x1xf32> to vector<17x256xf32>
    %325 = arith.mulf %315, %324 : vector<17x256xf32>
    %326 = vector.broadcast %307 : vector<1x256xf32> to vector<17x256xf32>
    %327 = arith.mulf %325, %326 : vector<17x256xf32>
    %328 = vector.broadcast %309 : vector<1x256xf32> to vector<17x256xf32>
    %329 = arith.addf %327, %328 : vector<17x256xf32>
    %330 = arith.truncf %329 : vector<17x256xf32> to vector<17x256xbf16>
    %c1_150 = arith.constant 1 : index
    %c0_151 = arith.constant 0 : index
    %c0_152 = arith.constant 0 : index
    %331 = vector.load %arg18[%c1_150, %c0_151, %c0_152] : memref<2x256x128xbf16, #tpu.memory_space<vmem>>, vector<1x256x128xbf16>
    %332 = vector.shape_cast %331 : vector<1x256x128xbf16> to vector<256x128xbf16>
    %cst_153 = arith.constant dense<0.000000e+00> : vector<17x128xf32>
    %333 = tpu.matmul %330, %332, %cst_153 {dimension_numbers = #tpu.dot_dimension_numbers<[1], [0], [0], [1], [0, 0, 1, 1], [], []>} : vector<17x256xbf16>, vector<256x128xbf16>, vector<17x128xf32> -> vector<17x128xf32>
    %334 = arith.addf %258, %333 : vector<17x128xf32>
    %c1_154 = arith.constant 1 : index
    %c0_155 = arith.constant 0 : index
    %c0_156 = arith.constant 0 : index
    %335 = vector.load %arg19[%c1_154, %c0_155, %c0_156] : memref<2x1x128xf32, #tpu.memory_space<vmem>>, vector<1x1x128xf32>
    %336 = vector.shape_cast %335 : vector<1x1x128xf32> to vector<1x128xf32>
    %337 = vector.broadcast %336 : vector<1x128xf32> to vector<17x128xf32>
    %338 = arith.addf %334, %337 : vector<17x128xf32>
    %339 = vector.extract_strided_slice %338 {offsets = [1, 0], sizes = [16, 128], strides = [1, 1]} : vector<17x128xf32> to vector<16x128xf32>
    %c0_157 = arith.constant 0 : index
    %c0_158 = arith.constant 0 : index
    %c0_159 = arith.constant 0 : index
    %340 = vector.load %arg20[%c0_157, %c0_158, %c0_159] : memref<1x16x128xf32, #tpu.memory_space<vmem>>, vector<1x16x128xf32>
    %341 = vector.shape_cast %340 : vector<1x16x128xf32> to vector<16x128xf32>
    %342 = vector.shape_cast %339 : vector<16x128xf32> to vector<1x16x128xf32>
    tpu.vector_store %arg20[%c0_157, %c0_158, %c0_159], %342 {strides = array<i32>} : memref<1x16x128xf32, #tpu.memory_space<vmem>>, vector<1x16x128xf32>,
    return
  }
  func.func @transform_0(%arg0: i32) -> (i32, i32, i32) {
    %c0_i32 = arith.constant 0 : i32
    %c0_i32_0 = arith.constant 0 : i32
    %c0_i32_1 = arith.constant 0 : i32
    return %arg0, %c0_i32, %c0_i32_0 : i32, i32, i32
  }
  func.func @transform_1(%arg0: i32) -> (i32, i32) {
    %c0_i32 = arith.constant 0 : i32
    %c0_i32_0 = arith.constant 0 : i32
    %c0_i32_1 = arith.constant 0 : i32
    return %c0_i32, %c0_i32_0 : i32, i32
  }
  func.func @transform_2(%arg0: i32) -> (i32, i32) {
    %c0_i32 = arith.constant 0 : i32
    %c0_i32_0 = arith.constant 0 : i32
    %c0_i32_1 = arith.constant 0 : i32
    return %c0_i32, %c0_i32_0 : i32, i32
  }
  func.func @transform_3(%arg0: i32) -> (i32, i32, i32) {
    %c0_i32 = arith.constant 0 : i32
    %c0_i32_0 = arith.constant 0 : i32
    %c0_i32_1 = arith.constant 0 : i32
    %c0_i32_2 = arith.constant 0 : i32
    return %c0_i32, %c0_i32_0, %c0_i32_1 : i32, i32, i32
  }
  func.func @transform_4(%arg0: i32) -> (i32, i32, i32) {
    %c0_i32 = arith.constant 0 : i32
    %c0_i32_0 = arith.constant 0 : i32
    %c0_i32_1 = arith.constant 0 : i32
    %c0_i32_2 = arith.constant 0 : i32
    return %c0_i32, %c0_i32_0, %c0_i32_1 : i32, i32, i32
  }
  func.func @transform_5(%arg0: i32) -> (i32, i32, i32) {
    %c0_i32 = arith.constant 0 : i32
    %c0_i32_0 = arith.constant 0 : i32
    %c0_i32_1 = arith.constant 0 : i32
    %c0_i32_2 = arith.constant 0 : i32
    return %c0_i32, %c0_i32_0, %c0_i32_1 : i32, i32, i32
  }
  func.func @transform_6(%arg0: i32) -> (i32, i32, i32) {
    %c0_i32 = arith.constant 0 : i32
    %c0_i32_0 = arith.constant 0 : i32
    %c0_i32_1 = arith.constant 0 : i32
    %c0_i32_2 = arith.constant 0 : i32
    return %c0_i32, %c0_i32_0, %c0_i32_1 : i32, i32, i32
  }
  func.func @transform_7(%arg0: i32) -> (i32, i32, i32, i32) {
    %c0_i32 = arith.constant 0 : i32
    %c0_i32_0 = arith.constant 0 : i32
    %c0_i32_1 = arith.constant 0 : i32
    %c0_i32_2 = arith.constant 0 : i32
    %c0_i32_3 = arith.constant 0 : i32
    return %c0_i32, %c0_i32_0, %c0_i32_1, %c0_i32_2 : i32, i32, i32, i32
  }
  func.func @transform_8(%arg0: i32) -> (i32, i32, i32) {
    %c0_i32 = arith.constant 0 : i32
    %c0_i32_0 = arith.constant 0 : i32
    %c0_i32_1 = arith.constant 0 : i32
    %c0_i32_2 = arith.constant 0 : i32
    return %c0_i32, %c0_i32_0, %c0_i32_1 : i32, i32, i32
  }
  func.func @transform_9(%arg0: i32) -> (i32, i32, i32) {
    %c0_i32 = arith.constant 0 : i32
    %c0_i32_0 = arith.constant 0 : i32
    %c0_i32_1 = arith.constant 0 : i32
    %c0_i32_2 = arith.constant 0 : i32
    return %c0_i32, %c0_i32_0, %c0_i32_1 : i32, i32, i32
  }
  func.func @transform_10(%arg0: i32) -> (i32, i32, i32) {
    %c0_i32 = arith.constant 0 : i32
    %c0_i32_0 = arith.constant 0 : i32
    %c0_i32_1 = arith.constant 0 : i32
    %c0_i32_2 = arith.constant 0 : i32
    return %c0_i32, %c0_i32_0, %c0_i32_1 : i32, i32, i32
  }
  func.func @transform_11(%arg0: i32) -> (i32, i32, i32) {
    %c0_i32 = arith.constant 0 : i32
    %c0_i32_0 = arith.constant 0 : i32
    %c0_i32_1 = arith.constant 0 : i32
    %c0_i32_2 = arith.constant 0 : i32
    return %c0_i32, %c0_i32_0, %c0_i32_1 : i32, i32, i32
  }
  func.func @transform_12(%arg0: i32) -> (i32, i32, i32) {
    %c0_i32 = arith.constant 0 : i32
    %c0_i32_0 = arith.constant 0 : i32
    %c0_i32_1 = arith.constant 0 : i32
    %c0_i32_2 = arith.constant 0 : i32
    return %c0_i32, %c0_i32_0, %c0_i32_1 : i32, i32, i32
  }
  func.func @transform_13(%arg0: i32) -> (i32, i32, i32) {
    %c0_i32 = arith.constant 0 : i32
    %c0_i32_0 = arith.constant 0 : i32
    %c0_i32_1 = arith.constant 0 : i32
    %c0_i32_2 = arith.constant 0 : i32
    return %c0_i32, %c0_i32_0, %c0_i32_1 : i32, i32, i32
  }
  func.func @transform_14(%arg0: i32) -> (i32, i32, i32) {
    %c0_i32 = arith.constant 0 : i32
    %c0_i32_0 = arith.constant 0 : i32
    %c0_i32_1 = arith.constant 0 : i32
    %c0_i32_2 = arith.constant 0 : i32
    return %c0_i32, %c0_i32_0, %c0_i32_1 : i32, i32, i32
  }
  func.func @transform_15(%arg0: i32) -> (i32, i32, i32) {
    %c0_i32 = arith.constant 0 : i32
    %c0_i32_0 = arith.constant 0 : i32
    %c0_i32_1 = arith.constant 0 : i32
    %c0_i32_2 = arith.constant 0 : i32
    return %c0_i32, %c0_i32_0, %c0_i32_1 : i32, i32, i32
  }
  func.func @transform_16(%arg0: i32) -> (i32, i32, i32) {
    %c0_i32 = arith.constant 0 : i32
    %c0_i32_0 = arith.constant 0 : i32
    %c0_i32_1 = arith.constant 0 : i32
    %c0_i32_2 = arith.constant 0 : i32
    return %c0_i32, %c0_i32_0, %c0_i32_1 : i32, i32, i32
  }
  func.func @transform_17(%arg0: i32) -> (i32, i32, i32) {
    %c0_i32 = arith.constant 0 : i32
    %c0_i32_0 = arith.constant 0 : i32
    %c0_i32_1 = arith.constant 0 : i32
    %c0_i32_2 = arith.constant 0 : i32
    return %c0_i32, %c0_i32_0, %c0_i32_1 : i32, i32, i32
  }
  func.func @transform_18(%arg0: i32) -> (i32, i32, i32) {
    %c0_i32 = arith.constant 0 : i32
    %c0_i32_0 = arith.constant 0 : i32
    %c0_i32_1 = arith.constant 0 : i32
    %c0_i32_2 = arith.constant 0 : i32
    return %c0_i32, %c0_i32_0, %c0_i32_1 : i32, i32, i32
  }
  func.func @transform_19(%arg0: i32) -> (i32, i32, i32) {
    %c0_i32 = arith.constant 0 : i32
    %c0_i32_0 = arith.constant 0 : i32
    %c0_i32_1 = arith.constant 0 : i32
    return %arg0, %c0_i32, %c0_i32_0 : i32, i32, i32
  }
}

</mosaic_0001>

<bundles_post_ra>
// kernel: eva02_forward.1
= control target key start
LH: loop header
LB: loop body
LE: loop exit
PB: predicated region body
PF: predicated region fallthrough
CT: control target
= control target key end

     0   :  { %s7560_s0 = inlined_call_operand.vmem [shape: f32[2,17,128], index: 0, kind: input, shape index: {}]   ;;  %s7561_s1 = inlined_call_operand.vmem [shape: bf16[128,128], index: 1, kind: input, shape index: {}]   ;;  %s7562_s2 = inlined_call_operand.vmem [shape: f32[17,128], index: 2, kind: input, shape index: {}]   ;;  %s7563_s3 = inlined_call_operand.vmem [shape: f32[2,1,128], index: 3, kind: input, shape index: {}]   ;;  %s7564_s4 = inlined_call_operand.vmem [shape: f32[2,1,128], index: 4, kind: input, shape index: {}]   ;;  %s7565_s5 = inlined_call_operand.vmem [shape: bf16[2,128,384], index: 5, kind: input, shape index: {}]   ;;  %s7566_s6 = inlined_call_operand.vmem [shape: f32[2,1,384], index: 6, kind: input, shape index: {}]   ;;  %s7567_s7 = inlined_call_operand.vmem [shape: bf16[2,4,32,128], index: 7, kind: input, shape index: {}]   ;;  %s7568_s8 = inlined_call_operand.vmem [shape: f32[2,1,128], index: 8, kind: input, shape index: {}]   ;;  %s7569_s9 = inlined_call_operand.vmem [shape: f32[2,1,128], index: 9, kind: input, shape index: {}]   ;;  %s7570_s10 = inlined_call_operand.vmem [shape: f32[2,1,128], index: 10, kind: input, shape index: {}]   ;;  %s7571_s11 = inlined_call_operand.vmem [shape: bf16[2,128,256], index: 11, kind: input, shape index: {}]   ;;  %s7572_s12 = inlined_call_operand.vmem [shape: f32[2,1,256], index: 12, kind: input, shape index: {}]   ;;  %s7573_s13 = inlined_call_operand.vmem [shape: bf16[2,128,256], index: 13, kind: input, shape index: {}]   ;;  %s7574_s14 = inlined_call_operand.vmem [shape: f32[2,1,256], index: 14, kind: input, shape index: {}]   ;;  %s7575_s15 = inlined_call_operand.vmem [shape: f32[2,1,256], index: 15, kind: input, shape index: {}]   ;;  %s7576_s16 = inlined_call_operand.vmem [shape: f32[2,1,256], index: 16, kind: input, shape index: {}]   ;;  %s7577_s17 = inlined_call_operand.vmem [shape: bf16[2,256,128], index: 17, kind: input, shape index: {}]   ;;  %s7578_s18 = inlined_call_operand.vmem [shape: f32[2,1,128], index: 18, kind: input, shape index: {}]   ;;  %s7579_s19 = inlined_call_operand.hbm [shape: f32[2,16,128], index: 19, kind: output, shape index: {}]  }
   0x1   :  { %7597 = sst [smem:[#allocation11_spill]] %s7560_s0 }
   0x2   :  { %7598 = sst [smem:[#allocation12_spill]] %s7561_s1 }
   0x3   :  { %7599 = sst [smem:[#allocation13_spill]] %s7562_s2 }
   0x4   :  { %7600 = sst [smem:[#allocation14_spill]] %s7563_s3 }
   0x5   :  { %7601 = sst [smem:[#allocation15_spill]] %s7564_s4 }
   0x6   :  { %7602 = sst [smem:[#allocation16_spill]] %s7579_s19 }
   0x7   :  { %24 = vsyncpa [#allocation3], 0 }
   0x8   :  { %26 = vsyncpa [#allocation3 + $0x1], 0  ;;  %s6259_s0 = smov 0   ;;  %s6261_s30 = smov 0  }
   0x9   :  { %s6263_s20 = smov 0   ;;  %s6265_s21 = smov 0  }
   0xa LB: > { %7603 = sst [smem:[#allocation5_spill]] %s6138_s0  ;;  %s6280_s1 = sadd.s32 4294967295, %s6150_s21   ;;  %s6150_s21 = sphi %s6265_s21, %s7623_s21   ;;  %s6146_s20 = sphi %s6263_s20, %s7625_s20   ;;  %s6142_s30 = sphi %s6261_s30, %s7627_s30   ;;  %s6138_s0 = sphi %s6259_s0, %s7626_s0  }
   0xb   : > { %7604 = sst [smem:[#allocation6_spill]] %s6146_s20  ;;  %s4833_s22 = sadd.s32 4294967294, %s6150_s21  }
   0xc   : > { %7605 = sst [smem:[#allocation7_spill]] %s6150_s21  ;;  %s6284_s2 = sadd.s32 1, %s6150_s21  }
   0xd   : > { %7606 = sst [smem:[#allocation8_spill]] %s6284_s2  ;;  %s443_s23 = sadd.s32 1, %s6146_s20 }
   0xe   : > { %s440_s24 = ssub.s32 %s6150_s21, %s6284_s2  ;;  %p453_p0 = scmp.ne.s32.totalorder %s6146_s20, %s6142_s30 }
   0xf   : > { %p441_p1 = scmp.eq.s32.totalorder %s440_s24, 0  ;;  %p454_p2 = scmp.eq.s32.totalorder %s6280_s1, 1 }
  0x10   : > { %p459_p3 = scmp.ne.s32.totalorder %s6142_s30, %s6138_s0  ;;  %p460_p4 = scmp.eq.s32.totalorder %s4833_s22, 1 }
  0x11   : > { %s6295_s25 = scalar_select %p441_p1, %s6146_s20, %s443_s23  }
  0x12   : > { %p6297_p5 = por %p454_p2, %p453_p0  ;;  %p6301_p6 = por %p460_p4, %p459_p3 }
  0x13   : > { %7607 = sst [smem:[#allocation9_spill]] %s6295_s25  ;;  %p4836_p7 = scmp.ge.s32.totalorder %s6150_s21, 1 }
  0x14   : > { %s7609_s26 = scalar_select %p6301_p6, 1, 0 }
  0x15   : > { %p540_p8 = scmp.lt.s32.totalorder %s6150_s21, 3 }
  0x16   : > { %7610 = sst [smem:[#allocation10_spill]] %s7609_s26 }
  0x17   : > { %p541_p9 = pnand %p4836_p7, %p540_p8 }
  0x18   : > { %s7611_s29 = sld [smem:[#allocation12_spill]] (!%p541_p9)  ;;  %p596_p10 = scmp.lt.s32.totalorder (!%p541_p9), %s6280_s1, 1  ;;  %vm728_vm0 = vcmask (!%p541_p9), 1040384   ;;  %v5700_v24 = vld [vmem:[%s7565_s5 + $0x4] ss:$12 sps:$4 sm:$0xff] (!%p541_p9)   ;;  %v6152_v57 = vmov (!%p541_p9), 0  }
  0x19   : > { %544 = sbr.rel (%p541_p9) target bundleno = 5848 (0x16d8), region = 96  ;;  %s7612_s27 = sld [smem:[#allocation11_spill]] (!%p541_p9)  ;;  %v5702_v25 = vld [vmem:[%s7565_s5] ss:$12 sps:$4 sm:$0xff] (!%p541_p9)   ;;  %v5703_v26 = vld [vmem:[%s7565_s5 + $0x8] ss:$12 sps:$4 sm:$0xff] (!%p541_p9)   ;;  %958 = vmatprep.subr.bf16.mxu1 (!%p541_p9), %v5700_v24  ;;  %990 = vmatprep.mubr.bf16.mxu1 (!%p541_p9), %v6152_v57 }
  0x1a   : > { %v5704_v27 = vld [vmem:[%s7565_s5 + $0x1c] ss:$12 sps:$4 sm:$0xff] (!%p541_p9)   ;;  %959 = vmatpush1.bf16.msra.mxu1 (!%p541_p9), %v5702_v25  ;;  %v5706_v41 = vld [vmem:[%s7565_s5 + $0x18] ss:$12 sps:$4 sm:$0xff] (!%p541_p9)   ;;  %v5707_v42 = vld [vmem:[%s7565_s5 + $0x20] ss:$12 sps:$4 sm:$0xff] (!%p541_p9)  }
  0x1b   : > { %960 = vmatprep.subr.bf16.mxu1 (!%p541_p9), %v5704_v27  ;;  %v5708_v43 = vld [vmem:[%s7565_s5 + $0x34] ss:$12 sps:$4 sm:$0xff] (!%p541_p9)   ;;  %v5710_v44 = vld [vmem:[%s7565_s5 + $0x30] ss:$12 sps:$4 sm:$0xff] (!%p541_p9)   ;;  %v5711_v45 = vld [vmem:[%s7565_s5 + $0x38] ss:$12 sps:$4 sm:$0xff] (!%p541_p9)  }
  0x1c   : > { %v5712_v46 = vld [vmem:[%s7565_s5 + $0x4c] ss:$12 sps:$4 sm:$0xff] (!%p541_p9)   ;;  %v5714_v47 = vld [vmem:[%s7565_s5 + $0x48] ss:$12 sps:$4 sm:$0xff] (!%p541_p9)   ;;  %v5715_v48 = vld [vmem:[%s7565_s5 + $0x50] ss:$12 sps:$4 sm:$0xff] (!%p541_p9)  }
  0x1d   : > { %v5716_v49 = vld [vmem:[%s7565_s5 + $0x64] ss:$12 sps:$4 sm:$0xff] (!%p541_p9)   ;;  %v5718_v50 = vld [vmem:[%s7565_s5 + $0x60] ss:$12 sps:$4 sm:$0xff] (!%p541_p9)   ;;  %v5719_v51 = vld [vmem:[%s7565_s5 + $0x68] ss:$12 sps:$4 sm:$0xff] (!%p541_p9)  }
  0x1e   : > { %v5692_v0 = vld [vmem:[%s7611_s29] sm:$0xff] (!%p541_p9)   ;;  %v5693_v1 = vld [vmem:[%s7611_s29 + $0x8] sm:$0xff] (!%p541_p9)   ;;  %v5694_v2 = vld [vmem:[%s7611_s29 + $0x10] sm:$0xff] (!%p541_p9)   ;;  %961 = vmatpush1.bf16.msra.mxu1 (!%p541_p9), %v5706_v41  ;;  %s7615_s4 = sld [smem:[#allocation15_spill]] (!%p541_p9)  ;;  %vm1108_vm1 = vcmask (!%p541_p9), 261120   ;;  %s7594_s25 = smov (!%p541_p9), 96  }
  0x1f   : > { %5378 = vmatprep.subr.bf16.mxu0 (!%p541_p9), %v5692_v0  ;;  %v5695_v3 = vld [vmem:[%s7611_s29 + $0x18] sm:$0xff] (!%p541_p9)   ;;  %v5696_v7 = vld [vmem:[%s7611_s29 + $0x20] sm:$0xff] (!%p541_p9)   ;;  %v5697_v8 = vld [vmem:[%s7611_s29 + $0x28] sm:$0xff] (!%p541_p9)   ;;  %962 = vmatprep.subr.bf16.mxu1 (!%p541_p9), %v5708_v43  ;;  %s7590_s0 = smov (!%p541_p9), 64   ;;  %vm1356_vm2 = vcmask (!%p541_p9), 131072   ;;  %vm1349_vm3 = vcmask (!%p541_p9), 138240  }
  0x20   : > { %s597_s24 = scalar_select %p596_p10, %s6280_s1, 1  ;;  %5379 = vmatpush3.bf16.msra.mxu0 %v5692_v0  ;;  %v5698_v9 = vld [vmem:[%s7611_s29 + $0x30] sm:$0xff]   ;;  %v5699_v10 = vld [vmem:[%s7611_s29 + $0x38] sm:$0xff]   ;;  %v5723_v53 = vld [vmem:[%s7565_s5 + $0x80] ss:$12 sps:$4 sm:$0xff]  }
  0x21   : > { %5380 = vmatprep.subr.bf16.mxu0 %v5693_v1  ;;  %v5720_v52 = vld [vmem:[%s7565_s5 + $0x7c] ss:$12 sps:$4 sm:$0xff]   ;;  %v5722_v54 = vld [vmem:[%s7565_s5 + $0x78] ss:$12 sps:$4 sm:$0xff]   ;;  %v5724_v55 = vld [vmem:[%s7565_s5 + $0x94] ss:$12 sps:$4 sm:$0xff]  }
  0x22   : > { %s5646_s2 = smul.u32 24, %s597_s24  ;;  %963 = vmatpush1.bf16.msra.mxu1 %v5710_v44  ;;  %v5727_v56 = vld [vmem:[%s7565_s5 + $0x98] ss:$12 sps:$4 sm:$0xff]   ;;  %v5726_v58 = vld [vmem:[%s7565_s5 + $0x90] ss:$12 sps:$4 sm:$0xff]   ;;  %s7614_s24 = sld [smem:[#allocation14_spill]] }
  0x23   : > { %964 = vmatprep.subr.bf16.mxu1 %v5712_v46  ;;  %v5728_v59 = vld [vmem:[%s7565_s5 + $0xac] ss:$12 sps:$4 sm:$0xff]   ;;  %v5731_v60 = vld [vmem:[%s7565_s5 + $0xb0] ss:$12 sps:$4 sm:$0xff]   ;;  %v5730_v61 = vld [vmem:[%s7565_s5 + $0xa8] ss:$12 sps:$4 sm:$0xff]  }
  0x24   : > { %s600_s28 = scalar_lea.vmem %s7612_s27, %s5646_s2  ;;  %5381 = vmatpush3.bf16.msra.mxu0 %v5693_v1  ;;  %s7613_s27 = sld [smem:[#allocation13_spill]] }
  0x25   : > { %5382 = vmatprep.subr.bf16.mxu0 %v5694_v2  ;;  %v602_v4 = vld [vmem:[%s600_s28] sm:$0xff]  ;;  %v603_v5 = vld [vmem:[%s600_s28 + $0x8] sm:$0xff]  ;;  %v604_v11 = vld [vmem:[%s600_s28 + $0x10] sm:$0x1]  ;;  %s7592_s2 = smov 32   ;;  %s7616_s22 = smov 96  }
  0x26   : > { %v605_v6 = vpack.c.bf16 %v603_v5, %v602_v4  ;;  %v606_v12 = vpack.c.bf16 %v604_v11, %v604_v11  ;;  %965 = vmatpush1.bf16.msra.mxu1 %v5714_v47  ;;  %s7617_s23 = smov 32   ;;  %s7618_s28 = smov 64  }
  0x27   : > { %966 = vmatprep.subr.bf16.mxu1 %v5716_v49  ;;  %s5195_s20 = sshll.u32 %s6280_s1, 8  ;;  %s6156_s1 = smov [#allocation2]  }
  0x28   : > { %5383 = vmatpush3.bf16.msra.mxu0 %v5694_v2  ;;  %5394 = vmatprep.mubr.bf16.mxu0 %v605_v6 }
  0x29   : > { %5384 = vmatprep.subr.bf16.mxu0 %v5695_v3 }
  0x2a   : > { %v625_v13 = vld [vmem:[%s7613_s27 + $0x10] sm:$0x1]  ;;  %v623_v14 = vld [vmem:[%s7613_s27] sm:$0xff]  ;;  %v624_v21 = vld [vmem:[%s7613_s27 + $0x8] sm:$0xff]  ;;  %967 = vmatpush1.bf16.msra.mxu1 %v5718_v50  ;;  %s7619_s27 = sld [smem:[#allocation16_spill]] }
  0x2b   : > { %968 = vmatprep.subr.bf16.mxu1 %v5720_v52 }
  0x2c   : > { %5385 = vmatpush3.bf16.msra.mxu0 %v5695_v3 }
  0x2d   : > { %5386 = vmatprep.subr.bf16.mxu0 %v5696_v7 }
  0x2e   : > { %969 = vmatpush1.bf16.msra.mxu1 %v5722_v54 }
  0x2f   : > { %970 = vmatprep.subr.bf16.mxu1 %v5724_v55 }
  0x30   : > { %5387 = vmatpush3.bf16.msra.mxu0 %v5696_v7 }
  0x31   : > { %5388 = vmatprep.subr.bf16.mxu0 %v5697_v8 }
  0x32   : > { %971 = vmatpush1.bf16.msra.mxu1 %v5726_v58 }
  0x33   : > { %972 = vmatprep.subr.bf16.mxu1 %v5728_v59 }
  0x34   : > { %5389 = vmatpush3.bf16.msra.mxu0 %v5697_v8 }
  0x35   : > { %5390 = vmatprep.subr.bf16.mxu0 %v5698_v9 }
  0x36   : > { %973 = vmatpush1.bf16.msra.mxu1 %v5730_v61 }
  0x38   : > { %5391 = vmatpush3.bf16.msra.mxu0 %v5698_v9  ;;  %v4847_v9 = vld [vmem:[%s7614_s24] ss:$0 sm:$0xff] }
  0x39   : > { %5392 = vmatprep.subr.bf16.mxu0 %v5699_v10 }
  0x3c   : > { %5393 = vmatpush3.bf16.msra.mxu0 %v5699_v10 }
  0x3d   : > { %5398 = vmatprep.subr.bf16.mxu0 %v5703_v26 }
  0x3f   : > { %5395 = vmatmul.mubr.bf16.vlgmr.msra.gmra.mrb[0].mxu0 %v606_v12 }
  0x40   : > { %5399 = vmatpush3.bf16.msra.mxu0 %v5703_v26  ;;  %v815_v26 = vlaneseq }
  0x41   : > { %5400 = vmatprep.subr.bf16.mxu0 %v5707_v42 }
  0x42   : > { %v6454_v27 = vshrl.u32 %v815_v26, 7 }
  0x44   : > { %5401 = vmatpush3.bf16.msra.mxu0 %v5707_v42 }
  0x45   : > { %5402 = vmatprep.subr.bf16.mxu0 %v5711_v45 }
  0x48   : > { %5403 = vmatpush3.bf16.msra.mxu0 %v5711_v45 }
  0x49   : > { %5404 = vmatprep.subr.bf16.mxu0 %v5715_v48 }
  0x4c   : > { %5405 = vmatpush3.bf16.msra.mxu0 %v5715_v48 }
  0x4d   : > { %5406 = vmatprep.subr.bf16.mxu0 %v5719_v51 }
  0x50   : > { %5407 = vmatpush3.bf16.msra.mxu0 %v5719_v51 }
  0x51   : > { %5408 = vmatprep.subr.bf16.mxu0 %v5723_v53 }
  0x54   : > { %5409 = vmatpush3.bf16.msra.mxu0 %v5723_v53  ;;  %v6474_v53 = vsel %vm728_vm0, 65535, %v6152_v57 }
  0x55   : > { %5410 = vmatprep.subr.bf16.mxu0 %v5727_v56 }
  0x58   : > { %5411 = vmatpush3.bf16.msra.mxu0 %v5727_v56 }
  0x59   : > { %5412 = vmatprep.subr.bf16.mxu0 %v5731_v60 }
  0x5c   : > { %5413 = vmatpush3.bf16.msra.mxu0 %v5731_v60 }
 0x112   : > { %v5396_v15 = vpop.f32.mrb[0].mxu0 }
 0x113   : > { %v6342_v16 = vadd.f32 %v5396_v15, %v625_v13  ;;  %v708_v17 = vpop.f32.mrb[1].mxu0  ;;  %v4848_v15 = vld [vmem:[%s7615_s4] ss:$0 sm:$0xff] }
 0x114   : > { %v6344_v18 = vadd.f32 %v708_v17, %v623_v14  ;;  %v5397_v19 = vpop.f32.mrb[2].mxu0 }
 0x115   : > { %v711_v20 = vpop.f32.mrb[3].mxu0  ;;  %v729_v22 = vsel %vm728_vm0, %v6342_v16, 0.0 }
 0x116   : > { %730 = vadd.xlane.f32.xlu1 %v729_v22  ;;  %724 = vadd.xlane.f32.xlu0 %v6344_v18  ;;  %v6352_v23 = vadd.f32 %v711_v20, %v624_v21 }
 0x11a   : > { %726 = vadd.xlane.f32.xlu0 %v6352_v23 }
 0x1a3   : > { %v731_v28 = vpop.xlane.xlu1 %730  ;;  %v725_v29 = vpop.xlane.xlu0 %724 }
 0x1a4   : > { %v735_v30 = vmul.f32 0.0078125, %v731_v28  ;;  %v733_v31 = vmul.f32 0.0078125, %v725_v29  ;;  %v825_v28 = vsub.s32 2, %v6454_v27  ;;  %v813_v29 = vld [vmem:[%s7566_s6] sm:$0x7] }
 0x1a6   : > { %v6368_v32 = vsub.f32 %v6342_v16, %v735_v30  ;;  %v6371_v33 = vsub.f32 %v6344_v18, %v733_v31  ;;  %v6461_v30 = vsub.s32 0, %v6454_v27  ;;  %v6464_v31 = vsub.s32 1, %v6454_v27 }
 0x1a7   : > { %v727_v34 = vpop.xlane.xlu0 %726 }
 0x1a8   : > { %v734_v35 = vmul.f32 0.0078125, %v727_v34  ;;  %v739_v36 = vmul.f32 %v6371_v33, %v6371_v33  ;;  %v741_v37 = vmul.f32 %v6368_v32, %v6368_v32 }
 0x1aa   : > { %742 = vadd.xlane.f32.xlu1 %v739_v36  ;;  %v6378_v38 = vsub.f32 %v6352_v23, %v734_v35  ;;  %v746_v40 = vsel %vm728_vm0, %v741_v37, 0.0  ;;  %v822_v35 = vrot.slane %v813_v29, %v6464_v31 }
 0x1ac   : > { %v740_v39 = vmul.f32 %v6378_v38, %v6378_v38 }
 0x1ae   : > { %747 = vadd.xlane.f32.xlu1 %v746_v40  ;;  %744 = vadd.xlane.f32.xlu0 %v740_v39 }
 0x237   : > { %v743_v62 = vpop.xlane.xlu1 %742 }
 0x238   : > { %v749_v63 = vmul.f32 0.0078125, %v743_v62 }
 0x23a   : > { %v752_v0 = vadd.f32 1e-06, %v749_v63 }
 0x23b   : > { %v748_v1 = vpop.xlane.xlu1 %747  ;;  %v745_v2 = vpop.xlane.xlu0 %744 }
 0x23c   : > { %5908 = vrsqrt.f32 %v752_v0  ;;  %v751_v3 = vmul.f32 0.0078125, %v748_v1  ;;  %v750_v4 = vmul.f32 0.0078125, %v745_v2 }
 0x23e   : > { %v754_v5 = vadd.f32 1e-06, %v751_v3  ;;  %v753_v6 = vadd.f32 1e-06, %v750_v4 }
 0x240   : > { %5910 = vrsqrt.f32 %v754_v5 }
 0x241   : > { %5912 = vrsqrt.f32 %v753_v6 }
 0x246   : > { %v5909_v7 = vpop.eup %5908 }
 0x247   : > { %v758_v8 = vmul.f32 %v5909_v7, %v6371_v33  ;;  %v818_v33 = vrot.slane %v813_v29, %v6461_v30 }
 0x249   : > { %v767_v14 = vmul.f32 %v4847_v9, %v758_v8 }
 0x24a   : > { %v5911_v10 = vpop.eup %5910 }
 0x24b   : > { %v5913_v11 = vpop.eup %5912  ;;  %v760_v12 = vmul.f32 %v5911_v10, %v6368_v32  ;;  %v776_v21 = vadd.f32 %v4848_v15, %v767_v14  ;;  %v826_v32 = vrot.slane %v813_v29, %v825_v28 }
 0x24c   : > { %v759_v13 = vmul.f32 %v5913_v11, %v6378_v38 }
 0x24d   : > { %v769_v17 = vmul.f32 %v4847_v9, %v760_v12 }
 0x24e   : > { %v768_v19 = vmul.f32 %v4847_v9, %v759_v13 }
 0x24f   : > { %v778_v20 = vadd.f32 %v4848_v15, %v769_v17 }
 0x250   : > { %v777_v22 = vadd.f32 %v4848_v15, %v768_v19 }
 0x251   : > { %v780_v24 = vpack.c.bf16 %v778_v20, %v778_v20 }
 0x252   : > { %v779_v25 = vpack.c.bf16 %v777_v22, %v776_v21 }
 0x254   : > { %991 = vmatmul.mubr.bf16.vlgmr.msra.gmra.mrb[0].mxu1 %v779_v25  ;;  %5414 = vmatprep.mubr.bf16.mxu0 %v779_v25 }
 0x255   : > { %5415 = vmatmul.mubr.bf16.vlgmr.msra.gmra.mrb[4].mxu0 %v780_v24  ;;  %1000 = vmatprep.mubr.bf16.mxu1 %v6152_v57 }
 0x25c   : > { %1001 = vmatmul.mubr.bf16.gmra.mrb[4].mxu1 %v780_v24 }
 0x327   : > { %v992_v34 = vpop.f32.mrb[0].mxu1 }
 0x328   : > { %v994_v36 = vpop.f32.mrb[1].mxu1  ;;  %v5416_v37 = vpop.f32.mrb[4].mxu0  ;;  %v993_v41 = vadd.f32 %v992_v34, %v818_v33 }
 0x329   : > { %v1052_v38 = vadd.f32 %v5416_v37, %v826_v32  ;;  %v996_v39 = vpop.f32.mrb[2].mxu1  ;;  %v1043_v40 = vpop.f32.mrb[5].mxu0  ;;  %v995_v45 = vadd.f32 %v994_v36, %v822_v35 }
 0x32a   : > { %v997_v42 = vadd.f32 %v996_v39, %v818_v33  ;;  %v998_v43 = vpop.f32.mrb[3].mxu1  ;;  %v5417_v44 = vpop.f32.mrb[6].mxu0  ;;  %v1044_v50 = vadd.f32 %v1043_v40, %v826_v32 }
 0x32b   : > { %v999_v46 = vadd.f32 %v998_v43, %v822_v35  ;;  %v1046_v47 = vpop.f32.mrb[7].mxu0  ;;  %v6470_v48 = vpack.c.bf16 %v1052_v38, %v1052_v38 }
 0x32c   : > { %v1057_v49 = vpack.c.bf16 %v997_v42, %v993_v41  ;;  %v1047_v51 = vadd.f32 %v1046_v47, %v826_v32 }
 0x32d   : > { %v1058_v52 = vpack.c.bf16 %v999_v46, %v995_v45  ;;  %v1500_v60 = vand.u32 %v6474_v53, %v6470_v48 }
 0x32e   : > { %v6476_v54 = vpack.c.bf16 %v1047_v51, %v1044_v50  ;;  %5422 = vmatprep.mubr.msk.bf16.mxu1 %vm1108_vm1, %v1057_v49 }
 0x32f   : > { %v1002_v55 = vpop.f32.mrb[4].mxu1  ;;  %1079 = vrot.lane.b32.xlu0 %v1058_v52, %s7594_s25  ;;  %5630 = vmatprep.subr.msk.bf16.mxu1 %vm1108_vm1, %v1058_v52  ;;  %v1116_v56 = vsel %vm1108_vm1, %v1058_v52, 0 }
 0x330   : > { %v1003_v58 = vadd.f32 %v1002_v55, %v818_v33  ;;  %v1004_v59 = vpop.f32.mrb[5].mxu1  ;;  %5419 = vmatpush3.bf16.xpose.msra.mxu1 %v1116_v56  ;;  %5450 = vmatprep.subr.bf16.mxu0 %v6476_v54 }
 0x331   : > { %v1005_v61 = vadd.f32 %v1004_v59, %v822_v35  ;;  %v1006_v62 = vpop.f32.mrb[6].mxu1  ;;  %5451 = vmatpush3.bf16.msra.mxu0 %v6476_v54 }
 0x332   : > { %v1060_v63 = vpack.c.bf16 %v1003_v58, %v1003_v58  ;;  %v1007_v0 = vpop.f32.mrb[7].mxu1  ;;  %5452 = vmatprep.subr.bf16.mxu0 %v1500_v60 }
 0x333   : > { %v1061_v1 = vpack.c.bf16 %v1005_v61, %v1005_v61 }
 0x334   : > { %1067 = vrot.lane.b32.xlu0 %v1060_v63, %s7594_s25 }
 0x335   : > { %5453 = vmatpush3.bf16.msra.mxu0 %v1500_v60  ;;  %1081 = vrot.lane.b32.xlu1 %v1061_v1, %s7594_s25  ;;  %v1119_v2 = vsel %vm1108_vm1, %v1061_v1, 0 }
 0x336   : > { %5631 = vmatprep.subr.msk.bf16.mxu1 %vm1108_vm1, %v1061_v1 }
 0x338   : > { %5421 = vmatpush3.bf16.xpose.msra.mxu1 %v1119_v2  ;;  %1069 = vrot.lane.b32.xlu0 %v1057_v49, %s7590_s0 }
 0x339   : > { %1065 = vrot.lane.b32.xlu1 %v1057_v49, %s7594_s25 }
 0x33c   : > { %1071 = vrot.lane.b32.xlu0 %v1060_v63, %s7590_s0 }
 0x33d   : > { %1083 = vrot.lane.b32.xlu1 %v1058_v52, %s7590_s0 }
 0x33f   : > { %5423 = vmatmul.mubr.msk.bf16.vlgmr.msra.gmra.mrb[8].mxu1 %vm1108_vm1, %v1060_v63 }
 0x340   : > { %1073 = vrot.lane.b32.xlu0 %v1057_v49, %s7592_s2 }
 0x341   : > { %1085 = vrot.lane.b32.xlu1 %v1061_v1, %s7590_s0 }
 0x345   : > { %1087 = vrot.lane.b32.xlu1 %v1058_v52, %s7592_s2 }
 0x349   : > { %1089 = vrot.lane.b32.xlu1 %v1061_v1, %s7592_s2 }
 0x34d   : > { %1075 = vrot.lane.b32.xlu1 %v1060_v63, %s7592_s2 }
 0x3a1   : > { %v1080_v3 = vpop.permute.xlu0 %1079 }
 0x3a2   : > { %5632 = vmatprep.subr.msk.bf16.mxu1 %vm1108_vm1, %v1080_v3  ;;  %v1176_v4 = vsel %vm1108_vm1, %v1080_v3, 0 }
 0x3a3   : > { %5427 = vmatpush3.bf16.xpose.msra.mxu1 %v1176_v4 }
 0x3a6   : > { %v1068_v8 = vpop.permute.xlu0 %1067 }
 0x3a7   : > { %v1082_v5 = vpop.permute.xlu1 %1081 }
 0x3a8   : > { %5633 = vmatprep.subr.msk.bf16.mxu1 %vm1108_vm1, %v1082_v5  ;;  %v1179_v6 = vsel %vm1108_vm1, %v1082_v5, 0 }
 0x3aa   : > { %v1070_v10 = vpop.permute.xlu0 %1069 }
 0x3ab   : > { %v1066_v7 = vpop.permute.xlu1 %1065  ;;  %5429 = vmatpush3.bf16.xpose.msra.mxu1 %v1179_v6 }
 0x3ac   : > { %5430 = vmatprep.mubr.msk.bf16.mxu1 %vm1108_vm1, %v1066_v7 }
 0x3ae   : > { %v1072_v15 = vpop.permute.xlu0 %1071 }
 0x3af   : > { %v1084_v9 = vpop.permute.xlu1 %1083 }
 0x3b0   : > { %5634 = vmatprep.subr.msk.bf16.mxu1 %vm1108_vm1, %v1084_v9  ;;  %v1236_v11 = vsel %vm1108_vm1, %v1084_v9, 0 }
 0x3b2   : > { %5431 = vmatmul.mubr.msk.bf16.vlgmr.msra.gmra.mrb[12].mxu1 %vm1108_vm1, %v1068_v8  ;;  %v1074_v17 = vpop.permute.xlu0 %1073 }
 0x3b3   : > { %v1086_v12 = vpop.permute.xlu1 %1085  ;;  %5435 = vmatpush3.bf16.xpose.msra.mxu1 %v1236_v11  ;;  %5438 = vmatprep.mubr.msk.bf16.mxu1 %vm1108_vm1, %v1070_v10 }
 0x3b4   : > { %5635 = vmatprep.subr.msk.bf16.mxu1 %vm1108_vm1, %v1086_v12  ;;  %v1239_v13 = vsel %vm1108_vm1, %v1086_v12, 0 }
 0x3b7   : > { %v1088_v14 = vpop.permute.xlu1 %1087 }
 0x3b8   : > { %v1296_v19 = vsel %vm1108_vm1, %v1088_v14, 0 }
 0x3bb   : > { %5437 = vmatpush3.bf16.xpose.msra.mxu1 %v1239_v13  ;;  %v1090_v20 = vpop.permute.xlu1 %1089 }
 0x3bc   : > { %5636 = vmatprep.subr.msk.bf16.mxu1 %vm1108_vm1, %v1088_v14  ;;  %v1299_v21 = vsel %vm1108_vm1, %v1090_v20, 0 }
 0x3bf   : > { %v1076_v22 = vpop.permute.xlu1 %1075 }
 0x3c2   : > { %5439 = vmatmul.mubr.msk.bf16.vlgmr.msra.gmra.mrb[16].mxu1 %vm1108_vm1, %v1072_v15 }
 0x3c3   : > { %5443 = vmatpush3.bf16.xpose.msra.mxu1 %v1296_v19  ;;  %5446 = vmatprep.mubr.msk.bf16.mxu1 %vm1108_vm1, %v1074_v17 }
 0x3c4   : > { %5637 = vmatprep.subr.msk.bf16.mxu1 %vm1108_vm1, %v1090_v20 }
 0x3cb   : > { %5445 = vmatpush3.bf16.xpose.msra.mxu1 %v1299_v21 }
 0x3d2   : > { %5447 = vmatmul.mubr.msk.bf16.vlgmr.msra.gmra.mrb[20].mxu1 %vm1108_vm1, %v1076_v22 }
 0x412   : > { %v5424_v24 = vpop.f32.mrb[8].mxu1 }
 0x413   : > { %v1155_v25 = vpop.f32.mrb[9].mxu1  ;;  %v1357_v26 = vsel %vm1356_vm2, %v5424_v24, -inf }
 0x414   : > { %1358 = vmax.xlane.f32.xlu0 %v1357_v26  ;;  %v5425_v29 = vpop.f32.mrb[10].mxu1  ;;  %v1350_v34 = vsel %vm1349_vm3, %v1155_v25, -inf }
 0x415   : > { %v1158_v32 = vpop.f32.mrb[11].mxu1 }
 0x416   : > { %v1353_v33 = vsel %vm1349_vm3, %v1158_v32, -inf }
 0x417   : > { %1354 = vmax.xlane.f32.xlu1 %v1353_v33 }
 0x418   : > { %1351 = vmax.xlane.f32.xlu0 %v1350_v34 }
 0x485   : > { %v5432_v35 = vpop.f32.mrb[12].mxu1 }
 0x486   : > { %v1215_v36 = vpop.f32.mrb[13].mxu1  ;;  %v1366_v37 = vsel %vm1356_vm2, %v5432_v35, -inf }
 0x487   : > { %1367 = vmax.xlane.f32.xlu1 %v1366_v37  ;;  %v5433_v38 = vpop.f32.mrb[14].mxu1  ;;  %v1360_v39 = vsel %vm1349_vm3, %v1215_v36, -inf }
 0x488   : > { %1361 = vmax.xlane.f32.xlu0 %v1360_v39  ;;  %v1218_v40 = vpop.f32.mrb[15].mxu1 }
 0x489   : > { %v1363_v41 = vsel %vm1349_vm3, %v1218_v40, -inf }
 0x48c   : > { %1364 = vmax.xlane.f32.xlu0 %v1363_v41 }
 0x495   : > { %v6524_v42 = vpop.f32.mrb[16].mxu1 }
 0x496   : > { %v6526_v43 = vpop.f32.mrb[17].mxu1  ;;  %v1375_v44 = vsel %vm1356_vm2, %v6524_v42, -inf }
 0x497   : > { %1376 = vmax.xlane.f32.xlu0 %v1375_v44  ;;  %v5441_v45 = vpop.f32.mrb[18].mxu1  ;;  %v1369_v49 = vsel %vm1349_vm3, %v6526_v43, -inf }
 0x498   : > { %v6530_v46 = vpop.f32.mrb[19].mxu1 }
 0x499   : > { %v1372_v47 = vsel %vm1349_vm3, %v6530_v46, -inf }
 0x49a   : > { %1373 = vmax.xlane.f32.xlu1 %v1372_v47 }
 0x49b   : > { %1370 = vmax.xlane.f32.xlu0 %v1369_v49 }
 0x4a1   : > { %v1359_v60 = vpop.xlane.xlu0 %1358 }
 0x4a2   : > { %v1389_v61 = vsub.f32 %v5424_v24, %v1359_v60 }
 0x4a4   : > { %v1403_v63 = vmul.f32 1.442695, %v1389_v61  ;;  %v1355_v1 = vpop.xlane.xlu1 %1354 }
 0x4a5   : > { %v6536_v50 = vpop.f32.mrb[20].mxu1  ;;  %v1352_v62 = vpop.xlane.xlu0 %1351  ;;  %v1388_v3 = vsub.f32 %v1158_v32, %v1355_v1 }
 0x4a6   : > { %v6538_v51 = vpop.f32.mrb[21].mxu1  ;;  %v1384_v59 = vsel %vm1356_vm2, %v6536_v50, -inf  ;;  %v1387_v0 = vsub.f32 %v1155_v25, %v1352_v62  ;;  %5914 = vpow2.f32 %v1403_v63 }
 0x4a7   : > { %v5449_v52 = vpop.f32.mrb[22].mxu1  ;;  %v1378_v55 = vsel %vm1349_vm3, %v6538_v51, -inf  ;;  %v1401_v4 = vmul.f32 1.442695, %v1388_v3 }
 0x4a8   : > { %1379 = vmax.xlane.f32.xlu1 %v1378_v55  ;;  %v6542_v56 = vpop.f32.mrb[23].mxu1  ;;  %v1399_v2 = vmul.f32 1.442695, %v1387_v0 }
 0x4a9   : > { %v1381_v58 = vsel %vm1349_vm3, %v6542_v56, -inf }
 0x4aa   : > { %1382 = vmax.xlane.f32.xlu0 %v1381_v58  ;;  %5916 = vpow2.f32 %v1399_v2 }
 0x4ab   : > { %5918 = vpow2.f32 %v1401_v4 }
 0x4ac   : > { %1385 = vmax.xlane.f32.xlu1 %v1384_v59 }
 0x4b0   : > { %v6556_v5 = vpop.eup %5914 }
 0x4b1   : > { %v1429_v6 = vsel %vm1356_vm2, %v6556_v5, 0.0 }
 0x4b4   : > { %v6560_v7 = vpop.eup %5916 }
 0x4b5   : > { %v1423_v8 = vsel %vm1349_vm3, %v6560_v7, 0.0  ;;  %v6564_v9 = vpop.eup %5918 }
 0x4b6   : > { %v1426_v10 = vsel %vm1349_vm3, %v6564_v9, 0.0 }
 0x4bd   : > { %1095 = vrot.lane.b32.xlu1 %v6470_v48, %s7594_s25 }
 0x4c0   : > { %1093 = vrot.lane.b32.xlu0 %v6476_v54, %s7594_s25  ;;  %s7517_s25 = scalar_lea.hbm %s7619_s27, %s5195_s20 }
 0x4c1   : > { %1098 = vrot.lane.b32.xlu1 %v6476_v54, %s7590_s0 }
 0x4c5   : > { %1100 = vrot.lane.b32.xlu1 %v6470_v48, %s7590_s0 }
 0x4df   : > { %1430 = vadd.xlane.f32.xlu0 %v1429_v6 }
 0x4e3   : > { %1424 = vadd.xlane.f32.xlu0 %v1423_v8 }
 0x4e9   : > { %1427 = vadd.xlane.f32.xlu1 %v1426_v10 }
 0x514   : > { %v1368_v11 = vpop.xlane.xlu1 %1367 }
 0x515   : > { %v1392_v12 = vsub.f32 %v5432_v35, %v1368_v11  ;;  %v1362_v13 = vpop.xlane.xlu0 %1361 }
 0x516   : > { %v1390_v14 = vsub.f32 %v1215_v36, %v1362_v13 }
 0x517   : > { %v1409_v15 = vmul.f32 1.442695, %v1392_v12 }
 0x518   : > { %v1405_v17 = vmul.f32 1.442695, %v1390_v14 }
 0x519   : > { %5920 = vpow2.f32 %v1409_v15  ;;  %v1365_v19 = vpop.xlane.xlu0 %1364 }
 0x51a   : > { %v1391_v20 = vsub.f32 %v1218_v40, %v1365_v19  ;;  %5922 = vpow2.f32 %v1405_v17 }
 0x51c   : > { %v1407_v21 = vmul.f32 1.442695, %v1391_v20 }
 0x51e   : > { %5924 = vpow2.f32 %v1407_v21 }
 0x523   : > { %v6568_v22 = vpop.eup %5920 }
 0x524   : > { %v1377_v24 = vpop.xlane.xlu0 %1376  ;;  %v1438_v25 = vsel %vm1356_vm2, %v6568_v22, 0.0  ;;  %v6572_v26 = vpop.eup %5922 }
 0x525   : > { %v1395_v29 = vsub.f32 %v6524_v42, %v1377_v24  ;;  %1439 = vadd.xlane.f32.xlu1 %v1438_v25  ;;  %v1432_v37 = vsel %vm1349_vm3, %v6572_v26, 0.0  ;;  %v5732_v25 = vld [vmem:[%s7567_s7] sm:$0xff]  }
 0x527   : > { %v1415_v32 = vmul.f32 1.442695, %v1395_v29  ;;  %v1374_v33 = vpop.xlane.xlu1 %1373 }
 0x528   : > { %v6575_v34 = vpop.eup %5924  ;;  %v1394_v35 = vsub.f32 %v6530_v46, %v1374_v33  ;;  %v1371_v36 = vpop.xlane.xlu0 %1370 }
 0x529   : > { %5926 = vpow2.f32 %v1415_v32  ;;  %v1393_v38 = vsub.f32 %v6526_v43, %v1371_v36  ;;  %1433 = vadd.xlane.f32.xlu1 %v1432_v37  ;;  %v1435_v39 = vsel %vm1349_vm3, %v6575_v34, 0.0 }
 0x52a   : > { %v1413_v40 = vmul.f32 1.442695, %v1394_v35  ;;  %1436 = vadd.xlane.f32.xlu0 %v1435_v39 }
 0x52b   : > { %v1411_v41 = vmul.f32 1.442695, %v1393_v38 }
 0x52c   : > { %5928 = vpow2.f32 %v1413_v40 }
 0x52d   : > { %5930 = vpow2.f32 %v1411_v41 }
 0x533   : > { %v6583_v42 = vpop.eup %5926 }
 0x534   : > { %v1447_v44 = vsel %vm1356_vm2, %v6583_v42, 0.0 }
 0x535   : > { %v1380_v45 = vpop.xlane.xlu1 %1379  ;;  %1448 = vadd.xlane.f32.xlu0 %v1447_v44 }
 0x536   : > { %v6587_v46 = vpop.eup %5928  ;;  %v1396_v52 = vsub.f32 %v6538_v51, %v1380_v45 }
 0x537   : > { %v6589_v47 = vpop.eup %5930  ;;  %v1383_v43 = vpop.xlane.xlu0 %1382  ;;  %v1444_v49 = vsel %vm1349_vm3, %v6587_v46, 0.0 }
 0x538   : > { %v1397_v55 = vsub.f32 %v6542_v56, %v1383_v43  ;;  %1445 = vadd.xlane.f32.xlu1 %v1444_v49  ;;  %v1441_v58 = vsel %vm1349_vm3, %v6589_v47, 0.0  ;;  %v1417_v63 = vmul.f32 1.442695, %v1396_v52 }
 0x539   : > { %v1386_v59 = vpop.xlane.xlu1 %1385  ;;  %1442 = vadd.xlane.f32.xlu0 %v1441_v58 }
 0x53a   : > { %v1419_v60 = vmul.f32 1.442695, %v1397_v55  ;;  %v1398_v61 = vsub.f32 %v6536_v50, %v1386_v59 }
 0x53b   : > { %v1094_v62 = vpop.permute.xlu0 %1093 }
 0x53c   : > { %5932 = vpow2.f32 %v1419_v60  ;;  %v1421_v0 = vmul.f32 1.442695, %v1398_v61  ;;  %5458 = vmatprep.subr.bf16.mxu1 %v1094_v62 }
 0x53d   : > { %v1096_v1 = vpop.permute.xlu1 %1095  ;;  %5459 = vmatpush3.bf16.msra.mxu1 %v1094_v62  ;;  %v5734_v62 = vld [vmem:[%s7567_s7 + $0x10] sm:$0xff]  }
 0x53e   : > { %5934 = vpow2.f32 %v1421_v0  ;;  %v1557_v51 = vand.u32 %v6474_v53, %v1096_v1 }
 0x53f   : > { %5936 = vpow2.f32 %v1417_v63 }
 0x540   : > { %5460 = vmatprep.subr.bf16.mxu1 %v1557_v51 }
 0x541   : > { %v1099_v56 = vpop.permute.xlu1 %1098  ;;  %5461 = vmatpush3.bf16.msra.mxu1 %v1557_v51 }
 0x542   : > { %5466 = vmatprep.subr.bf16.mxu0 %v1099_v56 }
 0x545   : > { %v1101_v11 = vpop.permute.xlu1 %1100 }
 0x546   : > { %v6599_v2 = vpop.eup %5932 }
 0x547   : > { %v1453_v50 = vsel %vm1349_vm3, %v6599_v2, 0.0 }
 0x548   : > { %v6603_v3 = vpop.eup %5934  ;;  %1454 = vadd.xlane.f32.xlu0 %v1453_v50 }
 0x549   : > { %v1456_v4 = vsel %vm1356_vm2, %v6603_v3, 0.0  ;;  %v6607_v6 = vpop.eup %5936 }
 0x54a   : > { %1457 = vadd.xlane.f32.xlu1 %v1456_v4  ;;  %v1450_v8 = vsel %vm1349_vm3, %v6607_v6, 0.0 }
 0x54e   : > { %1451 = vadd.xlane.f32.xlu1 %v1450_v8 }
 0x55e   : > { %1103 = vrot.lane.b32.xlu0 %v6476_v54, %s7592_s2 }
 0x55f   : > { %1105 = vrot.lane.b32.xlu1 %v6470_v48, %s7592_s2  ;;  %v1614_v48 = vand.u32 %v6474_v53, %v1101_v11  ;;  %s593_s2 = sand.u32 1, %s6142_s30  }
 0x560   : > { %s4837_s21 = sshll.u32 %s593_s2, 4 }
 0x56c   : > { %v1431_v10 = vpop.xlane.xlu0 %1430 }
 0x56d   : > { %5938 = vrcp.f32 %v1431_v10  ;;  %v5735_v10 = vld [vmem:[%s7567_s7 + $0x18] sm:$0xff]  }
 0x570   : > { %v1425_v12 = vpop.xlane.xlu0 %1424 }
 0x571   : > { %5940 = vrcp.f32 %v1425_v12 }
 0x576   : > { %v1428_v13 = vpop.xlane.xlu1 %1427 }
 0x577   : > { %5942 = vrcp.f32 %v1428_v13  ;;  %v5939_v14 = vpop.eup %5938 }
 0x578   : > { %v1473_v19 = vmul.f32 %v5939_v14, %v6556_v5 }
 0x57a   : > { %v1484_v24 = vpack.c.bf16 %v1473_v19, %v1473_v19 }
 0x57b   : > { %v5941_v15 = vpop.eup %5940 }
 0x57c   : > { %v1471_v20 = vmul.f32 %v5941_v15, %v6560_v7 }
 0x581   : > { %v5943_v17 = vpop.eup %5942 }
 0x582   : > { %v1472_v21 = vmul.f32 %v5943_v17, %v6564_v9  ;;  %v5737_v17 = vld [vmem:[%s7567_s7 + $0x28] sm:$0xff]  }
 0x584   : > { %v1483_v54 = vpack.c.bf16 %v1472_v21, %v1471_v20 }
 0x586   : > { %5454 = vmatprep.mubr.msk.bf16.mxu0 %vm1349_vm3, %v1483_v54 }
 0x587   : > { %5455 = vmatmul.mubr.msk.bf16.vlgmr.msra.gmra.mrb[8].mxu0 %vm1349_vm3, %v1484_v24 }
 0x588   : > { %5467 = vmatpush3.bf16.msra.mxu0 %v1099_v56 }
 0x589   : > { %5468 = vmatprep.subr.bf16.mxu0 %v1614_v48 }
 0x58c   : > { %5469 = vmatpush3.bf16.msra.mxu0 %v1614_v48 }
 0x58d   : > { %5482 = vmatprep.subr.bf16.mxu0 %v5732_v25 }
 0x5b2   : > { %v1440_v5 = vpop.xlane.xlu1 %1439 }
 0x5b3   : > { %5944 = vrcp.f32 %v1440_v5 }
 0x5b6   : > { %v1434_v7 = vpop.xlane.xlu1 %1433 }
 0x5b7   : > { %5946 = vrcp.f32 %v1434_v7  ;;  %v1437_v9 = vpop.xlane.xlu0 %1436 }
 0x5b8   : > { %5948 = vrcp.f32 %v1437_v9 }
 0x5bd   : > { %v5945_v29 = vpop.eup %5944 }
 0x5be   : > { %v1476_v35 = vmul.f32 %v5945_v29, %v6568_v22 }
 0x5c0   : > { %v1486_v44 = vpack.c.bf16 %v1476_v35, %v1476_v35 }
 0x5c1   : > { %v5947_v32 = vpop.eup %5946 }
 0x5c2   : > { %v5949_v33 = vpop.eup %5948  ;;  %v1449_v36 = vpop.xlane.xlu0 %1448  ;;  %v1474_v37 = vmul.f32 %v5947_v32, %v6572_v26 }
 0x5c3   : > { %v1475_v38 = vmul.f32 %v5949_v33, %v6575_v34  ;;  %5950 = vrcp.f32 %v1449_v36 }
 0x5c5   : > { %v1446_v39 = vpop.xlane.xlu1 %1445  ;;  %v1485_v40 = vpack.c.bf16 %v1475_v38, %v1474_v37 }
 0x5c6   : > { %5952 = vrcp.f32 %v1446_v39  ;;  %v1443_v41 = vpop.xlane.xlu0 %1442 }
 0x5c7   : > { %5954 = vrcp.f32 %v1443_v41  ;;  %5462 = vmatprep.mubr.msk.bf16.mxu1 %vm1349_vm3, %v1485_v40 }
 0x5c8   : > { %5463 = vmatmul.mubr.msk.bf16.vlgmr.msra.gmra.mrb[24].mxu1 %vm1349_vm3, %v1486_v44 }
 0x5cd   : > { %v5951_v45 = vpop.eup %5950 }
 0x5ce   : > { %v1479_v22 = vmul.f32 %v5951_v45, %v6583_v42  ;;  %v5733_v42 = vld [vmem:[%s7567_s7 + $0x8] sm:$0xff]  }
 0x5d0   : > { %v5953_v43 = vpop.eup %5952  ;;  %v1488_v58 = vpack.c.bf16 %v1479_v22, %v1479_v22 }
 0x5d1   : > { %v5955_v49 = vpop.eup %5954  ;;  %v1478_v26 = vmul.f32 %v5953_v43, %v6587_v46 }
 0x5d2   : > { %v1477_v34 = vmul.f32 %v5955_v49, %v6589_v47 }
 0x5d4   : > { %v1487_v52 = vpack.c.bf16 %v1478_v26, %v1477_v34 }
 0x5d5   : > { %v1455_v55 = vpop.xlane.xlu0 %1454 }
 0x5d6   : > { %5470 = vmatprep.mubr.msk.bf16.mxu0 %vm1349_vm3, %v1487_v52 }
 0x5d7   : > { %v1458_v59 = vpop.xlane.xlu1 %1457  ;;  %5471 = vmatmul.mubr.msk.bf16.vlgmr.msra.gmra.mrb[12].mxu0 %vm1349_vm3, %v1488_v58 }
 0x5d8   : > { %5483 = vmatpush3.bf16.msra.mxu0 %v5732_v25  ;;  %5956 = vrcp.f32 %v1458_v59  ;;  %v5739_v25 = vld [vmem:[%s7567_s7 + $0x38] sm:$0xff]  }
 0x5d9   : > { %v1104_v60 = vpop.permute.xlu0 %1103  ;;  %5958 = vrcp.f32 %v1455_v55  ;;  %5484 = vmatprep.subr.bf16.mxu0 %v5733_v42 }
 0x5da   : > { %5474 = vmatprep.subr.bf16.mxu1 %v1104_v60 }
 0x5db   : > { %v1452_v61 = vpop.xlane.xlu1 %1451  ;;  %5475 = vmatpush3.bf16.msra.mxu1 %v1104_v60 }
 0x5dc   : > { %5960 = vrcp.f32 %v1452_v61  ;;  %5485 = vmatpush3.bf16.msra.mxu0 %v5733_v42 }
 0x5df   : > { %v1106_v46 = vpop.permute.xlu1 %1105 }
 0x5e0   : > { %v1671_v47 = vand.u32 %v6474_v53, %v1106_v46 }
 0x5e2   : > { %5476 = vmatprep.subr.bf16.mxu1 %v1671_v47  ;;  %v5957_v63 = vpop.eup %5956 }
 0x5e3   : > { %5477 = vmatpush3.bf16.msra.mxu1 %v1671_v47  ;;  %v5959_v0 = vpop.eup %5958  ;;  %v1482_v51 = vmul.f32 %v5957_v63, %v6603_v3  ;;  %v5736_v3 = vld [vmem:[%s7567_s7 + $0x20] sm:$0xff]  }
 0x5e4   : > { %5490 = vmatprep.subr.bf16.mxu1 %v5734_v62  ;;  %v1481_v50 = vmul.f32 %v5959_v0, %v6599_v2  ;;  %5498 = vmatprep.subr.bf16.mxu0 %v5736_v3  ;;  %v5738_v2 = vld [vmem:[%s7567_s7 + $0x30] sm:$0xff]  }
 0x5e5   : > { %v1490_v8 = vpack.c.bf16 %v1482_v51, %v1482_v51 }
 0x5e6   : > { %v5961_v1 = vpop.eup %5960 }
 0x5e7   : > { %v1480_v56 = vmul.f32 %v5961_v1, %v6607_v6 }
 0x5e9   : > { %v1489_v4 = vpack.c.bf16 %v1481_v50, %v1480_v56 }
 0x5eb   : > { %5478 = vmatprep.mubr.msk.bf16.mxu1 %vm1349_vm3, %v1489_v4 }
 0x5ec   : > { %5479 = vmatmul.mubr.msk.bf16.vlgmr.msra.gmra.mrb[28].mxu1 %vm1349_vm3, %v1490_v8 }
 0x5ed   : > { %5491 = vmatpush3.bf16.msra.mxu1 %v5734_v62 }
 0x5ee   : > { %5492 = vmatprep.subr.bf16.mxu1 %v5735_v10 }
 0x5f1   : > { %5493 = vmatpush3.bf16.msra.mxu1 %v5735_v10 }
 0x5f2   : > { %5506 = vmatprep.subr.bf16.mxu1 %v5738_v2 }
 0x65a   : > { %v5456_v6 = vpop.f32.mrb[8].mxu0 }
 0x65b   : > { %v1536_v11 = vpop.f32.mrb[9].mxu0  ;;  %v1722_v15 = vpack.c.bf16 %v5456_v6, %v5456_v6 }
 0x65c   : > { %v5457_v12 = vpop.f32.mrb[10].mxu0 }
 0x65d   : > { %v1539_v13 = vpop.f32.mrb[11].mxu0 }
 0x65e   : > { %v1721_v14 = vpack.c.bf16 %v1539_v13, %v1536_v11 }
 0x660   : > { %5486 = vmatprep.mubr.msk.bf16.mxu0 %vm1108_vm1, %v1721_v14 }
 0x661   : > { %5487 = vmatmul.mubr.msk.bf16.vlgmr.msra.gmra.mrb[16].mxu0 %vm1108_vm1, %v1722_v15 }
 0x662   : > { %5499 = vmatpush3.bf16.msra.mxu0 %v5736_v3 }
 0x663   : > { %5500 = vmatprep.subr.bf16.mxu0 %v5737_v17 }
 0x666   : > { %5501 = vmatpush3.bf16.msra.mxu0 %v5737_v17 }
 0x69b   : > { %v5464_v19 = vpop.f32.mrb[24].mxu1 }
 0x69c   : > { %v1593_v20 = vpop.f32.mrb[25].mxu1  ;;  %v1724_v48 = vpack.c.bf16 %v5464_v19, %v5464_v19 }
 0x69d   : > { %v5465_v21 = vpop.f32.mrb[26].mxu1 }
 0x69e   : > { %v1596_v54 = vpop.f32.mrb[27].mxu1  ;;  %v5748_v21 = vld [vmem:[%s7571_s11 + $0x14] ss:$8 sps:$4 sm:$0xff]  }
 0x69f   : > { %v1723_v24 = vpack.c.bf16 %v1596_v54, %v1593_v20  ;;  %v5745_v20 = vld [vmem:[%s7573_s13 + $0x4] ss:$8 sps:$4 sm:$0xff]   ;;  %v5751_v54 = vld [vmem:[%s7573_s13 + $0x14] ss:$8 sps:$4 sm:$0xff]  }
 0x6a1   : > { %5494 = vmatprep.mubr.msk.bf16.mxu1 %vm1108_vm1, %v1723_v24  ;;  %v5746_v24 = vld [vmem:[%s7571_s11 + $0x10] ss:$8 sps:$4 sm:$0xff]  }
 0x6a2   : > { %5495 = vmatmul.mubr.msk.bf16.vlgmr.msra.gmra.mrb[32].mxu1 %vm1108_vm1, %v1724_v48  ;;  %v5749_v48 = vld [vmem:[%s7573_s13 + $0x10] ss:$8 sps:$4 sm:$0xff]  }
 0x6a3   : > { %5507 = vmatpush3.bf16.msra.mxu1 %v5738_v2  ;;  %v4905_v2 = vld [vmem:[%s7568_s8] ss:$0 sm:$0xff] }
 0x6a4   : > { %5508 = vmatprep.subr.bf16.mxu1 %v5739_v25 }
 0x6a7   : > { %5509 = vmatpush3.bf16.msra.mxu1 %v5739_v25 }
 0x6a8   : > { %2359 = vmatprep.subr.bf16.mxu1 %v5745_v20 }
 0x6aa   : > { %v5472_v5 = vpop.f32.mrb[12].mxu0 }
 0x6ab   : > { %v1650_v7 = vpop.f32.mrb[13].mxu0  ;;  %v1726_v33 = vpack.c.bf16 %v5472_v5, %v5472_v5 }
 0x6ac   : > { %v5473_v9 = vpop.f32.mrb[14].mxu0 }
 0x6ad   : > { %v1653_v29 = vpop.f32.mrb[15].mxu0 }
 0x6ae   : > { %v1725_v32 = vpack.c.bf16 %v1653_v29, %v1650_v7 }
 0x6b0   : > { %5502 = vmatprep.mubr.msk.bf16.mxu0 %vm1108_vm1, %v1725_v32 }
 0x6b1   : > { %5503 = vmatmul.mubr.msk.bf16.vlgmr.msra.gmra.mrb[20].mxu0 %vm1108_vm1, %v1726_v33 }
 0x6b2   : > { %2232 = vmatprep.mubr.bf16.mxu0 %v6152_v57 }
 0x6bf   : > { %v5480_v35 = vpop.f32.mrb[28].mxu1 }
 0x6c0   : > { %v1707_v36 = vpop.f32.mrb[29].mxu1  ;;  %v1728_v40 = vpack.c.bf16 %v5480_v35, %v5480_v35 }
 0x6c1   : > { %v5481_v37 = vpop.f32.mrb[30].mxu1 }
 0x6c2   : > { %v1710_v38 = vpop.f32.mrb[31].mxu1 }
 0x6c3   : > { %v1727_v39 = vpack.c.bf16 %v1710_v38, %v1707_v36 }
 0x6c5   : > { %5510 = vmatprep.mubr.msk.bf16.mxu1 %vm1108_vm1, %v1727_v39 }
 0x6c6   : > { %5511 = vmatmul.mubr.msk.bf16.vlgmr.msra.gmra.mrb[36].mxu1 %vm1108_vm1, %v1728_v40 }
 0x6c7   : > { %2391 = vmatprep.mubr.bf16.mxu1 %v6152_v57 }
 0x734   : > { %v5488_v41 = vpop.f32.mrb[16].mxu0 }
 0x735   : > { %v1797_v44 = vpop.f32.mrb[17].mxu0  ;;  %v2015_v22 = vsel %vm728_vm0, %v5488_v41, 0.0  ;;  %v5754_v41 = vld [vmem:[%s7571_s11 + $0x24] ss:$8 sps:$4 sm:$0xff]  }
 0x736   : > { %v5489_v45 = vpop.f32.mrb[18].mxu0 }
 0x737   : > { %v1800_v43 = vpop.f32.mrb[19].mxu0  ;;  %v5752_v45 = vld [vmem:[%s7571_s11 + $0x20] ss:$8 sps:$4 sm:$0xff]  }
 0x775   : > { %v5496_v49 = vpop.f32.mrb[32].mxu1 }
 0x776   : > { %v2016_v26 = vsel %vm728_vm0, %v5496_v49, 0.0  ;;  %v1863_v34 = vpop.f32.mrb[33].mxu1  ;;  %v5760_v49 = vld [vmem:[%s7571_s11 + $0x34] ss:$8 sps:$4 sm:$0xff]  }
 0x777   : > { %v2017_v52 = vadd.f32 %v2016_v26, %v2015_v22  ;;  %v2009_v55 = vadd.f32 %v1863_v34, %v1797_v44  ;;  %v5497_v58 = vpop.f32.mrb[34].mxu1  ;;  %v5757_v44 = vld [vmem:[%s7573_s13 + $0x24] ss:$8 sps:$4 sm:$0xff]   ;;  %v5763_v22 = vld [vmem:[%s7573_s13 + $0x34] ss:$8 sps:$4 sm:$0xff]  }
 0x778   : > { %v1866_v59 = vpop.f32.mrb[35].mxu1  ;;  %v5758_v26 = vld [vmem:[%s7571_s11 + $0x30] ss:$8 sps:$4 sm:$0xff]   ;;  %v5764_v58 = vld [vmem:[%s7571_s11 + $0x40] ss:$8 sps:$4 sm:$0xff]  }
 0x779   : > { %v2012_v60 = vadd.f32 %v1866_v59, %v1800_v43  ;;  %v5755_v43 = vld [vmem:[%s7573_s13 + $0x20] ss:$8 sps:$4 sm:$0xff]   ;;  %v5761_v34 = vld [vmem:[%s7573_s13 + $0x30] ss:$8 sps:$4 sm:$0xff]  }
 0x77a   : > { %v5767_v59 = vld [vmem:[%s7573_s13 + $0x40] ss:$8 sps:$4 sm:$0xff]  }
 0x784   : > { %v5504_v61 = vpop.f32.mrb[20].mxu0 }
 0x785   : > { %v2018_v42 = vsel %vm728_vm0, %v5504_v61, 0.0  ;;  %v1929_v46 = vpop.f32.mrb[21].mxu0  ;;  %v5775_v61 = vld [vmem:[%s7573_s13 + $0x54] ss:$8 sps:$4 sm:$0xff]  }
 0x786   : > { %v2019_v47 = vadd.f32 %v2018_v42, %v2017_v52  ;;  %v2010_v62 = vadd.f32 %v2009_v55, %v1929_v46  ;;  %v5505_v63 = vpop.f32.mrb[22].mxu0  ;;  %v5766_v52 = vld [vmem:[%s7571_s11 + $0x44] ss:$8 sps:$4 sm:$0xff]   ;;  %v5770_v42 = vld [vmem:[%s7571_s11 + $0x50] ss:$8 sps:$4 sm:$0xff]  }
 0x787   : > { %v1932_v0 = vpop.f32.mrb[23].mxu0  ;;  %v5769_v55 = vld [vmem:[%s7573_s13 + $0x44] ss:$8 sps:$4 sm:$0xff]   ;;  %v5773_v46 = vld [vmem:[%s7573_s13 + $0x50] ss:$8 sps:$4 sm:$0xff]  }
 0x788   : > { %v2013_v1 = vadd.f32 %v2012_v60, %v1932_v0  ;;  %v5772_v60 = vld [vmem:[%s7571_s11 + $0x54] ss:$8 sps:$4 sm:$0xff]   ;;  %v5776_v63 = vld [vmem:[%s7571_s11 + $0x60] ss:$8 sps:$4 sm:$0xff]  }
 0x789   : > { %v5779_v0 = vld [vmem:[%s7573_s13 + $0x60] ss:$8 sps:$4 sm:$0xff]  }
 0x799   : > { %v5512_v51 = vpop.f32.mrb[36].mxu1 }
 0x79a   : > { %v2020_v56 = vsel %vm728_vm0, %v5512_v51, 0.0  ;;  %v1995_v50 = vpop.f32.mrb[37].mxu1  ;;  %v5787_v51 = vld [vmem:[%s7573_s13 + $0x74] ss:$8 sps:$4 sm:$0xff]  }
 0x79b   : > { %v2021_v4 = vadd.f32 %v2020_v56, %v2019_v47  ;;  %v2011_v8 = vadd.f32 %v2010_v62, %v1995_v50  ;;  %v5513_v10 = vpop.f32.mrb[38].mxu1  ;;  %v5778_v47 = vld [vmem:[%s7571_s11 + $0x64] ss:$8 sps:$4 sm:$0xff]   ;;  %v5782_v56 = vld [vmem:[%s7571_s11 + $0x70] ss:$8 sps:$4 sm:$0xff]  }
 0x79c   : > { %v1998_v3 = vpop.f32.mrb[39].mxu1  ;;  %v5781_v62 = vld [vmem:[%s7573_s13 + $0x64] ss:$8 sps:$4 sm:$0xff]   ;;  %v5785_v50 = vld [vmem:[%s7573_s13 + $0x70] ss:$8 sps:$4 sm:$0xff]  }
 0x79d   : > { %v2024_v6 = vadd.f32 %v2021_v4, %v6342_v16  ;;  %v2022_v11 = vadd.f32 %v2011_v8, %v6344_v18  ;;  %v2014_v12 = vadd.f32 %v2013_v1, %v1998_v3  ;;  %v5740_v16 = vld [vmem:[%s7571_s11] ss:$8 sps:$4 sm:$0xff]   ;;  %v5742_v18 = vld [vmem:[%s7571_s11 + $0x4] ss:$8 sps:$4 sm:$0xff]   ;;  %v5784_v1 = vld [vmem:[%s7571_s11 + $0x74] ss:$8 sps:$4 sm:$0xff]  }
 0x79e   : > { %2200 = vmatprep.subr.bf16.mxu0 %v5742_v18  ;;  %v4906_v18 = vld [vmem:[%s7569_s9] ss:$0 sm:$0xff] }
 0x79f   : > { %v2023_v13 = vadd.f32 %v2014_v12, %v6352_v23  ;;  %v6681_v14 = vadd.f32 %v4905_v2, %v2022_v11  ;;  %v6683_v15 = vadd.f32 %v4905_v2, %v2024_v6  ;;  %v5743_v23 = vld [vmem:[%s7573_s13] ss:$8 sps:$4 sm:$0xff]   ;;  %2201 = vmatpush1.bf16.msra.mxu0 %v5740_v16 }
 0x7a0   : > { %2360 = vmatpush1.bf16.msra.mxu1 %v5743_v23  ;;  %2202 = vmatprep.subr.bf16.mxu0 %v5748_v21 }
 0x7a1   : > { %2037 = vadd.xlane.f32.xlu0 %v6681_v14  ;;  %v6686_v17 = vadd.f32 %v4905_v2, %v2023_v13  ;;  %v2041_v19 = vsel %vm728_vm0, %v6683_v15, 0.0  ;;  %2361 = vmatprep.subr.bf16.mxu1 %v5751_v54 }
 0x7a3   : > { %2039 = vadd.xlane.f32.xlu1 %v6686_v17  ;;  %2203 = vmatpush1.bf16.msra.mxu0 %v5746_v24  ;;  %v4907_v24 = vld [vmem:[%s7570_s10] ss:$0 sm:$0xff] }
 0x7a4   : > { %2362 = vmatpush1.bf16.msra.mxu1 %v5749_v48  ;;  %2204 = vmatprep.subr.bf16.mxu0 %v5754_v41 }
 0x7a5   : > { %2042 = vadd.xlane.f32.xlu0 %v2041_v19  ;;  %2363 = vmatprep.subr.bf16.mxu1 %v5757_v44 }
 0x7a7   : > { %2205 = vmatpush1.bf16.msra.mxu0 %v5752_v45 }
 0x7a8   : > { %2364 = vmatpush1.bf16.msra.mxu1 %v5755_v43  ;;  %2206 = vmatprep.subr.bf16.mxu0 %v5760_v49 }
 0x7a9   : > { %2365 = vmatprep.subr.bf16.mxu1 %v5763_v22 }
 0x7ab   : > { %2207 = vmatpush1.bf16.msra.mxu0 %v5758_v26 }
 0x7ac   : > { %2366 = vmatpush1.bf16.msra.mxu1 %v5761_v34  ;;  %2208 = vmatprep.subr.bf16.mxu0 %v5766_v52 }
 0x7ad   : > { %2367 = vmatprep.subr.bf16.mxu1 %v5769_v55 }
 0x7af   : > { %2209 = vmatpush1.bf16.msra.mxu0 %v5764_v58 }
 0x7b0   : > { %2368 = vmatpush1.bf16.msra.mxu1 %v5767_v59  ;;  %2210 = vmatprep.subr.bf16.mxu0 %v5772_v60 }
 0x7b1   : > { %2369 = vmatprep.subr.bf16.mxu1 %v5775_v61 }
 0x7b3   : > { %2211 = vmatpush1.bf16.msra.mxu0 %v5770_v42 }
 0x7b4   : > { %2370 = vmatpush1.bf16.msra.mxu1 %v5773_v46  ;;  %2212 = vmatprep.subr.bf16.mxu0 %v5778_v47 }
 0x7b5   : > { %2371 = vmatprep.subr.bf16.mxu1 %v5781_v62 }
 0x7b7   : > { %2213 = vmatpush1.bf16.msra.mxu0 %v5776_v63 }
 0x7b8   : > { %2372 = vmatpush1.bf16.msra.mxu1 %v5779_v0  ;;  %2214 = vmatprep.subr.bf16.mxu0 %v5784_v1 }
 0x7b9   : > { %2373 = vmatprep.subr.bf16.mxu1 %v5787_v51 }
 0x7bb   : > { %2215 = vmatpush1.bf16.msra.mxu0 %v5782_v56 }
 0x7bc   : > { %2374 = vmatpush1.bf16.msra.mxu1 %v5785_v50 }
 0x82e   : > { %v2038_v25 = vpop.xlane.xlu0 %2037 }
 0x82f   : > { %v2044_v5 = vmul.f32 0.0078125, %v2038_v25 }
 0x830   : > { %v2040_v7 = vpop.xlane.xlu1 %2039 }
 0x831   : > { %v6716_v9 = vsub.f32 %v6681_v14, %v2044_v5  ;;  %v2045_v29 = vmul.f32 0.0078125, %v2040_v7 }
 0x832   : > { %v2043_v32 = vpop.xlane.xlu0 %2042 }
 0x833   : > { %v6719_v33 = vsub.f32 %v6686_v17, %v2045_v29  ;;  %v2046_v35 = vmul.f32 0.0078125, %v2043_v32  ;;  %v2050_v36 = vmul.f32 %v6716_v9, %v6716_v9 }
 0x835   : > { %v6724_v37 = vsub.f32 %v6683_v15, %v2046_v35  ;;  %2053 = vadd.xlane.f32.xlu0 %v2050_v36  ;;  %v2051_v38 = vmul.f32 %v6719_v33, %v6719_v33  ;;  %v2108_v35 = vld [vmem:[%s7572_s12] sm:$0x3] }
 0x836   : > { %v2113_v36 = vrot.slane %v2108_v35, %v6461_v30 }
 0x837   : > { %v2052_v39 = vmul.f32 %v6724_v37, %v6724_v37 }
 0x839   : > { %2055 = vadd.xlane.f32.xlu0 %v2051_v38  ;;  %v2057_v40 = vsel %vm728_vm0, %v2052_v39, 0.0 }
 0x83a   : > { %2058 = vadd.xlane.f32.xlu1 %v2057_v40 }
 0x8c2   : > { %v2054_v4 = vpop.xlane.xlu0 %2053 }
 0x8c3   : > { %v2060_v8 = vmul.f32 0.0078125, %v2054_v4 }
 0x8c5   : > { %v2063_v10 = vadd.f32 1e-06, %v2060_v8 }
 0x8c6   : > { %v2056_v3 = vpop.xlane.xlu0 %2055 }
 0x8c7   : > { %5962 = vrsqrt.f32 %v2063_v10  ;;  %v2061_v2 = vmul.f32 0.0078125, %v2056_v3  ;;  %v2059_v6 = vpop.xlane.xlu1 %2058 }
 0x8c8   : > { %v2062_v11 = vmul.f32 0.0078125, %v2059_v6 }
 0x8c9   : > { %v2064_v12 = vadd.f32 1e-06, %v2061_v2 }
 0x8ca   : > { %v2065_v13 = vadd.f32 1e-06, %v2062_v11 }
 0x8cb   : > { %5964 = vrsqrt.f32 %v2064_v12 }
 0x8cc   : > { %5966 = vrsqrt.f32 %v2065_v13 }
 0x8d1   : > { %v5963_v19 = vpop.eup %5962 }
 0x8d2   : > { %v2069_v16 = vmul.f32 %v5963_v19, %v6716_v9 }
 0x8d4   : > { %v2078_v54 = vmul.f32 %v4906_v18, %v2069_v16 }
 0x8d5   : > { %v5965_v23 = vpop.eup %5964 }
 0x8d6   : > { %v5967_v20 = vpop.eup %5966  ;;  %v2070_v21 = vmul.f32 %v5965_v23, %v6719_v33  ;;  %v2087_v5 = vadd.f32 %v4907_v24, %v2078_v54  ;;  %v2267_v54 = vld [vmem:[%s7574_s14] sm:$0x3] }
 0x8d7   : > { %v2071_v25 = vmul.f32 %v5967_v20, %v6724_v37  ;;  %v2117_v37 = vrot.slane %v2108_v35, %v6464_v31 }
 0x8d8   : > { %v2079_v48 = vmul.f32 %v4906_v18, %v2070_v21 }
 0x8d9   : > { %v2080_v9 = vmul.f32 %v4906_v18, %v2071_v25 }
 0x8da   : > { %v2088_v7 = vadd.f32 %v4907_v24, %v2079_v48 }
 0x8db   : > { %v2089_v32 = vadd.f32 %v4907_v24, %v2080_v9 }
 0x8dc   : > { %v2090_v29 = vpack.c.bf16 %v2088_v7, %v2087_v5  ;;  %v2272_v5 = vrot.slane %v2267_v54, %v6461_v30 }
 0x8dd   : > { %v2091_v33 = vpack.c.bf16 %v2089_v32, %v2089_v32 }
 0x8de   : > { %2233 = vmatmul.mubr.bf16.vlgmr.msra.gmra.mrb[24].mxu0 %v2090_v29  ;;  %2392 = vmatmul.mubr.bf16.vlgmr.msra.gmra.mrb[40].mxu1 %v2090_v29  ;;  %v2276_v29 = vrot.slane %v2267_v54, %v6464_v31 }
 0x8df   : > { %2242 = vmatprep.mubr.bf16.mxu0 %v6152_v57  ;;  %2401 = vmatprep.mubr.bf16.mxu1 %v6152_v57 }
 0x8e6   : > { %2243 = vmatmul.mubr.bf16.gmra.mrb[28].mxu0 %v2091_v33  ;;  %2402 = vmatmul.mubr.bf16.gmra.mrb[44].mxu1 %v2091_v33 }
 0x8e7   : > { %3004 = vmatprep.mubr.bf16.mxu1 %v6152_v57 }
 0x9b1   : > { %v2234_v38 = vpop.f32.mrb[24].mxu0  ;;  %v6820_v39 = vpop.f32.mrb[40].mxu1 }
 0x9b2   : > { %v2235_v40 = vadd.f32 %v2234_v38, %v2113_v36  ;;  %v2236_v41 = vpop.f32.mrb[25].mxu0  ;;  %v6822_v44 = vpop.f32.mrb[41].mxu1  ;;  %v2394_v35 = vadd.f32 %v6820_v39, %v2272_v5 }
 0x9b3   : > { %v2237_v45 = vadd.f32 %v2236_v41, %v2117_v37  ;;  %v2238_v43 = vpop.f32.mrb[26].mxu0  ;;  %v6824_v49 = vpop.f32.mrb[42].mxu1  ;;  %v2396_v38 = vadd.f32 %v6822_v44, %v2276_v29 }
 0x9b4   : > { %v2410_v22 = vsub.f32 0.0, %v2235_v40  ;;  %v2239_v26 = vadd.f32 %v2238_v43, %v2113_v36  ;;  %v2240_v34 = vpop.f32.mrb[27].mxu0  ;;  %v6826_v52 = vpop.f32.mrb[43].mxu1 }
 0x9b5   : > { %v2411_v55 = vsub.f32 0.0, %v2237_v45  ;;  %v2241_v58 = vadd.f32 %v2240_v34, %v2117_v37  ;;  %v2398_v34 = vadd.f32 %v6824_v49, %v2272_v5 }
 0x9b6   : > { %v2416_v59 = vmul.f32 1.442695, %v2410_v22  ;;  %v2412_v60 = vsub.f32 0.0, %v2239_v26 }
 0x9b7   : > { %v2418_v61 = vmul.f32 1.442695, %v2411_v55  ;;  %v2413_v42 = vsub.f32 0.0, %v2241_v58 }
 0x9b8   : > { %5968 = vpow2.f32 %v2416_v59  ;;  %v2420_v46 = vmul.f32 1.442695, %v2412_v60  ;;  %v2400_v60 = vadd.f32 %v6826_v52, %v2276_v29  ;;  %v5788_v52 = vld [vmem:[%s7577_s17 + $0x40] sm:$0xff]  }
 0x9b9   : > { %5970 = vpow2.f32 %v2418_v61  ;;  %v2422_v47 = vmul.f32 1.442695, %v2413_v42  ;;  %v2244_v62 = vpop.f32.mrb[28].mxu0  ;;  %v2403_v63 = vpop.f32.mrb[44].mxu1  ;;  %5264 = vmatprep.subr.bf16.mxu0 %v5788_v52 }
 0x9ba   : > { %5972 = vpow2.f32 %v2420_v46  ;;  %v2245_v0 = vadd.f32 %v2244_v62, %v2113_v36  ;;  %v2246_v1 = vpop.f32.mrb[29].mxu0  ;;  %v2405_v51 = vpop.f32.mrb[45].mxu1 }
 0x9bb   : > { %5974 = vpow2.f32 %v2422_v47  ;;  %v2247_v56 = vadd.f32 %v2246_v1, %v2117_v37  ;;  %v2248_v50 = vpop.f32.mrb[30].mxu0  ;;  %v2407_v4 = vpop.f32.mrb[46].mxu1  ;;  %v2406_v44 = vadd.f32 %v2405_v51, %v2276_v29  ;;  %v5791_v51 = vld [vmem:[%s7577_s17 + $0x8] sm:$0xff]  }
 0x9bc   : > { %v2414_v8 = vsub.f32 0.0, %v2245_v0  ;;  %v2249_v10 = vpop.f32.mrb[31].mxu0  ;;  %v2408_v3 = vpop.f32.mrb[47].mxu1 }
 0x9bd   : > { %v2415_v2 = vsub.f32 0.0, %v2247_v56 }
 0x9be   : > { %v2424_v6 = vmul.f32 1.442695, %v2414_v8 }
 0x9bf   : > { %v2426_v11 = vmul.f32 1.442695, %v2415_v2 }
 0x9c0   : > { %5976 = vpow2.f32 %v2424_v6 }
 0x9c1   : > { %5978 = vpow2.f32 %v2426_v11 }
 0x9c2   : > { %v5969_v12 = vpop.eup %5968 }
 0x9c3   : > { %v5971_v13 = vpop.eup %5970  ;;  %v2428_v19 = vadd.f32 1.0, %v5969_v12 }
 0x9c4   : > { %v5973_v16 = vpop.eup %5972  ;;  %v2429_v18 = vadd.f32 1.0, %v5971_v13 }
 0x9c5   : > { %v5975_v23 = vpop.eup %5974  ;;  %5980 = vrcp.f32 %v2428_v19  ;;  %v2430_v20 = vadd.f32 1.0, %v5973_v16 }
 0x9c6   : > { %5982 = vrcp.f32 %v2429_v18  ;;  %v2431_v21 = vadd.f32 1.0, %v5975_v23 }
 0x9c7   : > { %5984 = vrcp.f32 %v2430_v20 }
 0x9c8   : > { %5986 = vrcp.f32 %v2431_v21 }
 0x9ca   : > { %v5977_v24 = vpop.eup %5976 }
 0x9cb   : > { %v5979_v48 = vpop.eup %5978  ;;  %v2432_v25 = vadd.f32 1.0, %v5977_v24 }
 0x9cc   : > { %v2433_v7 = vadd.f32 1.0, %v5979_v48 }
 0x9cd   : > { %5988 = vrcp.f32 %v2432_v25 }
 0x9ce   : > { %5990 = vrcp.f32 %v2433_v7 }
 0x9cf   : > { %v5981_v9 = vpop.eup %5980 }
 0x9d0   : > { %v5983_v32 = vpop.eup %5982  ;;  %v2440_v33 = vmul.f32 %v5981_v9, %v2235_v40 }
 0x9d1   : > { %v5985_v36 = vpop.eup %5984  ;;  %v2441_v37 = vmul.f32 %v5983_v32, %v2237_v45  ;;  %v2404_v45 = vadd.f32 %v2403_v63, %v2272_v5  ;;  %v5790_v63 = vld [vmem:[%s7577_s17 + $0x48] sm:$0xff]   ;;  %v5792_v32 = vld [vmem:[%s7577_s17 + $0x50] sm:$0xff]  }
 0x9d2   : > { %v5987_v41 = vpop.eup %5986  ;;  %v2446_v43 = vmul.f32 %v2440_v33, %v2394_v35  ;;  %v2442_v22 = vmul.f32 %v5985_v36, %v2239_v26  ;;  %v5793_v33 = vld [vmem:[%s7577_s17 + $0x10] sm:$0xff]   ;;  %v5794_v35 = vld [vmem:[%s7577_s17 + $0x58] sm:$0xff]  }
 0x9d3   : > { %v2447_v55 = vmul.f32 %v2441_v37, %v2396_v38  ;;  %v2443_v59 = vmul.f32 %v5987_v41, %v2241_v58  ;;  %v5795_v36 = vld [vmem:[%s7577_s17 + $0x18] sm:$0xff]   ;;  %v5796_v37 = vld [vmem:[%s7577_s17 + $0x60] sm:$0xff]   ;;  %v5798_v41 = vld [vmem:[%s7577_s17 + $0x68] sm:$0xff]  }
 0x9d4   : > { %v2448_v61 = vmul.f32 %v2442_v22, %v2398_v34  ;;  %v5797_v38 = vld [vmem:[%s7577_s17 + $0x20] sm:$0xff]   ;;  %v5800_v22 = vld [vmem:[%s7577_s17 + $0x70] sm:$0xff]  }
 0x9d5   : > { %v2449_v42 = vmul.f32 %v2443_v59, %v2400_v60  ;;  %v2454_v46 = vadd.f32 %v2447_v55, %v2446_v43  ;;  %v5801_v34 = vld [vmem:[%s7577_s17 + $0x30] sm:$0xff]   ;;  %v5803_v59 = vld [vmem:[%s7577_s17 + $0x38] sm:$0xff]  }
 0x9d7   : > { %v5989_v47 = vpop.eup %5988  ;;  %2455 = vadd.xlane.f32.xlu0 %v2454_v46  ;;  %v2457_v40 = vadd.f32 %v2449_v42, %v2448_v61 }
 0x9d8   : > { %v5991_v39 = vpop.eup %5990  ;;  %v2444_v62 = vmul.f32 %v5989_v47, %v2245_v0  ;;  %v5789_v0 = vld [vmem:[%s7577_s17] sm:$0xff]  }
 0x9d9   : > { %v2445_v1 = vmul.f32 %v5991_v39, %v2247_v56  ;;  %2458 = vadd.xlane.f32.xlu1 %v2457_v40  ;;  %5265 = vmatpush3.bf16.msra.mxu0 %v5789_v0 }
 0x9da   : > { %v2450_v50 = vmul.f32 %v2444_v62, %v2404_v45  ;;  %5266 = vmatprep.subr.bf16.mxu0 %v5790_v63  ;;  %v2452_v45 = vld [vmem:[%s7575_s15] sm:$0x3] }
 0x9db   : > { %v2451_v26 = vmul.f32 %v2445_v1, %v2406_v44  ;;  %v2453_v44 = vld [vmem:[%s7576_s16] sm:$0x3] }
 0x9dc   : > { %v2460_v49 = vsel %vm728_vm0, %v2450_v50, 0.0  ;;  %v2528_v0 = vrot.slane %v2453_v44, %v6461_v30  ;;  %v2532_v63 = vrot.slane %v2453_v44, %v6464_v31 }
 0x9dd   : > { %v2461_v58 = vsel %vm728_vm0, %v2451_v26, 0.0  ;;  %5267 = vmatpush3.bf16.msra.mxu0 %v5791_v51 }
 0x9de   : > { %v2462_v4 = vadd.f32 %v2461_v58, %v2460_v49  ;;  %5268 = vmatprep.subr.bf16.mxu0 %v5792_v32 }
 0x9e0   : > { %2463 = vadd.xlane.f32.xlu0 %v2462_v4 }
 0x9e1   : > { %5269 = vmatpush3.bf16.msra.mxu0 %v5793_v33 }
 0x9e2   : > { %5270 = vmatprep.subr.bf16.mxu0 %v5794_v35 }
 0x9e5   : > { %5271 = vmatpush3.bf16.msra.mxu0 %v5795_v36 }
 0x9e6   : > { %5272 = vmatprep.subr.bf16.mxu0 %v5796_v37 }
 0x9e9   : > { %5273 = vmatpush3.bf16.msra.mxu0 %v5797_v38 }
 0x9ea   : > { %5274 = vmatprep.subr.bf16.mxu0 %v5798_v41 }
 0xa64   : > { %v2456_v56 = vpop.xlane.xlu0 %2455 }
 0xa65   : > { %v2466_v8 = vmul.f32 0.00390625, %v2456_v56 }
 0xa66   : > { %v2459_v10 = vpop.xlane.xlu1 %2458 }
 0xa67   : > { %v6851_v3 = vsub.f32 %v2446_v43, %v2466_v8  ;;  %v6853_v2 = vsub.f32 %v2447_v55, %v2466_v8  ;;  %v2467_v6 = vmul.f32 0.00390625, %v2459_v10  ;;  %v5799_v43 = vld [vmem:[%s7577_s17 + $0x28] sm:$0xff]   ;;  %v5802_v55 = vld [vmem:[%s7577_s17 + $0x78] sm:$0xff]  }
 0xa68   : > { %5275 = vmatpush3.bf16.msra.mxu0 %v5799_v43 }
 0xa69   : > { %v6855_v11 = vsub.f32 %v2448_v61, %v2467_v6  ;;  %v6857_v12 = vsub.f32 %v2449_v42, %v2467_v6  ;;  %v2475_v13 = vmul.f32 %v6851_v3, %v6851_v3  ;;  %v2476_v19 = vmul.f32 %v6853_v2, %v6853_v2  ;;  %5276 = vmatprep.subr.bf16.mxu0 %v5800_v22 }
 0xa6b   : > { %v2481_v16 = vadd.f32 %v2476_v19, %v2475_v13  ;;  %v2477_v18 = vmul.f32 %v6855_v11, %v6855_v11  ;;  %v2478_v23 = vmul.f32 %v6857_v12, %v6857_v12 }
 0xa6c   : > { %5277 = vmatpush3.bf16.msra.mxu0 %v5801_v34 }
 0xa6d   : > { %2482 = vadd.xlane.f32.xlu1 %v2481_v16  ;;  %v2464_v20 = vpop.xlane.xlu0 %2463  ;;  %v2484_v21 = vadd.f32 %v2478_v23, %v2477_v18  ;;  %5278 = vmatprep.subr.bf16.mxu0 %v5802_v55 }
 0xa6e   : > { %v2468_v54 = vmul.f32 0.00390625, %v2464_v20 }
 0xa6f   : > { %2485 = vadd.xlane.f32.xlu0 %v2484_v21 }
 0xa70   : > { %v6867_v24 = vsub.f32 %v2450_v50, %v2468_v54  ;;  %v6869_v48 = vsub.f32 %v2451_v26, %v2468_v54  ;;  %5279 = vmatpush3.bf16.msra.mxu0 %v5803_v59  ;;  %v2511_v50 = vrot.slane %v2452_v45, %v6461_v30  ;;  %v2515_v26 = vrot.slane %v2452_v45, %v6464_v31 }
 0xa72   : > { %v2479_v25 = vmul.f32 %v6867_v24, %v6867_v24  ;;  %v2480_v5 = vmul.f32 %v6869_v48, %v6869_v48 }
 0xa74   : > { %v2487_v7 = vsel %vm728_vm0, %v2479_v25, 0.0  ;;  %v2488_v29 = vsel %vm728_vm0, %v2480_v5, 0.0 }
 0xa75   : > { %v2489_v9 = vadd.f32 %v2488_v29, %v2487_v7 }
 0xa77   : > { %2490 = vadd.xlane.f32.xlu1 %v2489_v9 }
 0xafa   : > { %v2483_v60 = vpop.xlane.xlu1 %2482 }
 0xafb   : > { %v2492_v61 = vmul.f32 0.00390625, %v2483_v60 }
 0xafc   : > { %v2486_v42 = vpop.xlane.xlu0 %2485 }
 0xafd   : > { %v2495_v46 = vadd.f32 1e-06, %v2492_v61  ;;  %v2493_v47 = vmul.f32 0.00390625, %v2486_v42 }
 0xaff   : > { %5992 = vrsqrt.f32 %v2495_v46  ;;  %v2496_v40 = vadd.f32 1e-06, %v2493_v47  ;;  %v5806_v46 = vld [vmem:[%s7565_s5 + $0xc4] ss:$12 sps:$4 sm:$0xff]   ;;  %v5809_v47 = vld [vmem:[%s7565_s5 + $0xdc] ss:$12 sps:$4 sm:$0xff]  }
 0xb00   : > { %2972 = vmatprep.subr.bf16.mxu1 %v5806_v46 }
 0xb01   : > { %5994 = vrsqrt.f32 %v2496_v40 }
 0xb04   : > { %v2491_v39 = vpop.xlane.xlu1 %2490 }
 0xb05   : > { %v2494_v62 = vmul.f32 0.00390625, %v2491_v39 }
 0xb07   : > { %v2497_v1 = vadd.f32 1e-06, %v2494_v62 }
 0xb09   : > { %v5993_v49 = vpop.eup %5992  ;;  %5996 = vrsqrt.f32 %v2497_v1 }
 0xb0a   : > { %v2501_v58 = vmul.f32 %v5993_v49, %v6851_v3  ;;  %v2502_v4 = vmul.f32 %v5993_v49, %v6853_v2 }
 0xb0b   : > { %v5995_v52 = vpop.eup %5994 }
 0xb0c   : > { %v2503_v51 = vmul.f32 %v5995_v52, %v6855_v11  ;;  %v2504_v56 = vmul.f32 %v5995_v52, %v6857_v12  ;;  %v2519_v8 = vmul.f32 %v2515_v26, %v2502_v4  ;;  %v2518_v10 = vmul.f32 %v2511_v50, %v2501_v58 }
 0xb0e   : > { %v2521_v6 = vmul.f32 %v2515_v26, %v2504_v56  ;;  %v2520_v13 = vmul.f32 %v2511_v50, %v2503_v51  ;;  %v2536_v19 = vadd.f32 %v2532_v63, %v2519_v8  ;;  %v2535_v18 = vadd.f32 %v2528_v0, %v2518_v10  ;;  %v5813_v51 = vld [vmem:[%s7565_s5 + $0xc8] ss:$12 sps:$4 sm:$0xff]   ;;  %v5810_v56 = vld [vmem:[%s7565_s5 + $0xf0] ss:$12 sps:$4 sm:$0xff]   ;;  %v5816_v8 = vld [vmem:[%s7565_s5 + $0x10c] ss:$12 sps:$4 sm:$0xff]  }
 0xb0f   : > { %5514 = vmatprep.subr.bf16.mxu0 %v5813_v51  ;;  %v5817_v10 = vld [vmem:[%s7565_s5 + $0xe0] ss:$12 sps:$4 sm:$0xff]  }
 0xb10   : > { %v2538_v16 = vadd.f32 %v2532_v63, %v2521_v6  ;;  %v2537_v23 = vadd.f32 %v2528_v0, %v2520_v13  ;;  %v5814_v6 = vld [vmem:[%s7565_s5 + $0x108] ss:$12 sps:$4 sm:$0xff]   ;;  %v5820_v13 = vld [vmem:[%s7565_s5 + $0x124] ss:$12 sps:$4 sm:$0xff]  }
 0xb12   : > { %v2542_v3 = vpack.c.bf16 %v2538_v16, %v2536_v19  ;;  %v2541_v20 = vpack.c.bf16 %v2537_v23, %v2535_v18  ;;  %v5821_v19 = vld [vmem:[%s7565_s5 + $0xf8] ss:$12 sps:$4 sm:$0xff]   ;;  %v5818_v16 = vld [vmem:[%s7565_s5 + $0x120] ss:$12 sps:$4 sm:$0xff]   ;;  %v5824_v18 = vld [vmem:[%s7565_s5 + $0x13c] ss:$12 sps:$4 sm:$0xff]  }
 0xb13   : > { %v5997_v2 = vpop.eup %5996  ;;  %v5825_v23 = vld [vmem:[%s7565_s5 + $0x110] ss:$12 sps:$4 sm:$0xff]  }
 0xb14   : > { %2705 = vmatprep.mubr.bf16.mxu0 %v2542_v3  ;;  %v2506_v21 = vmul.f32 %v5997_v2, %v6869_v48  ;;  %v2505_v54 = vmul.f32 %v5997_v2, %v6867_v24  ;;  %v4956_v48 = vld [vmem:[%s7578_s18] ss:$0 sm:$0xff]  ;;  %v5822_v3 = vld [vmem:[%s7565_s5 + $0x138] ss:$12 sps:$4 sm:$0xff]   ;;  %v5829_v2 = vld [vmem:[%s7565_s5 + $0x128] ss:$12 sps:$4 sm:$0xff]  }
 0xb15   : > { %2706 = vmatmul.mubr.bf16.vlgmr.msra.gmra.mrb[32].mxu0 %v2541_v20  ;;  %v5828_v20 = vld [vmem:[%s7565_s5 + $0x154] ss:$12 sps:$4 sm:$0xff]  }
 0xb16   : > { %v2523_v11 = vmul.f32 %v2515_v26, %v2506_v21  ;;  %v2522_v25 = vmul.f32 %v2511_v50, %v2505_v54  ;;  %5515 = vmatpush3.bf16.msra.mxu0 %v5813_v51  ;;  %v5826_v21 = vld [vmem:[%s7565_s5 + $0x150] ss:$12 sps:$4 sm:$0xff]   ;;  %v5830_v54 = vld [vmem:[%s7565_s5 + $0x168] ss:$12 sps:$4 sm:$0xff]  }
 0xb17   : > { %5516 = vmatprep.subr.bf16.mxu0 %v5817_v10 }
 0xb18   : > { %v2540_v12 = vadd.f32 %v2532_v63, %v2523_v11  ;;  %v2539_v5 = vadd.f32 %v2528_v0, %v2522_v25  ;;  %v5812_v63 = vld [vmem:[%s7565_s5 + $0xf4] ss:$12 sps:$4 sm:$0xff]   ;;  %v5832_v11 = vld [vmem:[%s7565_s5 + $0x16c] ss:$12 sps:$4 sm:$0xff]  }
 0xb19   : > { %v5833_v25 = vld [vmem:[%s7565_s5 + $0x140] ss:$12 sps:$4 sm:$0xff]  }
 0xb1a   : > { %v2544_v7 = vpack.c.bf16 %v2540_v12, %v2540_v12  ;;  %v2543_v29 = vpack.c.bf16 %v2539_v5, %v2539_v5  ;;  %5517 = vmatpush3.bf16.msra.mxu0 %v5817_v10  ;;  %v5834_v12 = vld [vmem:[%s7565_s5 + $0x158] ss:$12 sps:$4 sm:$0xff]   ;;  %v5835_v5 = vld [vmem:[%s7565_s5 + $0x170] ss:$12 sps:$4 sm:$0xff]  }
 0xb1b   : > { %5518 = vmatprep.subr.bf16.mxu0 %v5821_v19 }
 0xb1c   : > { %2713 = vmatprep.mubr.bf16.mxu0 %v2544_v7 }
 0xb1d   : > { %2714 = vmatmul.mubr.bf16.gmra.mrb[36].mxu0 %v2543_v29 }
 0xb1e   : > { %5519 = vmatpush3.bf16.msra.mxu0 %v5821_v19 }
 0xb1f   : > { %5520 = vmatprep.subr.bf16.mxu0 %v5825_v23 }
 0xb22   : > { %5521 = vmatpush3.bf16.msra.mxu0 %v5825_v23 }
 0xb23   : > { %5522 = vmatprep.subr.bf16.mxu0 %v5829_v2 }
 0xb26   : > { %5523 = vmatpush3.bf16.msra.mxu0 %v5829_v2 }
 0xb27   : > { %5524 = vmatprep.subr.bf16.mxu0 %v5833_v25 }
 0xb2a   : > { %5525 = vmatpush3.bf16.msra.mxu0 %v5833_v25 }
 0xb2b   : > { %5526 = vmatprep.subr.bf16.mxu0 %v5834_v12 }
 0xb2e   : > { %5527 = vmatpush3.bf16.msra.mxu0 %v5834_v12 }
 0xb2f   : > { %5528 = vmatprep.subr.bf16.mxu0 %v5835_v5 }
 0xb32   : > { %5529 = vmatpush3.bf16.msra.mxu0 %v5835_v5 }
 0xbe8   : > { %v5280_v9 = vpop.f32.mrb[32].mxu0 }
 0xbe9   : > { %v5281_v32 = vpop.f32.mrb[33].mxu0 }
 0xbea   : > { %v5282_v33 = vadd.f32 %v5281_v32, %v5280_v9  ;;  %v5283_v35 = vpop.f32.mrb[34].mxu0 }
 0xbeb   : > { %v5284_v36 = vpop.f32.mrb[35].mxu0 }
 0xbec   : > { %v2721_v24 = vadd.f32 %v5282_v33, %v6681_v14  ;;  %v5285_v37 = vadd.f32 %v5284_v36, %v5283_v35 }
 0xbee   : > { %v2722_v38 = vadd.f32 %v5285_v37, %v6686_v17  ;;  %v6934_v41 = vadd.f32 %v4956_v48, %v2721_v24  ;;  %v5804_v17 = vld [vmem:[%s7565_s5 + $0xc0] ss:$12 sps:$4 sm:$0xff]  }
 0xbef   : > { %2973 = vmatpush1.bf16.msra.mxu1 %v5804_v17 }
 0xbf0   : > { %2738 = vadd.xlane.f32.xlu0 %v6934_v41  ;;  %v5286_v43 = vpop.f32.mrb[36].mxu0  ;;  %v6937_v22 = vadd.f32 %v4956_v48, %v2722_v38  ;;  %2974 = vmatprep.subr.bf16.mxu1 %v5809_v47  ;;  %v4959_v38 = vld [vmem:[%s7614_s24 + $0x1] ss:$0 sm:$0xff] }
 0xbf1   : > { %v5287_v34 = vpop.f32.mrb[37].mxu0 }
 0xbf2   : > { %v5288_v55 = vadd.f32 %v5287_v34, %v5286_v43  ;;  %2740 = vadd.xlane.f32.xlu1 %v6937_v22  ;;  %v5289_v59 = vpop.f32.mrb[38].mxu0 }
 0xbf3   : > { %v5290_v60 = vpop.f32.mrb[39].mxu0 }
 0xbf4   : > { %v2723_v61 = vadd.f32 %v5288_v55, %v6683_v15  ;;  %v5807_v15 = vld [vmem:[%s7565_s5 + $0xd8] ss:$12 sps:$4 sm:$0xff]   ;;  %v4960_v60 = vld [vmem:[%s7615_s4 + $0x1] ss:$0 sm:$0xff] }
 0xbf5   : > { %2975 = vmatpush1.bf16.msra.mxu1 %v5807_v15 }
 0xbf6   : > { %v6941_v42 = vadd.f32 %v4956_v48, %v2723_v61  ;;  %2976 = vmatprep.subr.bf16.mxu1 %v5812_v63 }
 0xbf8   : > { %v2742_v14 = vsel %vm728_vm0, %v6941_v42, 0.0 }
 0xbf9   : > { %2743 = vadd.xlane.f32.xlu0 %v2742_v14  ;;  %2977 = vmatpush1.bf16.msra.mxu1 %v5810_v56 }
 0xbfa   : > { %2978 = vmatprep.subr.bf16.mxu1 %v5816_v8 }
 0xbfd   : > { %2979 = vmatpush1.bf16.msra.mxu1 %v5814_v6 }
 0xbfe   : > { %2980 = vmatprep.subr.bf16.mxu1 %v5820_v13 }
 0xc01   : > { %2981 = vmatpush1.bf16.msra.mxu1 %v5818_v16 }
 0xc02   : > { %2982 = vmatprep.subr.bf16.mxu1 %v5824_v18 }
 0xc05   : > { %2983 = vmatpush1.bf16.msra.mxu1 %v5822_v3 }
 0xc06   : > { %2984 = vmatprep.subr.bf16.mxu1 %v5828_v20 }
 0xc09   : > { %2985 = vmatpush1.bf16.msra.mxu1 %v5826_v21 }
 0xc0a   : > { %2986 = vmatprep.subr.bf16.mxu1 %v5832_v11 }
 0xc0d   : > { %2987 = vmatpush1.bf16.msra.mxu1 %v5830_v54 }
 0xc7d   : > { %v2739_v40 = vpop.xlane.xlu0 %2738 }
 0xc7e   : > { %v2745_v39 = vmul.f32 0.0078125, %v2739_v40 }
 0xc7f   : > { %v2741_v62 = vpop.xlane.xlu1 %2740 }
 0xc80   : > { %v6958_v45 = vsub.f32 %v6934_v41, %v2745_v39  ;;  %v2746_v1 = vmul.f32 0.0078125, %v2741_v62 }
 0xc82   : > { %v6961_v44 = vsub.f32 %v6937_v22, %v2746_v1  ;;  %v2751_v50 = vmul.f32 %v6958_v45, %v6958_v45 }
 0xc84   : > { %2754 = vadd.xlane.f32.xlu1 %v2751_v50  ;;  %v2752_v26 = vmul.f32 %v6961_v44, %v6961_v44 }
 0xc86   : > { %v2744_v49 = vpop.xlane.xlu0 %2743  ;;  %2756 = vadd.xlane.f32.xlu0 %v2752_v26 }
 0xc87   : > { %v2747_v58 = vmul.f32 0.0078125, %v2744_v49 }
 0xc89   : > { %v6968_v4 = vsub.f32 %v6941_v42, %v2747_v58 }
 0xc8b   : > { %v2753_v52 = vmul.f32 %v6968_v4, %v6968_v4 }
 0xc8d   : > { %v2758_v0 = vsel %vm728_vm0, %v2753_v52, 0.0 }
 0xc8e   : > { %2759 = vadd.xlane.f32.xlu1 %v2758_v0 }
 0xd11   : > { %v2755_v7 = vpop.xlane.xlu1 %2754 }
 0xd12   : > { %v2761_v29 = vmul.f32 0.0078125, %v2755_v7 }
 0xd13   : > { %v2757_v9 = vpop.xlane.xlu0 %2756 }
 0xd14   : > { %v2764_v32 = vadd.f32 1e-06, %v2761_v29  ;;  %v2762_v33 = vmul.f32 0.0078125, %v2757_v9 }
 0xd16   : > { %5998 = vrsqrt.f32 %v2764_v32  ;;  %v2765_v35 = vadd.f32 1e-06, %v2762_v33 }
 0xd18   : > { %6000 = vrsqrt.f32 %v2765_v35 }
 0xd1b   : > { %v2760_v36 = vpop.xlane.xlu1 %2759 }
 0xd1c   : > { %v2763_v48 = vmul.f32 0.0078125, %v2760_v36 }
 0xd1e   : > { %v2766_v24 = vadd.f32 1e-06, %v2763_v48 }
 0xd20   : > { %v5999_v37 = vpop.eup %5998  ;;  %6002 = vrsqrt.f32 %v2766_v24 }
 0xd21   : > { %v2770_v43 = vmul.f32 %v5999_v37, %v6958_v45  ;;  %v4993_v45 = vld [vmem:[%s7566_s6 + $0x3] sm:$0x7] }
 0xd22   : > { %v6001_v34 = vpop.eup %6000  ;;  %v2832_v1 = vrot.slane %v4993_v45, %v6461_v30  ;;  %v2836_v50 = vrot.slane %v4993_v45, %v6464_v31  ;;  %v2840_v10 = vrot.slane %v4993_v45, %v825_v28 }
 0xd23   : > { %v2779_v55 = vmul.f32 %v4959_v38, %v2770_v43  ;;  %v2771_v59 = vmul.f32 %v6001_v34, %v6961_v44 }
 0xd25   : > { %v2780_v61 = vmul.f32 %v4959_v38, %v2771_v59  ;;  %v2788_v14 = vadd.f32 %v4960_v60, %v2779_v55 }
 0xd27   : > { %v2789_v17 = vadd.f32 %v4960_v60, %v2780_v61 }
 0xd29   : > { %v2791_v46 = vpack.c.bf16 %v2789_v17, %v2788_v14 }
 0xd2a   : > { %v6003_v47 = vpop.eup %6002 }
 0xd2b   : > { %3005 = vmatmul.mubr.bf16.vlgmr.msra.gmra.mrb[48].mxu1 %v2791_v46  ;;  %5530 = vmatprep.mubr.bf16.mxu0 %v2791_v46  ;;  %v2772_v15 = vmul.f32 %v6003_v47, %v6968_v4 }
 0xd2c   : > { %3014 = vmatprep.mubr.bf16.mxu1 %v6152_v57 }
 0xd2d   : > { %v2781_v40 = vmul.f32 %v4959_v38, %v2772_v15 }
 0xd2f   : > { %v2790_v39 = vadd.f32 %v4960_v60, %v2781_v40 }
 0xd31   : > { %v2792_v62 = vpack.c.bf16 %v2790_v39, %v2790_v39 }
 0xd33   : > { %3015 = vmatmul.mubr.bf16.gmra.mrb[52].mxu1 %v2792_v62  ;;  %5531 = vmatmul.mubr.bf16.vlgmr.msra.gmra.mrb[40].mxu0 %v2792_v62 }
 0xdfe   : > { %v3006_v44 = vpop.f32.mrb[48].mxu1 }
 0xdff   : > { %v3008_v26 = vpop.f32.mrb[49].mxu1  ;;  %v3007_v58 = vadd.f32 %v3006_v44, %v2832_v1 }
 0xe00   : > { %v3010_v49 = vpop.f32.mrb[50].mxu1  ;;  %v3009_v0 = vadd.f32 %v3008_v26, %v2836_v50 }
 0xe01   : > { %v3011_v4 = vadd.f32 %v3010_v49, %v2832_v1  ;;  %v3012_v52 = vpop.f32.mrb[51].mxu1 }
 0xe02   : > { %v3013_v63 = vadd.f32 %v3012_v52, %v2836_v50 }
 0xe03   : > { %v3071_v51 = vpack.c.bf16 %v3011_v4, %v3007_v58 }
 0xe04   : > { %v3072_v56 = vpack.c.bf16 %v3013_v63, %v3009_v0 }
 0xe05   : > { %5538 = vmatprep.mubr.msk.bf16.mxu1 %vm1108_vm1, %v3071_v51 }
 0xe06   : > { %3093 = vrot.lane.b32.xlu0 %v3072_v56, %s7616_s22  ;;  %v3016_v8 = vpop.f32.mrb[52].mxu1  ;;  %v5532_v6 = vpop.f32.mrb[40].mxu0  ;;  %5638 = vmatprep.subr.msk.bf16.mxu1 %vm1108_vm1, %v3072_v56  ;;  %v3129_v13 = vsel %vm1108_vm1, %v3072_v56, 0 }
 0xe07   : > { %v3018_v19 = vpop.f32.mrb[53].mxu1  ;;  %v3057_v16 = vpop.f32.mrb[41].mxu0  ;;  %5535 = vmatpush3.bf16.xpose.msra.mxu1 %v3129_v13  ;;  %v3017_v25 = vadd.f32 %v3016_v8, %v2832_v1  ;;  %v3066_v38 = vadd.f32 %v5532_v6, %v2840_v10 }
 0xe08   : > { %v3019_v18 = vadd.f32 %v3018_v19, %v2836_v50  ;;  %v3020_v23 = vpop.f32.mrb[54].mxu1  ;;  %v5533_v3 = vpop.f32.mrb[42].mxu0  ;;  %v3058_v54 = vadd.f32 %v3057_v16, %v2840_v10 }
 0xe09   : > { %v3021_v20 = vpop.f32.mrb[55].mxu1  ;;  %v3060_v2 = vpop.f32.mrb[43].mxu0  ;;  %v3074_v12 = vpack.c.bf16 %v3017_v25, %v3017_v25  ;;  %v7085_v60 = vpack.c.bf16 %v3066_v38, %v3066_v38 }
 0xe0a   : > { %v3075_v21 = vpack.c.bf16 %v3019_v18, %v3019_v18  ;;  %v3061_v11 = vadd.f32 %v3060_v2, %v2840_v10  ;;  %3101 = vrot.lane.b32.xlu0 %v3072_v56, %s7617_s23 }
 0xe0b   : > { %v3509_v17 = vand.u32 %v7085_v60, %v6474_v53 }
 0xe0c   : > { %v7055_v27 = vpack.c.bf16 %v3061_v11, %v3058_v54  ;;  %3095 = vrot.lane.b32.xlu1 %v3075_v21, %s7616_s22  ;;  %5639 = vmatprep.subr.msk.bf16.mxu1 %vm1108_vm1, %v3075_v21  ;;  %v3132_v28 = vsel %vm1108_vm1, %v3075_v21, 0 }
 0xe0e   : > { %3099 = vrot.lane.b32.xlu0 %v3075_v21, %s7618_s28 }
 0xe0f   : > { %5537 = vmatpush3.bf16.xpose.msra.mxu1 %v3132_v28 }
 0xe10   : > { %3097 = vrot.lane.b32.xlu1 %v3072_v56, %s7618_s28 }
 0xe12   : > { %3083 = vrot.lane.b32.xlu0 %v3071_v51, %s7618_s28 }
 0xe14   : > { %3079 = vrot.lane.b32.xlu1 %v3071_v51, %s7616_s22 }
 0xe16   : > { %3087 = vrot.lane.b32.xlu0 %v3071_v51, %s7617_s23  ;;  %5539 = vmatmul.mubr.msk.bf16.vlgmr.msra.gmra.mrb[56].mxu1 %vm1108_vm1, %v3074_v12 }
 0xe18   : > { %3081 = vrot.lane.b32.xlu1 %v3074_v12, %s7616_s22 }
 0xe1c   : > { %3103 = vrot.lane.b32.xlu1 %v3075_v21, %s7617_s23 }
 0xe20   : > { %3085 = vrot.lane.b32.xlu1 %v3074_v12, %s7618_s28 }
 0xe24   : > { %3089 = vrot.lane.b32.xlu1 %v3074_v12, %s7617_s23 }
 0xe78   : > { %v3094_v5 = vpop.permute.xlu0 %3093 }
 0xe79   : > { %v3189_v7 = vsel %vm1108_vm1, %v3094_v5, 0  ;;  %5640 = vmatprep.subr.msk.bf16.mxu1 %vm1108_vm1, %v3094_v5 }
 0xe7a   : > { %5543 = vmatpush3.bf16.xpose.msra.mxu1 %v3189_v7 }
 0xe7c   : > { %v3102_v29 = vpop.permute.xlu0 %3101 }
 0xe7d   : > { %v3309_v43 = vsel %vm1108_vm1, %v3102_v29, 0 }
 0xe7e   : > { %v3096_v9 = vpop.permute.xlu1 %3095 }
 0xe7f   : > { %5641 = vmatprep.subr.msk.bf16.mxu1 %vm1108_vm1, %v3096_v9  ;;  %v3192_v33 = vsel %vm1108_vm1, %v3096_v9, 0 }
 0xe80   : > { %v3100_v32 = vpop.permute.xlu0 %3099 }
 0xe81   : > { %v3252_v34 = vsel %vm1108_vm1, %v3100_v32, 0 }
 0xe82   : > { %v3098_v35 = vpop.permute.xlu1 %3097  ;;  %5545 = vmatpush3.bf16.xpose.msra.mxu1 %v3192_v33 }
 0xe83   : > { %v3249_v36 = vsel %vm1108_vm1, %v3098_v35, 0  ;;  %5642 = vmatprep.subr.msk.bf16.mxu0 %vm1108_vm1, %v3098_v35  ;;  %5644 = vmatprep.subr.msk.bf16.mxu1 %vm1108_vm1, %v3102_v29 }
 0xe84   : > { %v3084_v48 = vpop.permute.xlu0 %3083  ;;  %5551 = vmatpush3.bf16.xpose.msra.mxu0 %v3249_v36 }
 0xe85   : > { %5643 = vmatprep.subr.msk.bf16.mxu0 %vm1108_vm1, %v3100_v32  ;;  %5554 = vmatprep.mubr.msk.bf16.mxu0 %vm1108_vm1, %v3084_v48 }
 0xe86   : > { %v3080_v24 = vpop.permute.xlu1 %3079 }
 0xe87   : > { %5546 = vmatprep.mubr.msk.bf16.mxu1 %vm1108_vm1, %v3080_v24 }
 0xe88   : > { %v3088_v55 = vpop.permute.xlu0 %3087 }
 0xe8a   : > { %v3082_v37 = vpop.permute.xlu1 %3081 }
 0xe8b   : > { %5547 = vmatmul.mubr.msk.bf16.vlgmr.msra.gmra.mrb[60].mxu1 %vm1108_vm1, %v3082_v37 }
 0xe8c   : > { %5559 = vmatpush3.bf16.xpose.msra.mxu1 %v3309_v43  ;;  %5553 = vmatpush3.bf16.xpose.msra.mxu0 %v3252_v34 }
 0xe8d   : > { %5562 = vmatprep.mubr.msk.bf16.mxu1 %vm1108_vm1, %v3088_v55  ;;  %5566 = vmatprep.subr.bf16.mxu0 %v7055_v27 }
 0xe8e   : > { %v3104_v59 = vpop.permute.xlu1 %3103 }
 0xe8f   : > { %5645 = vmatprep.subr.msk.bf16.mxu1 %vm1108_vm1, %v3104_v59  ;;  %v3312_v14 = vsel %vm1108_vm1, %v3104_v59, 0 }
 0xe92   : > { %v3086_v61 = vpop.permute.xlu1 %3085 }
 0xe93   : > { %5555 = vmatmul.mubr.msk.bf16.vlgmr.msra.gmra.mrb[44].mxu0 %vm1108_vm1, %v3086_v61 }
 0xe94   : > { %5561 = vmatpush3.bf16.xpose.msra.mxu1 %v3312_v14  ;;  %5567 = vmatpush3.bf16.msra.mxu0 %v7055_v27 }
 0xe95   : > { %5568 = vmatprep.subr.bf16.mxu0 %v3509_v17 }
 0xe96   : > { %v3090_v46 = vpop.permute.xlu1 %3089 }
 0xe98   : > { %5569 = vmatpush3.bf16.msra.mxu0 %v3509_v17 }
 0xe9b   : > { %5563 = vmatmul.mubr.msk.bf16.vlgmr.msra.gmra.mrb[64].mxu1 %vm1108_vm1, %v3090_v46 }
 0xee9   : > { %v5540_v47 = vpop.f32.mrb[56].mxu1 }
 0xeea   : > { %v3168_v15 = vpop.f32.mrb[57].mxu1  ;;  %v3368_v40 = vsel %vm1356_vm2, %v5540_v47, -inf }
 0xeeb   : > { %3369 = vmax.xlane.f32.xlu0 %v3368_v40  ;;  %v5541_v39 = vpop.f32.mrb[58].mxu1  ;;  %v3362_v1 = vsel %vm1349_vm3, %v3168_v15, -inf }
 0xeec   : > { %v3171_v62 = vpop.f32.mrb[59].mxu1 }
 0xeed   : > { %v3365_v45 = vsel %vm1349_vm3, %v3171_v62, -inf }
 0xeee   : > { %3366 = vmax.xlane.f32.xlu1 %v3365_v45 }
 0xeef   : > { %3363 = vmax.xlane.f32.xlu0 %v3362_v1 }
 0xf5e   : > { %v5548_v44 = vpop.f32.mrb[60].mxu1 }
 0xf5f   : > { %v3228_v50 = vpop.f32.mrb[61].mxu1  ;;  %v3377_v26 = vsel %vm1356_vm2, %v5548_v44, -inf }
 0xf60   : > { %3378 = vmax.xlane.f32.xlu1 %v3377_v26  ;;  %v5549_v49 = vpop.f32.mrb[62].mxu1  ;;  %v3371_v58 = vsel %vm1349_vm3, %v3228_v50, -inf }
 0xf61   : > { %3372 = vmax.xlane.f32.xlu0 %v3371_v58  ;;  %v7099_v4 = vpop.f32.mrb[63].mxu1 }
 0xf62   : > { %v3374_v10 = vsel %vm1349_vm3, %v7099_v4, -inf }
 0xf66   : > { %v7101_v52 = vpop.f32.mrb[44].mxu0 }
 0xf67   : > { %v7103_v0 = vpop.f32.mrb[45].mxu0  ;;  %v3386_v18 = vsel %vm1356_vm2, %v7101_v52, -inf }
 0xf68   : > { %v5557_v63 = vpop.f32.mrb[46].mxu0  ;;  %v3380_v51 = vsel %vm1349_vm3, %v7103_v0, -inf }
 0xf69   : > { %v3291_v56 = vpop.f32.mrb[47].mxu0  ;;  %3381 = vmax.xlane.f32.xlu0 %v3380_v51 }
 0xf6a   : > { %v3383_v8 = vsel %vm1349_vm3, %v3291_v56, -inf }
 0xf6b   : > { %3384 = vmax.xlane.f32.xlu1 %v3383_v8 }
 0xf6d   : > { %3375 = vmax.xlane.f32.xlu0 %v3374_v10 }
 0xf6e   : > { %v7110_v6 = vpop.f32.mrb[64].mxu1 }
 0xf6f   : > { %v7112_v13 = vpop.f32.mrb[65].mxu1  ;;  %v3395_v3 = vsel %vm1356_vm2, %v7110_v6, -inf }
 0xf70   : > { %v5565_v19 = vpop.f32.mrb[66].mxu1  ;;  %v3389_v16 = vsel %vm1349_vm3, %v7112_v13, -inf }
 0xf71   : > { %3390 = vmax.xlane.f32.xlu1 %v3389_v16  ;;  %v7118_v23 = vpop.f32.mrb[67].mxu1  ;;  %3387 = vmax.xlane.f32.xlu0 %v3386_v18 }
 0xf72   : > { %v3392_v20 = vsel %vm1349_vm3, %v7118_v23, -inf }
 0xf75   : > { %3396 = vmax.xlane.f32.xlu1 %v3395_v3  ;;  %3393 = vmax.xlane.f32.xlu0 %v3392_v20 }
 0xf78   : > { %v3370_v2 = vpop.xlane.xlu0 %3369 }
 0xf79   : > { %v3400_v21 = vsub.f32 %v5540_v47, %v3370_v2 }
 0xf7b   : > { %v3414_v11 = vmul.f32 1.442695, %v3400_v21  ;;  %v3367_v25 = vpop.xlane.xlu1 %3366 }
 0xf7c   : > { %v3364_v54 = vpop.xlane.xlu0 %3363  ;;  %v3399_v12 = vsub.f32 %v3171_v62, %v3367_v25 }
 0xf7d   : > { %v3398_v28 = vsub.f32 %v3168_v15, %v3364_v54  ;;  %6004 = vpow2.f32 %v3414_v11 }
 0xf7e   : > { %v3412_v7 = vmul.f32 1.442695, %v3399_v12 }
 0xf7f   : > { %v3410_v5 = vmul.f32 1.442695, %v3398_v28 }
 0xf81   : > { %6006 = vpow2.f32 %v3410_v5 }
 0xf82   : > { %6008 = vpow2.f32 %v3412_v7 }
 0xf86   : > { %3109 = vrot.lane.b32.xlu1 %v7085_v60, %s7616_s22 }
 0xf87   : > { %v7132_v29 = vpop.eup %6004 }
 0xf88   : > { %v3440_v9 = vsel %vm1356_vm2, %v7132_v29, 0.0 }
 0xf8a   : > { %3112 = vrot.lane.b32.xlu1 %v7055_v27, %s7618_s28 }
 0xf8b   : > { %3107 = vrot.lane.b32.xlu0 %v7055_v27, %s7616_s22  ;;  %v7136_v32 = vpop.eup %6006  ;;  %s6092_s22 = sshll.u32 %s6156_s1, 4  ;;  %s6093_s22 = int_to_ptr.vmem [resolvable:$false] %s6092_s22 }
 0xf8c   : > { %v3434_v33 = vsel %vm1349_vm3, %v7136_v32, 0.0  ;;  %v7140_v35 = vpop.eup %6008  ;;  %s6094_s4 = scalar_lea.vmem %s6093_s22, 512 }
 0xf8d   : > { %v3437_v36 = vsel %vm1349_vm3, %v7140_v35, 0.0 }
 0xf8e   : > { %3114 = vrot.lane.b32.xlu1 %v7085_v60, %s7618_s28 }
 0xfaa   : > { %3441 = vadd.xlane.f32.xlu0 %v3440_v9 }
 0xfae   : > { %3435 = vadd.xlane.f32.xlu0 %v3434_v33 }
 0xfb2   : > { %3438 = vadd.xlane.f32.xlu1 %v3437_v36 }
 0xfed   : > { %v3379_v48 = vpop.xlane.xlu1 %3378 }
 0xfee   : > { %v3403_v24 = vsub.f32 %v5548_v44, %v3379_v48  ;;  %v3373_v37 = vpop.xlane.xlu0 %3372 }
 0xfef   : > { %v3401_v38 = vsub.f32 %v3228_v50, %v3373_v37 }
 0xff0   : > { %v3420_v43 = vmul.f32 1.442695, %v3403_v24 }
 0xff1   : > { %v3416_v34 = vmul.f32 1.442695, %v3401_v38 }
 0xff2   : > { %6010 = vpow2.f32 %v3420_v43 }
 0xff3   : > { %6012 = vpow2.f32 %v3416_v34 }
 0xff6   : > { %v3382_v55 = vpop.xlane.xlu0 %3381 }
 0xff7   : > { %v3404_v40 = vsub.f32 %v7103_v0, %v3382_v55 }
 0xff8   : > { %v3385_v59 = vpop.xlane.xlu1 %3384 }
 0xff9   : > { %v3405_v61 = vsub.f32 %v3291_v56, %v3385_v59  ;;  %v3422_v26 = vmul.f32 1.442695, %v3404_v40 }
 0xffa   : > { %v3376_v14 = vpop.xlane.xlu0 %3375 }
 0xffb   : > { %v3424_v17 = vmul.f32 1.442695, %v3405_v61  ;;  %v3402_v49 = vsub.f32 %v7099_v4, %v3376_v14  ;;  %v5836_v61 = vld [vmem:[%s7567_s7 + $0x40] sm:$0xff]  }
 0xffc   : > { %v7144_v46 = vpop.eup %6010 }
 0xffd   : > { %6014 = vpow2.f32 %v3424_v17  ;;  %v3449_v47 = vsel %vm1356_vm2, %v7144_v46, 0.0  ;;  %v7148_v15 = vpop.eup %6012  ;;  %v3418_v8 = vmul.f32 1.442695, %v3402_v49 }
 0xffe   : > { %v3391_v39 = vpop.xlane.xlu1 %3390  ;;  %v3388_v62 = vpop.xlane.xlu0 %3387  ;;  %3450 = vadd.xlane.f32.xlu1 %v3449_v47  ;;  %v3443_v50 = vsel %vm1349_vm3, %v7148_v15, 0.0 }
 0xfff   : > { %v3406_v45 = vsub.f32 %v7101_v52, %v3388_v62  ;;  %v3407_v1 = vsub.f32 %v7112_v13, %v3391_v39 }
0x1001   : > { %v3426_v44 = vmul.f32 1.442695, %v3406_v45  ;;  %v3428_v0 = vmul.f32 1.442695, %v3407_v1 }
0x1002   : > { %v3397_v58 = vpop.xlane.xlu1 %3396  ;;  %3444 = vadd.xlane.f32.xlu1 %v3443_v50  ;;  %v3394_v63 = vpop.xlane.xlu0 %3393 }
0x1003   : > { %v3409_v51 = vsub.f32 %v7110_v6, %v3397_v58  ;;  %6016 = vpow2.f32 %v3426_v44  ;;  %v3408_v52 = vsub.f32 %v7118_v23, %v3394_v63 }
0x1004   : > { %6018 = vpow2.f32 %v3422_v26 }
0x1005   : > { %v3432_v56 = vmul.f32 1.442695, %v3409_v51  ;;  %v3430_v6 = vmul.f32 1.442695, %v3408_v52 }
0x1006   : > { %v3110_v10 = vpop.permute.xlu1 %3109  ;;  %v3108_v13 = vpop.permute.xlu0 %3107 }
0x1007   : > { %v7158_v19 = vpop.eup %6014  ;;  %6020 = vpow2.f32 %v3432_v56  ;;  %v3566_v16 = vand.u32 %v3110_v10, %v6474_v53  ;;  %5574 = vmatprep.subr.bf16.mxu1 %v3108_v13  ;;  %v5837_v10 = vld [vmem:[%s7567_s7 + $0x48] sm:$0xff]  }
0x1008   : > { %5575 = vmatpush3.bf16.msra.mxu1 %v3108_v13  ;;  %v3455_v4 = vsel %vm1349_vm3, %v7158_v19, 0.0  ;;  %6022 = vpow2.f32 %v3428_v0 }
0x1009   : > { %3456 = vadd.xlane.f32.xlu1 %v3455_v4  ;;  %5576 = vmatprep.subr.bf16.mxu1 %v3566_v16  ;;  %6024 = vpow2.f32 %v3418_v8 }
0x100a   : > { %v3113_v18 = vpop.permute.xlu1 %3112  ;;  %6026 = vpow2.f32 %v3430_v6 }
0x100b   : > { %5582 = vmatprep.subr.bf16.mxu0 %v3113_v18 }
0x100c   : > { %5577 = vmatpush3.bf16.msra.mxu1 %v3566_v16 }
0x100d   : > { %v7163_v23 = vpop.eup %6016 }
0x100e   : > { %v3458_v3 = vsel %vm1356_vm2, %v7163_v23, 0.0  ;;  %v7167_v20 = vpop.eup %6018  ;;  %v3115_v33 = vpop.permute.xlu1 %3114 }
0x100f   : > { %3459 = vadd.xlane.f32.xlu0 %v3458_v3  ;;  %v3452_v11 = vsel %vm1349_vm3, %v7167_v20, 0.0 }
0x1011   : > { %v7169_v2 = vpop.eup %6020 }
0x1012   : > { %v3467_v21 = vsel %vm1356_vm2, %v7169_v2, 0.0  ;;  %v7173_v54 = vpop.eup %6022 }
0x1013   : > { %3468 = vadd.xlane.f32.xlu1 %v3467_v21  ;;  %v7177_v28 = vpop.eup %6024  ;;  %3453 = vadd.xlane.f32.xlu0 %v3452_v11  ;;  %v3461_v25 = vsel %vm1349_vm3, %v7173_v54, 0.0 }
0x1014   : > { %v3446_v12 = vsel %vm1349_vm3, %v7177_v28, 0.0  ;;  %v7183_v5 = vpop.eup %6026 }
0x1015   : > { %v3464_v7 = vsel %vm1349_vm3, %v7183_v5, 0.0 }
0x1017   : > { %3462 = vadd.xlane.f32.xlu1 %v3461_v25  ;;  %3447 = vadd.xlane.f32.xlu0 %v3446_v12 }
0x101b   : > { %3465 = vadd.xlane.f32.xlu0 %v3464_v7 }
0x1028   : > { %3119 = vrot.lane.b32.xlu1 %v7085_v60, %s7617_s23 }
0x1031   : > { %3117 = vrot.lane.b32.xlu0 %v7055_v27, %s7617_s23  ;;  %v3623_v27 = vand.u32 %v3115_v33, %v6474_v53  ;;  %s595_s23 = scalar_lea.vmem [#allocation2], %s4837_s21  ;;  %s7519_s21 = scalar_lea.sflag [#allocation3], %s593_s2 }
0x1032   : > { %s4771_s28 = sshll.u32 %s595_s23, 4  ;;  %s7512_s28 = int_to_ptr.vmem [resolvable:$true] %s4771_s28 }
0x1033   : > { %s6088_s26 = scalar_lea.vmem %s7512_s28, 256  ;;  %p6095_p0 = scmp.lt.s32.totalorder %s7512_s28, %s6093_s22 }
0x1034   : > { %p6089_p11 = scmp.ne.s32.totalorder %s7512_s28, %s6088_s26  ;;  %p6096_p1 = scmp.lt.s32.totalorder %s6094_s4, %s6088_s26 }
0x1036   : > { %p6090_p12 = pnand %p6089_p11, %p6297_p5  ;;  %p6097_p2 = por %p6096_p1, %p6095_p0 }
0x1037   : > { %v3442_v9 = vpop.xlane.xlu0 %3441 }
0x1038   : > { %6028 = vrcp.f32 %v3442_v9  ;;  %p6091_p13 = pneg %p6090_p12 }
0x103a   : > { %p6098_p3 = pnand %p6097_p2, %p6091_p13 }
0x103b   : > { %v3436_v36 = vpop.xlane.xlu0 %3435 }
0x103c   : > { %6030 = vrcp.f32 %v3436_v36 }
0x103f   : > { %v3439_v48 = vpop.xlane.xlu1 %3438 }
0x1040   : > { %6032 = vrcp.f32 %v3439_v48  ;;  %v5840_v48 = vld [vmem:[%s7567_s7 + $0x68] sm:$0xff]  }
0x1042   : > { %v6029_v24 = vpop.eup %6028 }
0x1043   : > { %v3484_v43 = vmul.f32 %v6029_v24, %v7132_v29 }
0x1045   : > { %v3495_v59 = vpack.c.bf16 %v3484_v43, %v3484_v43 }
0x1046   : > { %v6031_v37 = vpop.eup %6030 }
0x1047   : > { %v3482_v34 = vmul.f32 %v6031_v37, %v7136_v32 }
0x104a   : > { %v6033_v38 = vpop.eup %6032 }
0x104b   : > { %v3483_v55 = vmul.f32 %v6033_v38, %v7140_v35 }
0x104d   : > { %v3494_v60 = vpack.c.bf16 %v3483_v55, %v3482_v34 }
0x104f   : > { %5570 = vmatprep.mubr.msk.bf16.mxu0 %vm1349_vm3, %v3494_v60 }
0x1050   : > { %5571 = vmatmul.mubr.msk.bf16.vlgmr.msra.gmra.mrb[48].mxu0 %vm1349_vm3, %v3495_v59 }
0x1051   : > { %5583 = vmatpush3.bf16.msra.mxu0 %v3113_v18 }
0x1052   : > { %5584 = vmatprep.subr.bf16.mxu0 %v3623_v27 }
0x1055   : > { %5585 = vmatpush3.bf16.msra.mxu0 %v3623_v27 }
0x1056   : > { %5598 = vmatprep.subr.bf16.mxu0 %v5836_v61 }
0x108b   : > { %v3451_v29 = vpop.xlane.xlu1 %3450 }
0x108f   : > { %v3445_v32 = vpop.xlane.xlu1 %3444 }
0x1096   : > { %v3457_v14 = vpop.xlane.xlu1 %3456 }
0x109c   : > { %v3460_v35 = vpop.xlane.xlu0 %3459 }
0x109d   : > { %6034 = vrcp.f32 %v3460_v35 }
0x109e   : > { %6036 = vrcp.f32 %v3457_v14  ;;  %v5843_v14 = vld [vmem:[%s7567_s7 + $0x78] sm:$0xff]  }
0x10a0   : > { %v3469_v17 = vpop.xlane.xlu1 %3468  ;;  %v3454_v47 = vpop.xlane.xlu0 %3453 }
0x10a1   : > { %6038 = vrcp.f32 %v3454_v47 }
0x10a2   : > { %6040 = vrcp.f32 %v3451_v29 }
0x10a3   : > { %6042 = vrcp.f32 %v3445_v32 }
0x10a4   : > { %v3463_v40 = vpop.xlane.xlu1 %3462  ;;  %v3448_v39 = vpop.xlane.xlu0 %3447 }
0x10a5   : > { %6044 = vrcp.f32 %v3448_v39 }
0x10a6   : > { %6046 = vrcp.f32 %v3463_v40 }
0x10a7   : > { %v6035_v62 = vpop.eup %6034 }
0x10a8   : > { %v3466_v45 = vpop.xlane.xlu0 %3465  ;;  %v6037_v1 = vpop.eup %6036  ;;  %v3490_v50 = vmul.f32 %v6035_v62, %v7163_v23 }
0x10a9   : > { %6048 = vrcp.f32 %v3466_v45  ;;  %v3489_v63 = vmul.f32 %v6037_v1, %v7158_v19  ;;  %v3120_v19 = vpop.permute.xlu1 %3119 }
0x10aa   : > { %6050 = vrcp.f32 %v3469_v17  ;;  %v3499_v52 = vpack.c.bf16 %v3490_v50, %v3490_v50  ;;  %v3680_v21 = vand.u32 %v3120_v19, %v6474_v53  ;;  %v5841_v53 = vld [vmem:[%s7567_s7 + $0x58] sm:$0xff]  }
0x10ab   : > { %v6039_v44 = vpop.eup %6038 }
0x10ac   : > { %v6041_v26 = vpop.eup %6040  ;;  %v3118_v49 = vpop.permute.xlu0 %3117  ;;  %v3488_v58 = vmul.f32 %v6039_v44, %v7167_v20 }
0x10ad   : > { %v6043_v51 = vpop.eup %6042  ;;  %5590 = vmatprep.subr.bf16.mxu1 %v3118_v49  ;;  %v3487_v8 = vmul.f32 %v6041_v26, %v7144_v46  ;;  %v5838_v46 = vld [vmem:[%s7567_s7 + $0x60] sm:$0xff]  }
0x10ae   : > { %v3498_v0 = vpack.c.bf16 %v3489_v63, %v3488_v58  ;;  %v3485_v13 = vmul.f32 %v6043_v51, %v7148_v15 }
0x10af   : > { %v6045_v56 = vpop.eup %6044  ;;  %v3497_v23 = vpack.c.bf16 %v3487_v8, %v3487_v8 }
0x10b0   : > { %5586 = vmatprep.mubr.msk.bf16.mxu0 %vm1349_vm3, %v3498_v0  ;;  %v3486_v16 = vmul.f32 %v6045_v56, %v7177_v28  ;;  %v6047_v4 = vpop.eup %6046 }
0x10b1   : > { %5587 = vmatmul.mubr.msk.bf16.vlgmr.msra.gmra.mrb[52].mxu0 %vm1349_vm3, %v3499_v52  ;;  %v3491_v15 = vmul.f32 %v6047_v4, %v7173_v54  ;;  %v5839_v54 = vld [vmem:[%s7567_s7 + $0x50] sm:$0xff]  }
0x10b2   : > { %v3496_v6 = vpack.c.bf16 %v3486_v16, %v3485_v13  ;;  %5599 = vmatpush3.bf16.msra.mxu0 %v5836_v61 }
0x10b3   : > { %v6049_v18 = vpop.eup %6048  ;;  %5600 = vmatprep.subr.bf16.mxu0 %v5837_v10 }
0x10b4   : > { %v6051_v3 = vpop.eup %6050  ;;  %5578 = vmatprep.mubr.msk.bf16.mxu1 %vm1349_vm3, %v3496_v6  ;;  %v3492_v20 = vmul.f32 %v6049_v18, %v7183_v5 }
0x10b5   : > { %5579 = vmatmul.mubr.msk.bf16.vlgmr.msra.gmra.mrb[68].mxu1 %vm1349_vm3, %v3497_v23  ;;  %v3493_v28 = vmul.f32 %v6051_v3, %v7169_v2  ;;  %v5842_v2 = vld [vmem:[%s7567_s7 + $0x70] sm:$0xff]  }
0x10b6   : > { %5591 = vmatpush3.bf16.msra.mxu1 %v3118_v49  ;;  %v3500_v11 = vpack.c.bf16 %v3492_v20, %v3491_v15  ;;  %5601 = vmatpush3.bf16.msra.mxu0 %v5837_v10 }
0x10b7   : > { %5592 = vmatprep.subr.bf16.mxu1 %v3680_v21  ;;  %5614 = vmatprep.subr.bf16.mxu0 %v5838_v46  ;;  %v3501_v25 = vpack.c.bf16 %v3493_v28, %v3493_v28  ;;  %v5067_v28 = vld [vmem:[%s7568_s8 + $0x1] ss:$0 sm:$0xff] }
0x10b8   : > { %5594 = vmatprep.mubr.msk.bf16.mxu1 %vm1349_vm3, %v3500_v11 }
0x10ba   : > { %5593 = vmatpush3.bf16.msra.mxu1 %v3680_v21 }
0x10bb   : > { %5606 = vmatprep.subr.bf16.mxu1 %v5839_v54 }
0x10bd   : > { %5595 = vmatmul.mubr.msk.bf16.vlgmr.msra.gmra.mrb[72].mxu1 %vm1349_vm3, %v3501_v25 }
0x10be   : > { %5607 = vmatpush3.bf16.msra.mxu1 %v5839_v54 }
0x10bf   : > { %5608 = vmatprep.subr.bf16.mxu1 %v5841_v53 }
0x10c2   : > { %5609 = vmatpush3.bf16.msra.mxu1 %v5841_v53 }
0x10c3   : > { %5622 = vmatprep.subr.bf16.mxu1 %v5842_v2 }
0x1123   : > { %v5572_v12 = vpop.f32.mrb[48].mxu0 }
0x1124   : > { %v3545_v5 = vpop.f32.mrb[49].mxu0  ;;  %v3731_v36 = vpack.c.bf16 %v5572_v12, %v5572_v12 }
0x1125   : > { %v5573_v7 = vpop.f32.mrb[50].mxu0 }
0x1126   : > { %v3548_v9 = vpop.f32.mrb[51].mxu0 }
0x1127   : > { %v3730_v33 = vpack.c.bf16 %v3548_v9, %v3545_v5 }
0x1129   : > { %5602 = vmatprep.mubr.msk.bf16.mxu0 %vm1108_vm1, %v3730_v33 }
0x112a   : > { %5603 = vmatmul.mubr.msk.bf16.vlgmr.msra.gmra.mrb[56].mxu0 %vm1108_vm1, %v3731_v36  ;;  %v5849_v36 = vld [vmem:[%s7573_s13 + $0x84] ss:$8 sps:$4 sm:$0xff]  }
0x112b   : > { %5615 = vmatpush3.bf16.msra.mxu0 %v5838_v46 }
0x112c   : > { %5616 = vmatprep.subr.bf16.mxu0 %v5840_v48 }
0x112f   : > { %5617 = vmatpush3.bf16.msra.mxu0 %v5840_v48  ;;  %v5852_v48 = vld [vmem:[%s7571_s11 + $0x94] ss:$8 sps:$4 sm:$0xff]  }
0x1184   : > { %v5588_v24 = vpop.f32.mrb[52].mxu0 }
0x1185   : > { %v3659_v37 = vpop.f32.mrb[53].mxu0  ;;  %v3735_v60 = vpack.c.bf16 %v5588_v24, %v5588_v24  ;;  %v5855_v24 = vld [vmem:[%s7573_s13 + $0x94] ss:$8 sps:$4 sm:$0xff]  }
0x1186   : > { %v5589_v38 = vpop.f32.mrb[54].mxu0 }
0x1187   : > { %v3662_v43 = vpop.f32.mrb[55].mxu0  ;;  %v5853_v38 = vld [vmem:[%s7573_s13 + $0x90] ss:$8 sps:$4 sm:$0xff]  }
0x1188   : > { %v3734_v34 = vpack.c.bf16 %v3662_v43, %v3659_v37  ;;  %v5580_v55 = vpop.f32.mrb[68].mxu1  ;;  %v5850_v37 = vld [vmem:[%s7571_s11 + $0x90] ss:$8 sps:$4 sm:$0xff]  }
0x1189   : > { %v3602_v59 = vpop.f32.mrb[69].mxu1  ;;  %v3733_v32 = vpack.c.bf16 %v5580_v55, %v5580_v55 }
0x118a   : > { %v5581_v27 = vpop.f32.mrb[70].mxu1  ;;  %5618 = vmatprep.mubr.msk.bf16.mxu0 %vm1108_vm1, %v3734_v34 }
0x118b   : > { %v3605_v61 = vpop.f32.mrb[71].mxu1  ;;  %5619 = vmatmul.mubr.msk.bf16.vlgmr.msra.gmra.mrb[60].mxu0 %vm1108_vm1, %v3735_v60 }
0x118c   : > { %v3732_v29 = vpack.c.bf16 %v3605_v61, %v3602_v59  ;;  %4247 = vmatprep.mubr.bf16.mxu0 %v6152_v57 }
0x118e   : > { %5610 = vmatprep.mubr.msk.bf16.mxu1 %vm1108_vm1, %v3732_v29 }
0x118f   : > { %5611 = vmatmul.mubr.msk.bf16.vlgmr.msra.gmra.mrb[76].mxu1 %vm1108_vm1, %v3733_v32 }
0x1190   : > { %5623 = vmatpush3.bf16.msra.mxu1 %v5842_v2  ;;  %v5596_v35 = vpop.f32.mrb[72].mxu1 }
0x1191   : > { %v3716_v17 = vpop.f32.mrb[73].mxu1  ;;  %5624 = vmatprep.subr.bf16.mxu1 %v5843_v14  ;;  %v3737_v62 = vpack.c.bf16 %v5596_v35, %v5596_v35 }
0x1192   : > { %v5597_v47 = vpop.f32.mrb[74].mxu1 }
0x1193   : > { %v3719_v40 = vpop.f32.mrb[75].mxu1 }
0x1194   : > { %v3736_v39 = vpack.c.bf16 %v3719_v40, %v3716_v17  ;;  %5625 = vmatpush3.bf16.msra.mxu1 %v5843_v14  ;;  %v5858_v40 = vld [vmem:[%s7571_s11 + $0xa4] ss:$8 sps:$4 sm:$0xff]  }
0x1195   : > { %4376 = vmatprep.subr.bf16.mxu1 %v5849_v36  ;;  %v5071_v36 = vld [vmem:[%s7570_s10 + $0x1] ss:$0 sm:$0xff] }
0x1196   : > { %5626 = vmatprep.mubr.msk.bf16.mxu1 %vm1108_vm1, %v3736_v39  ;;  %v5861_v39 = vld [vmem:[%s7573_s13 + $0xa4] ss:$8 sps:$4 sm:$0xff]  }
0x1197   : > { %5627 = vmatmul.mubr.msk.bf16.vlgmr.msra.gmra.mrb[80].mxu1 %vm1108_vm1, %v3737_v62  ;;  %v5856_v62 = vld [vmem:[%s7571_s11 + $0xa0] ss:$8 sps:$4 sm:$0xff]  }
0x1198   : > { %4408 = vmatprep.mubr.bf16.mxu1 %v6152_v57 }
0x11fd   : > { %v5604_v45 = vpop.f32.mrb[56].mxu0 }
0x11fe   : > { %v3807_v1 = vpop.f32.mrb[57].mxu0  ;;  %v4025_v0 = vsel %vm728_vm0, %v5604_v45, 0.0  ;;  %v5859_v45 = vld [vmem:[%s7573_s13 + $0xa0] ss:$8 sps:$4 sm:$0xff]  }
0x11ff   : > { %v5605_v44 = vpop.f32.mrb[58].mxu0 }
0x1200   : > { %v3810_v50 = vpop.f32.mrb[59].mxu0  ;;  %v5867_v44 = vld [vmem:[%s7573_s13 + $0xb4] ss:$8 sps:$4 sm:$0xff]  }
0x125e   : > { %v5620_v26 = vpop.f32.mrb[60].mxu0 }
0x125f   : > { %v3939_v49 = vpop.f32.mrb[61].mxu0  ;;  %v4028_v16 = vsel %vm728_vm0, %v5620_v26, 0.0  ;;  %v5865_v26 = vld [vmem:[%s7573_s13 + $0xb0] ss:$8 sps:$4 sm:$0xff]  }
0x1260   : > { %v5621_v58 = vpop.f32.mrb[62].mxu0 }
0x1261   : > { %v3942_v63 = vpop.f32.mrb[63].mxu0  ;;  %v5873_v58 = vld [vmem:[%s7573_s13 + $0xc4] ss:$8 sps:$4 sm:$0xff]  }
0x1262   : > { %v5612_v51 = vpop.f32.mrb[76].mxu1 }
0x1263   : > { %v4026_v56 = vsel %vm728_vm0, %v5612_v51, 0.0  ;;  %v3873_v8 = vpop.f32.mrb[77].mxu1  ;;  %v5871_v51 = vld [vmem:[%s7573_s13 + $0xc0] ss:$8 sps:$4 sm:$0xff]  }
0x1264   : > { %v4027_v52 = vadd.f32 %v4026_v56, %v4025_v0  ;;  %v4019_v10 = vadd.f32 %v3873_v8, %v3807_v1  ;;  %v5613_v13 = vpop.f32.mrb[78].mxu1  ;;  %v5864_v1 = vld [vmem:[%s7571_s11 + $0xb4] ss:$8 sps:$4 sm:$0xff]   ;;  %v5874_v8 = vld [vmem:[%s7571_s11 + $0xd0] ss:$8 sps:$4 sm:$0xff]  }
0x1265   : > { %v3876_v4 = vpop.f32.mrb[79].mxu1  ;;  %v5876_v0 = vld [vmem:[%s7571_s11 + $0xd4] ss:$8 sps:$4 sm:$0xff]   ;;  %v5885_v13 = vld [vmem:[%s7573_s13 + $0xe4] ss:$8 sps:$4 sm:$0xff]  }
0x1266   : > { %v4022_v19 = vadd.f32 %v3876_v4, %v3810_v50  ;;  %v4029_v6 = vadd.f32 %v4028_v16, %v4027_v52  ;;  %v4020_v18 = vadd.f32 %v4019_v10, %v3939_v49  ;;  %v5862_v50 = vld [vmem:[%s7571_s11 + $0xb0] ss:$8 sps:$4 sm:$0xff]   ;;  %v5870_v49 = vld [vmem:[%s7571_s11 + $0xc4] ss:$8 sps:$4 sm:$0xff]   ;;  %v5879_v56 = vld [vmem:[%s7573_s13 + $0xd4] ss:$8 sps:$4 sm:$0xff]  }
0x1267   : > { %v5877_v52 = vld [vmem:[%s7573_s13 + $0xd0] ss:$8 sps:$4 sm:$0xff]   ;;  %v5882_v10 = vld [vmem:[%s7571_s11 + $0xe4] ss:$8 sps:$4 sm:$0xff]   ;;  %v5880_v16 = vld [vmem:[%s7571_s11 + $0xe0] ss:$8 sps:$4 sm:$0xff]  }
0x1268   : > { %v4023_v23 = vadd.f32 %v4022_v19, %v3942_v63  ;;  %v5868_v63 = vld [vmem:[%s7571_s11 + $0xc0] ss:$8 sps:$4 sm:$0xff]   ;;  %v5888_v19 = vld [vmem:[%s7571_s11 + $0xf4] ss:$8 sps:$4 sm:$0xff]  }
0x1269   : > { %v5883_v4 = vld [vmem:[%s7573_s13 + $0xe0] ss:$8 sps:$4 sm:$0xff]  }
0x126a   : > { %v5628_v46 = vpop.f32.mrb[80].mxu1 }
0x126b   : > { %v4030_v3 = vsel %vm728_vm0, %v5628_v46, 0.0  ;;  %v4005_v15 = vpop.f32.mrb[81].mxu1 }
0x126c   : > { %v4031_v20 = vadd.f32 %v4030_v3, %v4029_v6  ;;  %v4021_v21 = vadd.f32 %v4020_v18, %v4005_v15  ;;  %v5629_v11 = vpop.f32.mrb[82].mxu1  ;;  %v5891_v6 = vld [vmem:[%s7573_s13 + $0xf4] ss:$8 sps:$4 sm:$0xff]   ;;  %v5886_v18 = vld [vmem:[%s7571_s11 + $0xf0] ss:$8 sps:$4 sm:$0xff]  }
0x126d   : > { %v4008_v25 = vpop.f32.mrb[83].mxu1 }
0x126e   : > { %v4034_v54 = vadd.f32 %v4031_v20, %v6941_v42  ;;  %v4032_v53 = vadd.f32 %v4021_v21, %v6934_v41  ;;  %v4024_v2 = vadd.f32 %v4023_v23, %v4008_v25  ;;  %v5844_v41 = vld [vmem:[%s7571_s11 + $0x80] ss:$8 sps:$4 sm:$0xff]   ;;  %v5889_v23 = vld [vmem:[%s7573_s13 + $0xf0] ss:$8 sps:$4 sm:$0xff]  }
0x126f   : > { %v5847_v42 = vld [vmem:[%s7573_s13 + $0x80] ss:$8 sps:$4 sm:$0xff]  }
0x1270   : > { %v4033_v12 = vadd.f32 %v4024_v2, %v6937_v22  ;;  %v7257_v5 = vadd.f32 %v5067_v28, %v4032_v53  ;;  %v7259_v7 = vadd.f32 %v5067_v28, %v4034_v54  ;;  %v5846_v22 = vld [vmem:[%s7571_s11 + $0x84] ss:$8 sps:$4 sm:$0xff]   ;;  %4377 = vmatpush1.bf16.msra.mxu1 %v5847_v42 }
0x1271   : > { %4215 = vmatprep.subr.bf16.mxu0 %v5846_v22  ;;  %4378 = vmatprep.subr.bf16.mxu1 %v5855_v24 }
0x1272   : > { %4050 = vadd.xlane.f32.xlu0 %v7257_v5  ;;  %v7262_v9 = vadd.f32 %v5067_v28, %v4033_v12  ;;  %v4054_v33 = vsel %vm728_vm0, %v7259_v7, 0.0  ;;  %4216 = vmatpush1.bf16.msra.mxu0 %v5844_v41  ;;  %v5070_v12 = vld [vmem:[%s7569_s9 + $0x1] ss:$0 sm:$0xff] }
0x1273   : > { %4217 = vmatprep.subr.bf16.mxu0 %v5852_v48 }
0x1274   : > { %4052 = vadd.xlane.f32.xlu1 %v7262_v9  ;;  %4379 = vmatpush1.bf16.msra.mxu1 %v5853_v38 }
0x1275   : > { %4380 = vmatprep.subr.bf16.mxu1 %v5861_v39 }
0x1276   : > { %4055 = vadd.xlane.f32.xlu0 %v4054_v33  ;;  %4218 = vmatpush1.bf16.msra.mxu0 %v5850_v37 }
0x1277   : > { %4219 = vmatprep.subr.bf16.mxu0 %v5858_v40 }
0x1278   : > { %4381 = vmatpush1.bf16.msra.mxu1 %v5859_v45 }
0x1279   : > { %4382 = vmatprep.subr.bf16.mxu1 %v5867_v44 }
0x127a   : > { %4220 = vmatpush1.bf16.msra.mxu0 %v5856_v62 }
0x127b   : > { %4221 = vmatprep.subr.bf16.mxu0 %v5864_v1 }
0x127c   : > { %4383 = vmatpush1.bf16.msra.mxu1 %v5865_v26 }
0x127d   : > { %4384 = vmatprep.subr.bf16.mxu1 %v5873_v58 }
0x127e   : > { %4222 = vmatpush1.bf16.msra.mxu0 %v5862_v50 }
0x127f   : > { %4223 = vmatprep.subr.bf16.mxu0 %v5870_v49 }
0x1280   : > { %4385 = vmatpush1.bf16.msra.mxu1 %v5871_v51 }
0x1281   : > { %4386 = vmatprep.subr.bf16.mxu1 %v5879_v56 }
0x1282   : > { %4224 = vmatpush1.bf16.msra.mxu0 %v5868_v63 }
0x1283   : > { %4225 = vmatprep.subr.bf16.mxu0 %v5876_v0 }
0x1284   : > { %4387 = vmatpush1.bf16.msra.mxu1 %v5877_v52 }
0x1285   : > { %4388 = vmatprep.subr.bf16.mxu1 %v5885_v13 }
0x1286   : > { %4226 = vmatpush1.bf16.msra.mxu0 %v5874_v8 }
0x1287   : > { %4227 = vmatprep.subr.bf16.mxu0 %v5882_v10 }
0x1288   : > { %4389 = vmatpush1.bf16.msra.mxu1 %v5883_v4 }
0x1289   : > { %4390 = vmatprep.subr.bf16.mxu1 %v5891_v6 }
0x128a   : > { %4228 = vmatpush1.bf16.msra.mxu0 %v5880_v16 }
0x128b   : > { %4229 = vmatprep.subr.bf16.mxu0 %v5888_v19 }
0x128c   : > { %4391 = vmatpush1.bf16.msra.mxu1 %v5889_v23 }
0x128e   : > { %4230 = vmatpush1.bf16.msra.mxu0 %v5886_v18 }
0x12ff   : > { %v4051_v43 = vpop.xlane.xlu0 %4050 }
0x1300   : > { %v4057_v34 = vmul.f32 0.0078125, %v4051_v43 }
0x1301   : > { %v4053_v55 = vpop.xlane.xlu1 %4052 }
0x1302   : > { %v7292_v60 = vsub.f32 %v7257_v5, %v4057_v34  ;;  %v4058_v59 = vmul.f32 0.0078125, %v4053_v55 }
0x1303   : > { %v4056_v27 = vpop.xlane.xlu0 %4055 }
0x1304   : > { %v7295_v61 = vsub.f32 %v7262_v9, %v4058_v59  ;;  %v4059_v29 = vmul.f32 0.0078125, %v4056_v27  ;;  %v4063_v32 = vmul.f32 %v7292_v60, %v7292_v60  ;;  %v5088_v59 = vld [vmem:[%s7572_s12 + $0x2] sm:$0x3] }
0x1305   : > { %v4128_v27 = vrot.slane %v5088_v59, %v6461_v30 }
0x1306   : > { %v7300_v14 = vsub.f32 %v7259_v7, %v4059_v29  ;;  %4066 = vadd.xlane.f32.xlu0 %v4063_v32  ;;  %v4064_v35 = vmul.f32 %v7295_v61, %v7295_v61 }
0x1308   : > { %v4065_v17 = vmul.f32 %v7300_v14, %v7300_v14 }
0x130a   : > { %4068 = vadd.xlane.f32.xlu0 %v4064_v35  ;;  %v4070_v47 = vsel %vm728_vm0, %v4065_v17, 0.0 }
0x130b   : > { %4071 = vadd.xlane.f32.xlu1 %v4070_v47 }
0x1393   : > { %v4067_v46 = vpop.xlane.xlu0 %4066 }
0x1394   : > { %v4073_v3 = vmul.f32 0.0078125, %v4067_v46 }
0x1396   : > { %v4076_v15 = vadd.f32 1e-06, %v4073_v3 }
0x1397   : > { %v4069_v20 = vpop.xlane.xlu0 %4068 }
0x1398   : > { %6052 = vrsqrt.f32 %v4076_v15  ;;  %v4074_v21 = vmul.f32 0.0078125, %v4069_v20  ;;  %v4072_v11 = vpop.xlane.xlu1 %4071 }
0x1399   : > { %v4075_v28 = vmul.f32 0.0078125, %v4072_v11 }
0x139a   : > { %v4077_v25 = vadd.f32 1e-06, %v4074_v21 }
0x139b   : > { %v4078_v54 = vadd.f32 1e-06, %v4075_v28 }
0x139c   : > { %6054 = vrsqrt.f32 %v4077_v25 }
0x139d   : > { %6056 = vrsqrt.f32 %v4078_v54 }
0x13a2   : > { %v6053_v53 = vpop.eup %6052 }
0x13a3   : > { %v4082_v2 = vmul.f32 %v6053_v53, %v7292_v60 }
0x13a5   : > { %v4091_v42 = vmul.f32 %v5070_v12, %v4082_v2 }
0x13a6   : > { %v6055_v33 = vpop.eup %6054 }
0x13a7   : > { %v6057_v41 = vpop.eup %6056  ;;  %v4083_v22 = vmul.f32 %v6055_v33, %v7295_v61  ;;  %v4100_v37 = vadd.f32 %v5071_v36, %v4091_v42  ;;  %v4132_v61 = vrot.slane %v5088_v59, %v6464_v31 }
0x13a8   : > { %v4084_v24 = vmul.f32 %v6057_v41, %v7300_v14 }
0x13a9   : > { %v4092_v48 = vmul.f32 %v5070_v12, %v4083_v22 }
0x13aa   : > { %v4093_v34 = vmul.f32 %v5070_v12, %v4084_v24  ;;  %v5121_v12 = vld [vmem:[%s7574_s14 + $0x2] sm:$0x3] }
0x13ab   : > { %v4101_v38 = vadd.f32 %v5071_v36, %v4092_v48  ;;  %v4289_v42 = vrot.slane %v5121_v12, %v6461_v30  ;;  %v4293_v48 = vrot.slane %v5121_v12, %v6464_v31 }
0x13ac   : > { %v4102_v55 = vadd.f32 %v5071_v36, %v4093_v34 }
0x13ad   : > { %v4103_v43 = vpack.c.bf16 %v4101_v38, %v4100_v37 }
0x13ae   : > { %v4104_v60 = vpack.c.bf16 %v4102_v55, %v4102_v55 }
0x13af   : > { %4248 = vmatmul.mubr.bf16.vlgmr.msra.gmra.mrb[64].mxu0 %v4103_v43  ;;  %4409 = vmatmul.mubr.bf16.vlgmr.msra.gmra.mrb[84].mxu1 %v4103_v43 }
0x13b0   : > { %4257 = vmatprep.mubr.bf16.mxu0 %v6152_v57  ;;  %4418 = vmatprep.mubr.bf16.mxu1 %v6152_v57 }
0x13b7   : > { %4258 = vmatmul.mubr.bf16.gmra.mrb[68].mxu0 %v4104_v60  ;;  %4419 = vmatmul.mubr.bf16.gmra.mrb[88].mxu1 %v4104_v60 }
0x1482   : > { %v4249_v29 = vpop.f32.mrb[64].mxu0  ;;  %v7395_v32 = vpop.f32.mrb[84].mxu1 }
0x1483   : > { %v4250_v14 = vadd.f32 %v4249_v29, %v4128_v27  ;;  %v4251_v35 = vpop.f32.mrb[65].mxu0  ;;  %v7397_v17 = vpop.f32.mrb[85].mxu1  ;;  %v4411_v43 = vadd.f32 %v7395_v32, %v4289_v42 }
0x1484   : > { %v4252_v57 = vadd.f32 %v4251_v35, %v4132_v61  ;;  %v4253_v47 = vpop.f32.mrb[66].mxu0  ;;  %v7399_v40 = vpop.f32.mrb[86].mxu1  ;;  %v4413_v60 = vadd.f32 %v7397_v17, %v4293_v48 }
0x1485   : > { %v4427_v39 = vsub.f32 0.0, %v4250_v14  ;;  %v4254_v62 = vadd.f32 %v4253_v47, %v4128_v27  ;;  %v4255_v45 = vpop.f32.mrb[67].mxu0  ;;  %v7401_v1 = vpop.f32.mrb[87].mxu1  ;;  %v4415_v29 = vadd.f32 %v7399_v40, %v4289_v42 }
0x1486   : > { %v4428_v44 = vsub.f32 0.0, %v4252_v57  ;;  %v4256_v50 = vadd.f32 %v4255_v45, %v4132_v61 }
0x1487   : > { %v4433_v26 = vmul.f32 1.442695, %v4427_v39  ;;  %v4429_v49 = vsub.f32 0.0, %v4254_v62  ;;  %v4417_v39 = vadd.f32 %v7401_v1, %v4293_v48  ;;  %v5892_v1 = vld [vmem:[%s7577_s17 + $0xc0] sm:$0xff]  }
0x1488   : > { %v4435_v58 = vmul.f32 1.442695, %v4428_v44  ;;  %v4430_v63 = vsub.f32 0.0, %v4256_v50  ;;  %5350 = vmatprep.subr.bf16.mxu0 %v5892_v1 }
0x1489   : > { %6058 = vpow2.f32 %v4433_v26  ;;  %v4437_v51 = vmul.f32 1.442695, %v4429_v49 }
0x148a   : > { %6060 = vpow2.f32 %v4435_v58  ;;  %v4439_v0 = vmul.f32 1.442695, %v4430_v63  ;;  %v4259_v56 = vpop.f32.mrb[68].mxu0  ;;  %v4420_v8 = vpop.f32.mrb[88].mxu1 }
0x148b   : > { %6062 = vpow2.f32 %v4437_v51  ;;  %v4260_v52 = vadd.f32 %v4259_v56, %v4128_v27  ;;  %v4261_v10 = vpop.f32.mrb[69].mxu0  ;;  %v4422_v13 = vpop.f32.mrb[89].mxu1  ;;  %v5893_v56 = vld [vmem:[%s7577_s17 + $0x80] sm:$0xff]  }
0x148c   : > { %6064 = vpow2.f32 %v4439_v0  ;;  %v4262_v16 = vadd.f32 %v4261_v10, %v4132_v61  ;;  %v4263_v4 = vpop.f32.mrb[70].mxu0  ;;  %v4424_v19 = vpop.f32.mrb[90].mxu1  ;;  %v4423_v17 = vadd.f32 %v4422_v13, %v4293_v48  ;;  %5351 = vmatpush3.bf16.msra.mxu0 %v5893_v56  ;;  %v5898_v48 = vld [vmem:[%s7577_s17 + $0xd8] sm:$0xff]  }
0x148d   : > { %v4431_v6 = vsub.f32 0.0, %v4260_v52  ;;  %v4264_v18 = vpop.f32.mrb[71].mxu0  ;;  %v4425_v23 = vpop.f32.mrb[91].mxu1 }
0x148e   : > { %v4432_v46 = vsub.f32 0.0, %v4262_v16 }
0x148f   : > { %v4441_v3 = vmul.f32 1.442695, %v4431_v6 }
0x1490   : > { %v4443_v15 = vmul.f32 1.442695, %v4432_v46 }
0x1491   : > { %6066 = vpow2.f32 %v4441_v3 }
0x1492   : > { %6068 = vpow2.f32 %v4443_v15 }
0x1493   : > { %v6059_v20 = vpop.eup %6058 }
0x1494   : > { %v6061_v21 = vpop.eup %6060  ;;  %v4445_v11 = vadd.f32 1.0, %v6059_v20 }
0x1495   : > { %v6063_v28 = vpop.eup %6062  ;;  %v4446_v25 = vadd.f32 1.0, %v6061_v21 }
0x1496   : > { %v6065_v54 = vpop.eup %6064  ;;  %6070 = vrcp.f32 %v4445_v11  ;;  %v4447_v53 = vadd.f32 1.0, %v6063_v28 }
0x1497   : > { %6072 = vrcp.f32 %v4446_v25  ;;  %v4448_v2 = vadd.f32 1.0, %v6065_v54 }
0x1498   : > { %6074 = vrcp.f32 %v4447_v53 }
0x1499   : > { %6076 = vrcp.f32 %v4448_v2 }
0x149b   : > { %v6067_v33 = vpop.eup %6066 }
0x149c   : > { %v6069_v41 = vpop.eup %6068  ;;  %v4449_v22 = vadd.f32 1.0, %v6067_v33 }
0x149d   : > { %v4450_v36 = vadd.f32 1.0, %v6069_v41 }
0x149e   : > { %6078 = vrcp.f32 %v4449_v22 }
0x149f   : > { %6080 = vrcp.f32 %v4450_v36  ;;  %v5897_v36 = vld [vmem:[%s7577_s17 + $0x90] sm:$0xff]  }
0x14a0   : > { %v6071_v24 = vpop.eup %6070 }
0x14a1   : > { %v6073_v37 = vpop.eup %6072  ;;  %v4457_v38 = vmul.f32 %v6071_v24, %v4250_v14  ;;  %v5899_v24 = vld [vmem:[%s7577_s17 + $0x98] sm:$0xff]  }
0x14a2   : > { %v6075_v34 = vpop.eup %6074  ;;  %v4458_v55 = vmul.f32 %v6073_v37, %v4252_v57  ;;  %v4421_v57 = vadd.f32 %v4420_v8, %v4289_v42  ;;  %v5894_v8 = vld [vmem:[%s7577_s17 + $0xc8] sm:$0xff]   ;;  %v5896_v42 = vld [vmem:[%s7577_s17 + $0xd0] sm:$0xff]   ;;  %v5900_v37 = vld [vmem:[%s7577_s17 + $0xe0] sm:$0xff]  }
0x14a3   : > { %v6077_v59 = vpop.eup %6076  ;;  %v4463_v27 = vmul.f32 %v4457_v38, %v4411_v43  ;;  %v4459_v61 = vmul.f32 %v6075_v34, %v4254_v62  ;;  %5352 = vmatprep.subr.bf16.mxu0 %v5894_v8  ;;  %v5901_v38 = vld [vmem:[%s7577_s17 + $0xa0] sm:$0xff]   ;;  %v5902_v43 = vld [vmem:[%s7577_s17 + $0xe8] sm:$0xff]  }
0x14a4   : > { %v4464_v35 = vmul.f32 %v4458_v55, %v4413_v60  ;;  %v4460_v47 = vmul.f32 %v6077_v59, %v4256_v50  ;;  %v5903_v34 = vld [vmem:[%s7577_s17 + $0xa8] sm:$0xff]   ;;  %v5904_v55 = vld [vmem:[%s7577_s17 + $0xf0] sm:$0xff]   ;;  %v5906_v59 = vld [vmem:[%s7577_s17 + $0xf8] sm:$0xff]  }
0x14a5   : > { %v4465_v45 = vmul.f32 %v4459_v61, %v4415_v29  ;;  %v5905_v60 = vld [vmem:[%s7577_s17 + $0xb0] sm:$0xff]  }
0x14a6   : > { %v4466_v44 = vmul.f32 %v4460_v47, %v4417_v39  ;;  %v4473_v26 = vadd.f32 %v4464_v35, %v4463_v27 }
0x14a8   : > { %v6079_v49 = vpop.eup %6078  ;;  %4474 = vadd.xlane.f32.xlu0 %v4473_v26  ;;  %v4476_v14 = vadd.f32 %v4466_v44, %v4465_v45 }
0x14a9   : > { %v6081_v32 = vpop.eup %6080  ;;  %v4461_v58 = vmul.f32 %v6079_v49, %v4260_v52  ;;  %v5895_v52 = vld [vmem:[%s7577_s17 + $0x88] sm:$0xff]   ;;  %v5138_v49 = vld [vmem:[%s7575_s15 + $0x2] sm:$0x3] }
0x14aa   : > { %v4462_v63 = vmul.f32 %v6081_v32, %v4262_v16  ;;  %4477 = vadd.xlane.f32.xlu1 %v4476_v14  ;;  %5353 = vmatpush3.bf16.msra.mxu0 %v5895_v52  ;;  %v5139_v32 = vld [vmem:[%s7576_s16 + $0x2] sm:$0x3] }
0x14ab   : > { %v4467_v51 = vmul.f32 %v4461_v58, %v4421_v57  ;;  %5354 = vmatprep.subr.bf16.mxu0 %v5896_v42  ;;  %v4529_v58 = vrot.slane %v5138_v49, %v6461_v30  ;;  %v4533_v57 = vrot.slane %v5138_v49, %v6464_v31 }
0x14ac   : > { %v4468_v62 = vmul.f32 %v4462_v63, %v4423_v17 }
0x14ad   : > { %v4479_v40 = vsel %vm728_vm0, %v4467_v51, 0.0 }
0x14ae   : > { %v4480_v50 = vsel %vm728_vm0, %v4468_v62, 0.0  ;;  %5355 = vmatpush3.bf16.msra.mxu0 %v5897_v36 }
0x14af   : > { %v4481_v0 = vadd.f32 %v4480_v50, %v4479_v40  ;;  %5356 = vmatprep.subr.bf16.mxu0 %v5898_v48  ;;  %v4546_v40 = vrot.slane %v5139_v32, %v6461_v30  ;;  %v4550_v50 = vrot.slane %v5139_v32, %v6464_v31 }
0x14b1   : > { %4482 = vadd.xlane.f32.xlu0 %v4481_v0 }
0x14b2   : > { %5357 = vmatpush3.bf16.msra.mxu0 %v5899_v24 }
0x14b3   : > { %5358 = vmatprep.subr.bf16.mxu0 %v5900_v37 }
0x14b6   : > { %5359 = vmatpush3.bf16.msra.mxu0 %v5901_v38 }
0x14b7   : > { %5360 = vmatprep.subr.bf16.mxu0 %v5902_v43 }
0x14ba   : > { %5361 = vmatpush3.bf16.msra.mxu0 %v5903_v34 }
0x14bb   : > { %5362 = vmatprep.subr.bf16.mxu0 %v5904_v55 }
0x14be   : > { %5363 = vmatpush3.bf16.msra.mxu0 %v5905_v60 }
0x14bf   : > { %5364 = vmatprep.subr.bf16.mxu0 %v5906_v59 }
0x1535   : > { %v4475_v10 = vpop.xlane.xlu0 %4474 }
0x1536   : > { %v4484_v13 = vmul.f32 0.00390625, %v4475_v10 }
0x1537   : > { %v4478_v16 = vpop.xlane.xlu1 %4477 }
0x1538   : > { %v7426_v4 = vsub.f32 %v4463_v27, %v4484_v13  ;;  %v7428_v19 = vsub.f32 %v4464_v35, %v4484_v13  ;;  %v4485_v6 = vmul.f32 0.00390625, %v4478_v16  ;;  %v5907_v27 = vld [vmem:[%s7577_s17 + $0xb8] sm:$0xff]  }
0x1539   : > { %5365 = vmatpush3.bf16.msra.mxu0 %v5907_v27 }
0x153a   : > { %v4493_v18 = vmul.f32 %v7426_v4, %v7426_v4  ;;  %v4494_v23 = vmul.f32 %v7428_v19, %v7428_v19  ;;  %v7434_v46 = vsub.f32 %v4465_v45, %v4485_v6  ;;  %v7436_v3 = vsub.f32 %v4466_v44, %v4485_v6 }
0x153c   : > { %v4495_v15 = vmul.f32 %v7434_v46, %v7434_v46  ;;  %v4496_v20 = vmul.f32 %v7436_v3, %v7436_v3  ;;  %v4499_v21 = vadd.f32 %v4494_v23, %v4493_v18 }
0x153e   : > { %4500 = vadd.xlane.f32.xlu1 %v4499_v21  ;;  %v4483_v11 = vpop.xlane.xlu0 %4482  ;;  %v4502_v28 = vadd.f32 %v4496_v20, %v4495_v15 }
0x153f   : > { %v4486_v25 = vmul.f32 0.00390625, %v4483_v11 }
0x1540   : > { %4503 = vadd.xlane.f32.xlu0 %v4502_v28 }
0x1541   : > { %v7442_v54 = vsub.f32 %v4467_v51, %v4486_v25  ;;  %v7444_v53 = vsub.f32 %v4468_v62, %v4486_v25 }
0x1543   : > { %v4497_v2 = vmul.f32 %v7442_v54, %v7442_v54  ;;  %v4498_v12 = vmul.f32 %v7444_v53, %v7444_v53 }
0x1545   : > { %v4505_v33 = vsel %vm728_vm0, %v4497_v2, 0.0  ;;  %v4506_v41 = vsel %vm728_vm0, %v4498_v12, 0.0 }
0x1546   : > { %v4507_v22 = vadd.f32 %v4506_v41, %v4505_v33 }
0x1548   : > { %4508 = vadd.xlane.f32.xlu1 %v4507_v22 }
0x15cb   : > { %v4501_v61 = vpop.xlane.xlu1 %4500 }
0x15cc   : > { %v4510_v29 = vmul.f32 0.00390625, %v4501_v61 }
0x15cd   : > { %v4504_v35 = vpop.xlane.xlu0 %4503 }
0x15ce   : > { %v4513_v47 = vadd.f32 1e-06, %v4510_v29  ;;  %v4511_v39 = vmul.f32 0.00390625, %v4504_v35 }
0x15d0   : > { %6082 = vrsqrt.f32 %v4513_v47  ;;  %v4514_v45 = vadd.f32 1e-06, %v4511_v39 }
0x15d2   : > { %6084 = vrsqrt.f32 %v4514_v45 }
0x15d5   : > { %v4509_v44 = vpop.xlane.xlu1 %4508 }
0x15d6   : > { %v4512_v26 = vmul.f32 0.00390625, %v4509_v44 }
0x15d8   : > { %v4515_v14 = vadd.f32 1e-06, %v4512_v26 }
0x15da   : > { %v6083_v63 = vpop.eup %6082  ;;  %6086 = vrsqrt.f32 %v4515_v14 }
0x15db   : > { %v4519_v17 = vmul.f32 %v6083_v63, %v7426_v4  ;;  %v4520_v51 = vmul.f32 %v6083_v63, %v7428_v19 }
0x15dc   : > { %v6085_v62 = vpop.eup %6084 }
0x15dd   : > { %v4521_v0 = vmul.f32 %v6085_v62, %v7434_v46  ;;  %v4522_v1 = vmul.f32 %v6085_v62, %v7436_v3  ;;  %v4537_v56 = vmul.f32 %v4533_v57, %v4520_v51  ;;  %v4536_v8 = vmul.f32 %v4529_v58, %v4519_v17 }
0x15df   : > { %v4539_v52 = vmul.f32 %v4533_v57, %v4522_v1  ;;  %v4538_v10 = vmul.f32 %v4529_v58, %v4521_v0  ;;  %v4554_v13 = vadd.f32 %v4550_v50, %v4537_v56  ;;  %v4553_v6 = vadd.f32 %v4546_v40, %v4536_v8 }
0x15e1   : > { %v4556_v16 = vadd.f32 %v4550_v50, %v4539_v52  ;;  %v4555_v18 = vadd.f32 %v4546_v40, %v4538_v10 }
0x15e3   : > { %v4560_v4 = vpack.c.bf16 %v4556_v16, %v4554_v13  ;;  %v4559_v19 = vpack.c.bf16 %v4555_v18, %v4553_v6 }
0x15e4   : > { %v6087_v23 = vpop.eup %6086 }
0x15e5   : > { %4724 = vmatprep.mubr.bf16.mxu0 %v4560_v4  ;;  %v4524_v30 = vmul.f32 %v6087_v23, %v7444_v53  ;;  %v4523_v31 = vmul.f32 %v6087_v23, %v7442_v54  ;;  %v5189_v53 = vld [vmem:[%s7578_s18 + $0x1] ss:$0 sm:$0xff] }
0x15e6   : > { %4725 = vmatmul.mubr.bf16.vlgmr.msra.gmra.mrb[72].mxu0 %v4559_v19 }
0x15e7   : > { %v4541_v46 = vmul.f32 %v4533_v57, %v4524_v30  ;;  %v4540_v3 = vmul.f32 %v4529_v58, %v4523_v31 }
0x15e9   : > { %v4558_v15 = vadd.f32 %v4550_v50, %v4541_v46  ;;  %v4557_v20 = vadd.f32 %v4546_v40, %v4540_v3 }
0x15eb   : > { %v4562_v21 = vpack.c.bf16 %v4558_v15, %v4558_v15  ;;  %v4561_v11 = vpack.c.bf16 %v4557_v20, %v4557_v20 }
0x15ed   : > { %4732 = vmatprep.mubr.bf16.mxu0 %v4562_v21 }
0x15ee   : > { %4733 = vmatmul.mubr.bf16.gmra.mrb[76].mxu0 %v4561_v11 }
0x16b9   : > { %v5366_v28 = vpop.f32.mrb[72].mxu0 }
0x16ba   : > { %v5367_v25 = vpop.f32.mrb[73].mxu0 }
0x16bb   : > { %v5368_v2 = vadd.f32 %v5367_v25, %v5366_v28  ;;  %v5369_v12 = vpop.f32.mrb[74].mxu0 }
0x16bc   : > { %v5370_v54 = vpop.f32.mrb[75].mxu0 }
0x16bd   : > { %v4740_v33 = vadd.f32 %v5368_v2, %v7257_v5  ;;  %v5371_v41 = vadd.f32 %v5370_v54, %v5369_v12 }
0x16bf   : > { %v4751_v22 = vadd.f32 %v5189_v53, %v4740_v33  ;;  %v4741_v42 = vadd.f32 %v5371_v41, %v7262_v9 }
0x16c1   : > { %4754 = vst [vmem:[%s595_s23 - $0x1] sm:$0xfe] %v4751_v22  ;;  %v4752_v36 = vadd.f32 %v5189_v53, %v4741_v42  ;;  %v5372_v48 = vpop.f32.mrb[76].mxu0 }
0x16c2   : > { %v5373_v24 = vpop.f32.mrb[77].mxu0 }
0x16c3   : > { %4755 = vst [vmem:[%s595_s23 + $0x7] sm:$0xff] %v4752_v36  ;;  %v5374_v37 = vadd.f32 %v5373_v24, %v5372_v48  ;;  %v5375_v38 = vpop.f32.mrb[78].mxu0 }
0x16c4   : > { %v5376_v43 = vpop.f32.mrb[79].mxu0 }
0x16c5   : > { %v4742_v34 = vadd.f32 %v5374_v37, %v7259_v7 }
0x16c7   : > { %v4753_v5 = vadd.f32 %v5189_v53, %v4742_v34 }
0x16c9   : > { %4756 = vst [vmem:[%s595_s23 + $0xf] sm:$0x1] %v4753_v5 }
0x16ca   : > { %6101 = shalt.err (!%p6098_p3)
}
0x16cb   : > { %s6102_s2 = scalar_lea.hbm %s7517_s25, 256  ;;  %s6106_s19 = scalar_lea.hbm %s7619_s27, 512 }
0x16cc   : > { %p6103_p4 = scmp.ne.s32.totalorder %s7517_s25, %s6102_s2  ;;  %p6107_p9 = scmp.lt.u32.totalorder %s7517_s25, %s7619_s27 }
0x16cd   : > { %p6108_p10 = scmp.lt.u32.totalorder %s6106_s19, %s6102_s2  ;;  %p6110_p12 = scmp.lt.u32.totalorder %s6102_s2, %s7517_s25 }
0x16ce   : > { %p6104_p7 = pnand %p6103_p4, %p6297_p5 }
0x16cf   : > { %p6109_p11 = por %p6108_p10, %p6107_p9 }
0x16d0   : > { %p6105_p8 = pneg %p6104_p7 }
0x16d1   : > { %p6111_p13 = por %p6110_p12, %p6109_p11 }
0x16d3   : > { %p6112_p0 = pnand %p6111_p13, %p6105_p8 }
0x16d5   : > { %6115 = shalt.err (!%p6112_p0)
}
0x16d6   : > { %s6157_s4 = smov 128   ;;  %s6158_s26 = smov 8  }
0x16d7   : > { %5647 = dma.vmem_to_hbm [thread:$0]  (%p6297_p5), %s7512_s28, 256, %s7517_s25, %s7519_s21, %s6157_s4, %s6157_s4, %s6158_s26  }
0x16d8 PF: > { %s7620_s22 = sld [smem:[#allocation7_spill]]  ;;  %s7621_s23 = sld [smem:[#allocation5_spill]] }
0x16de   : > { %p5653_p1 = scmp.ge.s32.totalorder %s7620_s22, 2  ;;  %s4786_s0 = sand.u32 1, %s7621_s23  }
0x16df   : > { %s4787_s2 = scalar_lea.sflag [#allocation3], %s4786_s0 }
0x16e0   : > { %p5650_p2 = pnand %p5653_p1, %p6301_p6 }
0x16e2   : > { %6133 = dma.done.wait (!%p5650_p2), %s4787_s2, 256  }
0x16e3   : > { %6135 = vsyncadd (!%p5650_p2), %s4787_s2, 4294967040  ;;  %s7623_s21 = sld [smem:[#allocation8_spill]]  ;;  %s7624_s19 = sld [smem:[#allocation6_spill]] }
0x16e4   : > { %s7625_s20 = sld [smem:[#allocation9_spill]]  ;;  %s7626_s0 = smov %s6142_s30 }
0x16e9   : > { %p29_p3 = scmp.ge.s32.totalorder %s7623_s21, 4   ;;  %s7627_s30 = smov %s7624_s19 }
0x16eb   :  { %31 = sbr.rel (!%p29_p3) target bundleno = 10 (0xa), region = 147 }
0x16f2   :  { %4792 = vsyncpa [#allocation3], 1 }
0x16f3   :  { %4794 = vsyncpa [#allocation3 + $0x1], 1 }

</bundles_post_ra>
